<compile_context>
chip_gen: v7x
topology: tpu7x:2x2x1
jax: 0.10.0
libtpu: 0.0.40
codegen_flags: <defaults>
</compile_context>

<pallas_src>
import jax
import jax.numpy as jnp
from jax.experimental import pallas as pl
from jax.experimental.pallas import tpu as pltpu

EPS = 1e-5          # InstanceNorm eps
NEG_SLOPE = 1e-2    # LeakyReLU negative slope

MID = 92            # conv1 / SEAttention channels (fixed by OMC)
SE_RED = 16         # SE reduction ratio -> hidden dim 92 // 16 = 5
MID_P = 128         # lane-padded channel counts
RD_P = 128
COUT_P = 128
HALO_OFF = 16       # bf16 (16,128)-tile-aligned offset of the image inside the halo scratch


def _leaky(x):
    return jnp.where(x >= 0, x, NEG_SLOPE * x)


def _rows_per_strip(H, W):
    # Largest number of image rows per strip with <= 128 flattened positions (accumulator
    # bounded to <= 16 vregs) that divides H evenly.
    r = max(1, min(H, 128 // max(1, W)))
    while H % r:
        r -= 1
    return r


def _make_omc_kernel(H, W, rows):
    HW = H * W
    spw = rows * W            # flattened positions per strip
    n_strips = H // rows
    inv_hw = 1.0 / float(HW)

    def kernel(p1_ref, xf_ref, w1_ref, g1_ref, b1_ref, wse1_ref, wse2_ref,
               w2p_ref, w2l_ref, g2_ref, b2_ref, wp_ref, gp_ref, bp_ref,
               o_ref, pad_ref, y2_ref):
        f32 = jnp.float32

        # ---- conv1: 3x3 as one small im2col matmul + one-pass InstanceNorm + LeakyReLU ----
        y1 = jnp.dot(p1_ref[...], w1_ref[...], preferred_element_type=f32)   # (HW, MID_P)
        s1 = jnp.sum(y1, axis=0, keepdims=True)
        s2 = jnp.sum(y1 * y1, axis=0, keepdims=True)
        m1 = s1 * inv_hw
        v1 = s2 * inv_hw - m1 * m1
        y1 = _leaky((y1 - m1) * jax.lax.rsqrt(v1 + EPS) * g1_ref[...] + b1_ref[...])

        # ---- SEAttention, fused on the resident tile (exact sigmoid; (1,128) vectors) ----
        gap = (jnp.sum(y1, axis=0, keepdims=True) * inv_hw).astype(jnp.bfloat16)
        z = jnp.dot(gap, wse1_ref[...], preferred_element_type=f32)
        z = jnp.maximum(z, 0.0).astype(jnp.bfloat16)
        a = jnp.dot(z, wse2_ref[...], preferred_element_type=f32)
        gate = 1.0 / (1.0 + jnp.exp(-a))
        y1 = y1 * gate

        # ---- bf16 zero-halo scratch: re-zero only the 1-wide halo ring actually read ----
        # (per-step, not program_id==0-gated: the scratch is per-core and a core may never
        #  execute grid step 0 when the batch axis is megacore-partitioned)
        zrow = jnp.zeros((1, W + 2 * HALO_OFF, MID_P), jnp.bfloat16)
        zcol = jnp.zeros((H, 1, MID_P), jnp.bfloat16)
        pad_ref[0:1, :, :] = zrow
        pad_ref[H + 1:H + 2, :, :] = zrow
        pad_ref[1:H + 1, HALO_OFF - 1:HALO_OFF, :] = zcol
        pad_ref[1:H + 1, HALO_OFF + W:HALO_OFF + W + 1, :] = zcol
        # single f32->bf16 cast, (16,128)-tile-aligned interior store
        pad_ref[1:H + 1, HALO_OFF:HALO_OFF + W, :] = (
            y1.reshape(H, W, MID_P).astype(jnp.bfloat16))

        # ---- conv2 over HW strips: 4 paired K=256 dots + 1 K=128 dot, f32 accumulate ----
        sum2 = jnp.zeros((1, COUT_P), f32)
        ssq2 = jnp.zeros((1, COUT_P), f32)
        sump = jnp.zeros((1, COUT_P), f32)
        ssqp = jnp.zeros((1, COUT_P), f32)
        for s in range(n_strips):
            r0 = s * rows
            lo = s * spw

            def win(k, r0=r0):
                dh, dw = k // 3, k % 3
                c0 = HALO_OFF - 1 + dw
                w = pad_ref[r0 + dh:r0 + dh + rows, c0:c0 + W, :]     # (rows, W, MID_P) bf16
                return w.reshape(spw, MID_P)

            acc = jnp.dot(jnp.concatenate([win(0), win(1)], axis=-1), w2p_ref[0],
                          preferred_element_type=f32)
            for p in range(1, 4):
                acc = acc + jnp.dot(
                    jnp.concatenate([win(2 * p), win(2 * p + 1)], axis=-1),
                    w2p_ref[p], preferred_element_type=f32)
            acc = acc + jnp.dot(win(8), w2l_ref[...], preferred_element_type=f32)

            y2_ref[lo:lo + spw, :] = acc
            sum2 = sum2 + jnp.sum(acc, axis=0, keepdims=True)
            ssq2 = ssq2 + jnp.sum(acc * acc, axis=0, keepdims=True)

            # skip 1x1 projection (K = Cin, tiny): accumulate its IN statistics too
            r = jnp.dot(xf_ref[lo:lo + spw, :], wp_ref[...], preferred_element_type=f32)
            sump = sump + jnp.sum(r, axis=0, keepdims=True)
            ssqp = ssqp + jnp.sum(r * r, axis=0, keepdims=True)

        # ---- one-pass InstanceNorm scale/shift for conv2 and skip paths ----
        m2 = sum2 * inv_hw
        k2 = jax.lax.rsqrt(ssq2 * inv_hw - m2 * m2 + EPS) * g2_ref[...]
        c2 = b2_ref[...] - m2 * k2
        mp = sump * inv_hw
        kp = jax.lax.rsqrt(ssqp * inv_hw - mp * mp + EPS) * gp_ref[...]
        cp = bp_ref[...] - mp * kp

        # ---- residual add + LeakyReLU; lane-dense bf16 strip stores ----
        for s in range(n_strips):
            lo = s * spw
            r = jnp.dot(xf_ref[lo:lo + spw, :], wp_ref[...], preferred_element_type=f32)
            o_ref[lo:lo + spw, :] = _leaky(
                y2_ref[lo:lo + spw, :] * k2 + c2 + r * kp + cp).astype(o_ref.dtype)

    return kernel


def _omc_pallas(p1, x_flat, pp, H, W):
    N, HW, K9 = p1.shape
    cin = x_flat.shape[-1]
    rows = _rows_per_strip(H, W)

    def per_sample(tail):
        return pl.BlockSpec((None,) + tail, lambda n: (n,) + (0,) * len(tail))

    def full(shape):
        return pl.BlockSpec(shape, lambda n: (0,) * len(shape))

    return pl.pallas_call(
        _make_omc_kernel(H, W, rows),
        out_shape=jax.ShapeDtypeStruct((N, HW, COUT_P), jnp.bfloat16),
        grid=(N,),
        in_specs=[
            per_sample((HW, K9)),                        # conv1 im2col patches (bf16)
            per_sample((HW, cin)),                       # x for the skip projection (bf16)
            full((K9, MID_P)),                           # w1 (bf16)
            full((1, MID_P)), full((1, MID_P)),          # gamma1, beta1 (f32)
            full((MID_P, RD_P)), full((RD_P, MID_P)),    # SE fc1, fc2 (bf16)
            full((4, 2 * MID_P, COUT_P)),                # conv2 taps 0..7 paired along K (bf16)
            full((MID_P, COUT_P)),                       # conv2 tap 8 (bf16)
            full((1, COUT_P)), full((1, COUT_P)),        # gamma2, beta2
            full((cin, COUT_P)),                         # skip 1x1 weight (bf16)
            full((1, COUT_P)), full((1, COUT_P)),        # gamma_p, beta_p
        ],
        out_specs=per_sample((HW, COUT_P)),
        scratch_shapes=[
            pltpu.VMEM((H + 2, W + 2 * HALO_OFF, MID_P), jnp.bfloat16),  # zero-halo y1
            pltpu.VMEM((HW, COUT_P), jnp.float32),                       # pre-IN conv2 output
        ],
        compiler_params=pltpu.CompilerParams(dimension_semantics=("parallel",)),
    )(p1, x_flat, pp["w1"], pp["g1"], pp["b1"], pp["wse1"], pp["wse2"],
      pp["w2p"], pp["w2l"], pp["g2"], pp["b2"], pp["wp"], pp["gp"], pp["bp"])


def _im2col_3x3(x_nhwc):
    """3x3, stride 1, pad 1 patch extraction for conv1 only (Cin is tiny)."""
    N, H, W, C = x_nhwc.shape
    xp = jnp.pad(x_nhwc, ((0, 0), (1, 1), (1, 1), (0, 0)))
    cols = [xp[:, dh:dh + H, dw:dw + W, :] for dh in range(3) for dw in range(3)]
    return jnp.concatenate(cols, axis=-1).reshape(N, H * W, 9 * C)


def _pack_params(p):
    """Pad channels to lane-dense 128 with zeros; cast MXU operands to bf16; pair conv2 taps."""
    cin = p["w1"].shape[2]
    cout = p["w2"].shape[3]

    def pad_to(a, shape):
        return jnp.pad(a, [(0, t - s) for s, t in zip(a.shape, shape)])

    def vec(v, n):
        return pad_to(v, (n,)).reshape(1, n)

    w2 = pad_to(p["w2"].reshape(9, MID, cout), (9, MID_P, COUT_P)).astype(jnp.bfloat16)
    return {
        "w1": pad_to(p["w1"].reshape(9 * cin, MID), (9 * cin, MID_P)).astype(jnp.bfloat16),
        "g1": vec(p["g1"], MID_P), "b1": vec(p["b1"], MID_P),
        "wse1": pad_to(p["wse1"], (MID_P, RD_P)).astype(jnp.bfloat16),
        "wse2": pad_to(p["wse2"], (RD_P, MID_P)).astype(jnp.bfloat16),
        "w2p": w2[:8].reshape(4, 2 * MID_P, COUT_P),   # taps (0,1),(2,3),(4,5),(6,7) -> K=256
        "w2l": w2[8],                                  # tap 8 -> K=128
        "g2": vec(p["g2"], COUT_P), "b2": vec(p["b2"], COUT_P),
        "wp": pad_to(p["wp"], (cin, COUT_P)).astype(jnp.bfloat16),
        "gp": vec(p["gp"], COUT_P), "bp": vec(p["bp"], COUT_P),
    }


def init_params(key, cin, cout):
    rd = MID // SE_RED  # 5
    ks = jax.random.split(key, 5)
    s = 0.05
    return {
        "w1": s * jax.random.normal(ks[0], (3, 3, cin, MID), jnp.float32),   # conv1 3x3
        "g1": jnp.ones((MID,), jnp.float32), "b1": jnp.zeros((MID,), jnp.float32),
        "wse1": s * jax.random.normal(ks[1], (MID, rd), jnp.float32),        # SE fc1
        "wse2": s * jax.random.normal(ks[2], (rd, MID), jnp.float32),        # SE fc2
        "w2": s * jax.random.normal(ks[3], (3, 3, MID, cout), jnp.float32),  # conv2 3x3
        "g2": jnp.ones((cout,), jnp.float32), "b2": jnp.zeros((cout,), jnp.float32),
        "wp": s * jax.random.normal(ks[4], (cin, cout), jnp.float32),        # skip 1x1 proj
        "gp": jnp.ones((cout,), jnp.float32), "bp": jnp.zeros((cout,), jnp.float32),
    }


@jax.jit
def omc_forward(x_nchw, params):
    N, cin, H, W = x_nchw.shape
    cout = params["w2"].shape[3]
    x = jnp.transpose(x_nchw, (0, 2, 3, 1)).astype(jnp.bfloat16)   # NCHW -> NHWC, bf16 once
    x_flat = x.reshape(N, H * W, cin)
    p1 = _im2col_3x3(x)                                            # (N, HW, 9*cin) bf16
    pp = _pack_params(params)
    out = _omc_pallas(p1, x_flat, pp, H, W)                        # (N, HW, 128) bf16
    out = out.reshape(N, H, W, COUT_P)[..., :cout].astype(jnp.float32)   # drop lane padding
    # TODO(synk): DropPath (stochastic_depth_p>0) and the optional SqueezeExcite(Cout)
    # branch are disabled in this configuration and therefore not implemented.
    return jnp.transpose(out, (0, 3, 1, 2))                        # back to NCHW


if __name__ == "__main__":
    key = jax.random.PRNGKey(0)
    kx, kp = jax.random.split(key)
    x = jax.random.normal(kx, (2, 4, 16, 16), jnp.float32)   # NCHW
    params = init_params(kp, cin=4, cout=32)
    y = omc_forward(x, params)
    jax.block_until_ready(y)
    assert y.shape == (2, 32, 16, 16)
    assert bool(jnp.all(jnp.isfinite(y)))
    print("KERNEL_OK")
</pallas_src>

<mosaic_0001>
module attributes {stable_mosaic.version = 11 : i64} {
  func.func @kernel(%arg0: i32, %arg1: memref<1x256x36xbf16, #tpu.memory_space<vmem>>, %arg2: memref<1x256x4xbf16, #tpu.memory_space<vmem>>, %arg3: memref<36x128xbf16, #tpu.memory_space<vmem>>, %arg4: memref<1x128xf32, #tpu.memory_space<vmem>>, %arg5: memref<1x128xf32, #tpu.memory_space<vmem>>, %arg6: memref<128x128xbf16, #tpu.memory_space<vmem>>, %arg7: memref<128x128xbf16, #tpu.memory_space<vmem>>, %arg8: memref<4x256x128xbf16, #tpu.memory_space<vmem>>, %arg9: memref<128x128xbf16, #tpu.memory_space<vmem>>, %arg10: memref<1x128xf32, #tpu.memory_space<vmem>>, %arg11: memref<1x128xf32, #tpu.memory_space<vmem>>, %arg12: memref<4x128xbf16, #tpu.memory_space<vmem>>, %arg13: memref<1x128xf32, #tpu.memory_space<vmem>>, %arg14: memref<1x128xf32, #tpu.memory_space<vmem>>, %arg15: memref<1x256x128xbf16, #tpu.memory_space<vmem>>, %arg16: memref<18x48x128xbf16, #tpu.memory_space<vmem>>, %arg17: memref<256x128xf32, #tpu.memory_space<vmem>>) attributes {dimension_semantics = [#tpu.dimension_semantics<parallel>], iteration_bounds = array<i64: 2>, scalar_prefetch = 0 : i64, scratch_operands = 2 : i64, tpu.core_type = #tpu.core_type<tc>, window_params = [{transform_indices = @transform_0, window_bounds = array<i64: 1, 256, 36>}, {transform_indices = @transform_1, window_bounds = array<i64: 1, 256, 4>}, {pipeline_mode = #tpu.pipeline_mode<synchronous>, transform_indices = @transform_2, window_bounds = array<i64: 36, 128>}, {pipeline_mode = #tpu.pipeline_mode<synchronous>, transform_indices = @transform_3, window_bounds = array<i64: 1, 128>}, {pipeline_mode = #tpu.pipeline_mode<synchronous>, transform_indices = @transform_4, window_bounds = array<i64: 1, 128>}, {pipeline_mode = #tpu.pipeline_mode<synchronous>, transform_indices = @transform_5, window_bounds = array<i64: 128, 128>}, {pipeline_mode = #tpu.pipeline_mode<synchronous>, transform_indices = @transform_6, window_bounds = array<i64: 128, 128>}, {pipeline_mode = #tpu.pipeline_mode<synchronous>, transform_indices = @transform_7, window_bounds = array<i64: 4, 256, 128>}, {pipeline_mode = #tpu.pipeline_mode<synchronous>, transform_indices = @transform_8, window_bounds = array<i64: 128, 128>}, {pipeline_mode = #tpu.pipeline_mode<synchronous>, transform_indices = @transform_9, window_bounds = array<i64: 1, 128>}, {pipeline_mode = #tpu.pipeline_mode<synchronous>, transform_indices = @transform_10, window_bounds = array<i64: 1, 128>}, {pipeline_mode = #tpu.pipeline_mode<synchronous>, transform_indices = @transform_11, window_bounds = array<i64: 4, 128>}, {pipeline_mode = #tpu.pipeline_mode<synchronous>, transform_indices = @transform_12, window_bounds = array<i64: 1, 128>}, {pipeline_mode = #tpu.pipeline_mode<synchronous>, transform_indices = @transform_13, window_bounds = array<i64: 1, 128>}, {transform_indices = @transform_14, window_bounds = array<i64: 1, 256, 128>}]} {
    %c0 = arith.constant 0 : index
    %c0_0 = arith.constant 0 : index
    %c0_1 = arith.constant 0 : index
    %0 = vector.load %arg1[%c0, %c0_0, %c0_1] : memref<1x256x36xbf16, #tpu.memory_space<vmem>>, vector<1x256x36xbf16>
    %1 = vector.shape_cast %0 : vector<1x256x36xbf16> to vector<256x36xbf16>
    %c0_2 = arith.constant 0 : index
    %c0_3 = arith.constant 0 : index
    %2 = vector.load %arg3[%c0_2, %c0_3] : memref<36x128xbf16, #tpu.memory_space<vmem>>, vector<36x128xbf16>
    %cst = arith.constant dense<0.000000e+00> : vector<256x128xf32>
    %3 = tpu.matmul %1, %2, %cst {dimension_numbers = #tpu.dot_dimension_numbers<[1], [0], [0], [1], [0, 0, 1, 1], [], []>} : vector<256x36xbf16>, vector<36x128xbf16>, vector<256x128xf32> -> vector<256x128xf32>
    %cst_4 = arith.constant dense<0.000000e+00> : vector<128xf32>
    %4 = vector.multi_reduction <add>, %3, %cst_4 [0] : vector<256x128xf32> to vector<128xf32>
    %5 = vector.shape_cast %4 : vector<128xf32> to vector<1x128xf32>
    %6 = arith.mulf %3, %3 : vector<256x128xf32>
    %cst_5 = arith.constant dense<0.000000e+00> : vector<128xf32>
    %7 = vector.multi_reduction <add>, %6, %cst_5 [0] : vector<256x128xf32> to vector<128xf32>
    %8 = vector.shape_cast %7 : vector<128xf32> to vector<1x128xf32>
    %cst_6 = arith.constant 3.906250e-03 : f32
    %9 = vector.broadcast %cst_6 : f32 to vector<1x128xf32>
    %10 = arith.mulf %5, %9 : vector<1x128xf32>
    %cst_7 = arith.constant 3.906250e-03 : f32
    %11 = vector.broadcast %cst_7 : f32 to vector<1x128xf32>
    %12 = arith.mulf %8, %11 : vector<1x128xf32>
    %13 = arith.mulf %10, %10 : vector<1x128xf32>
    %14 = arith.subf %12, %13 : vector<1x128xf32>
    %15 = vector.broadcast %10 : vector<1x128xf32> to vector<256x128xf32>
    %16 = arith.subf %3, %15 : vector<256x128xf32>
    %cst_8 = arith.constant 9.99999974E-6 : f32
    %17 = vector.broadcast %cst_8 : f32 to vector<1x128xf32>
    %18 = arith.addf %14, %17 : vector<1x128xf32>
    %19 = math.rsqrt %18 : vector<1x128xf32>
    %20 = vector.broadcast %19 : vector<1x128xf32> to vector<256x128xf32>
    %21 = arith.mulf %16, %20 : vector<256x128xf32>
    %c0_9 = arith.constant 0 : index
    %c0_10 = arith.constant 0 : index
    %22 = vector.load %arg4[%c0_9, %c0_10] : memref<1x128xf32, #tpu.memory_space<vmem>>, vector<1x128xf32>
    %23 = vector.broadcast %22 : vector<1x128xf32> to vector<256x128xf32>
    %24 = arith.mulf %21, %23 : vector<256x128xf32>
    %c0_11 = arith.constant 0 : index
    %c0_12 = arith.constant 0 : index
    %25 = vector.load %arg5[%c0_11, %c0_12] : memref<1x128xf32, #tpu.memory_space<vmem>>, vector<1x128xf32>
    %26 = vector.broadcast %25 : vector<1x128xf32> to vector<256x128xf32>
    %27 = arith.addf %24, %26 : vector<256x128xf32>
    %cst_13 = arith.constant 0.000000e+00 : f32
    %28 = vector.broadcast %cst_13 : f32 to vector<256x128xf32>
    %29 = arith.cmpf oge, %27, %28 : vector<256x128xf32>
    %cst_14 = arith.constant 0.00999999977 : f32
    %30 = vector.broadcast %cst_14 : f32 to vector<256x128xf32>
    %31 = arith.mulf %30, %27 : vector<256x128xf32>
    %32 = arith.select %29, %27, %31 : vector<256x128xi1>, vector<256x128xf32>
    %cst_15 = arith.constant dense<0.000000e+00> : vector<128xf32>
    %33 = vector.multi_reduction <add>, %32, %cst_15 [0] : vector<256x128xf32> to vector<128xf32>
    %34 = vector.shape_cast %33 : vector<128xf32> to vector<1x128xf32>
    %cst_16 = arith.constant 3.906250e-03 : f32
    %35 = vector.broadcast %cst_16 : f32 to vector<1x128xf32>
    %36 = arith.mulf %34, %35 : vector<1x128xf32>
    %37 = arith.truncf %36 : vector<1x128xf32> to vector<1x128xbf16>
    %c0_17 = arith.constant 0 : index
    %c0_18 = arith.constant 0 : index
    %38 = vector.load %arg6[%c0_17, %c0_18] : memref<128x128xbf16, #tpu.memory_space<vmem>>, vector<128x128xbf16>
    %cst_19 = arith.constant dense<0.000000e+00> : vector<1x128xf32>
    %39 = tpu.matmul %37, %38, %cst_19 {dimension_numbers = #tpu.dot_dimension_numbers<[1], [0], [0], [1], [0, 0, 1, 1], [], []>} : vector<1x128xbf16>, vector<128x128xbf16>, vector<1x128xf32> -> vector<1x128xf32>
    %cst_20 = arith.constant 0.000000e+00 : f32
    %40 = vector.broadcast %cst_20 : f32 to vector<1x128xf32>
    %41 = arith.maximumf %39, %40 : vector<1x128xf32>
    %42 = arith.truncf %41 : vector<1x128xf32> to vector<1x128xbf16>
    %c0_21 = arith.constant 0 : index
    %c0_22 = arith.constant 0 : index
    %43 = vector.load %arg7[%c0_21, %c0_22] : memref<128x128xbf16, #tpu.memory_space<vmem>>, vector<128x128xbf16>
    %cst_23 = arith.constant dense<0.000000e+00> : vector<1x128xf32>
    %44 = tpu.matmul %42, %43, %cst_23 {dimension_numbers = #tpu.dot_dimension_numbers<[1], [0], [0], [1], [0, 0, 1, 1], [], []>} : vector<1x128xbf16>, vector<128x128xbf16>, vector<1x128xf32> -> vector<1x128xf32>
    %cst_24 = arith.constant 0.000000e+00 : f32
    %45 = vector.broadcast %cst_24 : f32 to vector<1x128xf32>
    %46 = arith.subf %45, %44 : vector<1x128xf32>
    %47 = math.exp %46 : vector<1x128xf32>
    %cst_25 = arith.constant 1.000000e+00 : f32
    %48 = vector.broadcast %cst_25 : f32 to vector<1x128xf32>
    %49 = arith.addf %48, %47 : vector<1x128xf32>
    %cst_26 = arith.constant 1.000000e+00 : f32
    %50 = vector.broadcast %cst_26 : f32 to vector<1x128xf32>
    %51 = arith.divf %50, %49 : vector<1x128xf32>
    %52 = vector.broadcast %51 : vector<1x128xf32> to vector<256x128xf32>
    %53 = arith.mulf %32, %52 : vector<256x128xf32>
    %cst_27 = arith.constant 0.000000e+00 : bf16
    %54 = vector.broadcast %cst_27 : bf16 to vector<1x48x128xbf16>
    %cst_28 = arith.constant 0.000000e+00 : bf16
    %55 = vector.broadcast %cst_28 : bf16 to vector<16x1x128xbf16>
    %c0_29 = arith.constant 0 : index
    %c0_30 = arith.constant 0 : index
    %c0_31 = arith.constant 0 : index
    %56 = vector.load %arg16[%c0_29, %c0_30, %c0_31] : memref<18x48x128xbf16, #tpu.memory_space<vmem>>, vector<1x48x128xbf16>
    tpu.vector_store %arg16[%c0_29, %c0_30, %c0_31], %54 {strides = array<i32>} : memref<18x48x128xbf16, #tpu.memory_space<vmem>>, vector<1x48x128xbf16>,
    %c17 = arith.constant 17 : index
    %c0_32 = arith.constant 0 : index
    %c0_33 = arith.constant 0 : index
    %57 = vector.load %arg16[%c17, %c0_32, %c0_33] : memref<18x48x128xbf16, #tpu.memory_space<vmem>>, vector<1x48x128xbf16>
    tpu.vector_store %arg16[%c17, %c0_32, %c0_33], %54 {strides = array<i32>} : memref<18x48x128xbf16, #tpu.memory_space<vmem>>, vector<1x48x128xbf16>,
    %c1 = arith.constant 1 : index
    %c15 = arith.constant 15 : index
    %c0_34 = arith.constant 0 : index
    %58 = vector.load %arg16[%c1, %c15, %c0_34] : memref<18x48x128xbf16, #tpu.memory_space<vmem>>, vector<16x1x128xbf16>
    tpu.vector_store %arg16[%c1, %c15, %c0_34], %55 {strides = array<i32>} : memref<18x48x128xbf16, #tpu.memory_space<vmem>>, vector<16x1x128xbf16>,
    %c1_35 = arith.constant 1 : index
    %c32 = arith.constant 32 : index
    %c0_36 = arith.constant 0 : index
    %59 = vector.load %arg16[%c1_35, %c32, %c0_36] : memref<18x48x128xbf16, #tpu.memory_space<vmem>>, vector<16x1x128xbf16>
    tpu.vector_store %arg16[%c1_35, %c32, %c0_36], %55 {strides = array<i32>} : memref<18x48x128xbf16, #tpu.memory_space<vmem>>, vector<16x1x128xbf16>,
    %60 = vector.shape_cast %53 : vector<256x128xf32> to vector<16x16x128xf32>
    %61 = arith.truncf %60 : vector<16x16x128xf32> to vector<16x16x128xbf16>
    %c1_37 = arith.constant 1 : index
    %c16 = arith.constant 16 : index
    %c0_38 = arith.constant 0 : index
    %62 = vector.load %arg16[%c1_37, %c16, %c0_38] : memref<18x48x128xbf16, #tpu.memory_space<vmem>>, vector<16x16x128xbf16>
    tpu.vector_store %arg16[%c1_37, %c16, %c0_38], %61 {strides = array<i32>} : memref<18x48x128xbf16, #tpu.memory_space<vmem>>, vector<16x16x128xbf16>,
    %cst_39 = arith.constant 0.000000e+00 : f32
    %63 = vector.broadcast %cst_39 : f32 to vector<1x128xf32>
    %cst_40 = arith.constant 0.000000e+00 : f32
    %64 = vector.broadcast %cst_40 : f32 to vector<1x128xf32>
    %cst_41 = arith.constant 0.000000e+00 : f32
    %65 = vector.broadcast %cst_41 : f32 to vector<1x128xf32>
    %cst_42 = arith.constant 0.000000e+00 : f32
    %66 = vector.broadcast %cst_42 : f32 to vector<1x128xf32>
    %c0_43 = arith.constant 0 : index
    %c15_44 = arith.constant 15 : index
    %c0_45 = arith.constant 0 : index
    %67 = vector.load %arg16[%c0_43, %c15_44, %c0_45] : memref<18x48x128xbf16, #tpu.memory_space<vmem>>, vector<8x16x128xbf16>
    %68 = vector.shape_cast %67 : vector<8x16x128xbf16> to vector<128x128xbf16>
    %c0_46 = arith.constant 0 : index
    %c16_47 = arith.constant 16 : index
    %c0_48 = arith.constant 0 : index
    %69 = vector.load %arg16[%c0_46, %c16_47, %c0_48] : memref<18x48x128xbf16, #tpu.memory_space<vmem>>, vector<8x16x128xbf16>
    %70 = vector.shape_cast %69 : vector<8x16x128xbf16> to vector<128x128xbf16>
    %71 = tpu.concatenate %68, %70 in 1 : vector<128x128xbf16>, vector<128x128xbf16> -> vector<128x256xbf16>
    %c0_49 = arith.constant 0 : index
    %c0_50 = arith.constant 0 : index
    %c0_51 = arith.constant 0 : index
    %72 = vector.load %arg8[%c0_49, %c0_50, %c0_51] : memref<4x256x128xbf16, #tpu.memory_space<vmem>>, vector<1x256x128xbf16>
    %73 = vector.shape_cast %72 : vector<1x256x128xbf16> to vector<256x128xbf16>
    %cst_52 = arith.constant dense<0.000000e+00> : vector<128x128xf32>
    %74 = tpu.matmul %71, %73, %cst_52 {dimension_numbers = #tpu.dot_dimension_numbers<[1], [0], [0], [1], [0, 0, 1, 1], [], []>} : vector<128x256xbf16>, vector<256x128xbf16>, vector<128x128xf32> -> vector<128x128xf32>
    %c0_53 = arith.constant 0 : index
    %c17_54 = arith.constant 17 : index
    %c0_55 = arith.constant 0 : index
    %75 = vector.load %arg16[%c0_53, %c17_54, %c0_55] : memref<18x48x128xbf16, #tpu.memory_space<vmem>>, vector<8x16x128xbf16>
    %76 = vector.shape_cast %75 : vector<8x16x128xbf16> to vector<128x128xbf16>
    %c1_56 = arith.constant 1 : index
    %c15_57 = arith.constant 15 : index
    %c0_58 = arith.constant 0 : index
    %77 = vector.load %arg16[%c1_56, %c15_57, %c0_58] : memref<18x48x128xbf16, #tpu.memory_space<vmem>>, vector<8x16x128xbf16>
    %78 = vector.shape_cast %77 : vector<8x16x128xbf16> to vector<128x128xbf16>
    %79 = tpu.concatenate %76, %78 in 1 : vector<128x128xbf16>, vector<128x128xbf16> -> vector<128x256xbf16>
    %c1_59 = arith.constant 1 : index
    %c0_60 = arith.constant 0 : index
    %c0_61 = arith.constant 0 : index
    %80 = vector.load %arg8[%c1_59, %c0_60, %c0_61] : memref<4x256x128xbf16, #tpu.memory_space<vmem>>, vector<1x256x128xbf16>
    %81 = vector.shape_cast %80 : vector<1x256x128xbf16> to vector<256x128xbf16>
    %cst_62 = arith.constant dense<0.000000e+00> : vector<128x128xf32>
    %82 = tpu.matmul %79, %81, %cst_62 {dimension_numbers = #tpu.dot_dimension_numbers<[1], [0], [0], [1], [0, 0, 1, 1], [], []>} : vector<128x256xbf16>, vector<256x128xbf16>, vector<128x128xf32> -> vector<128x128xf32>
    %83 = arith.addf %74, %82 : vector<128x128xf32>
    %c1_63 = arith.constant 1 : index
    %c16_64 = arith.constant 16 : index
    %c0_65 = arith.constant 0 : index
    %84 = vector.load %arg16[%c1_63, %c16_64, %c0_65] : memref<18x48x128xbf16, #tpu.memory_space<vmem>>, vector<8x16x128xbf16>
    %85 = vector.shape_cast %84 : vector<8x16x128xbf16> to vector<128x128xbf16>
    %c1_66 = arith.constant 1 : index
    %c17_67 = arith.constant 17 : index
    %c0_68 = arith.constant 0 : index
    %86 = vector.load %arg16[%c1_66, %c17_67, %c0_68] : memref<18x48x128xbf16, #tpu.memory_space<vmem>>, vector<8x16x128xbf16>
    %87 = vector.shape_cast %86 : vector<8x16x128xbf16> to vector<128x128xbf16>
    %88 = tpu.concatenate %85, %87 in 1 : vector<128x128xbf16>, vector<128x128xbf16> -> vector<128x256xbf16>
    %c2 = arith.constant 2 : index
    %c0_69 = arith.constant 0 : index
    %c0_70 = arith.constant 0 : index
    %89 = vector.load %arg8[%c2, %c0_69, %c0_70] : memref<4x256x128xbf16, #tpu.memory_space<vmem>>, vector<1x256x128xbf16>
    %90 = vector.shape_cast %89 : vector<1x256x128xbf16> to vector<256x128xbf16>
    %cst_71 = arith.constant dense<0.000000e+00> : vector<128x128xf32>
    %91 = tpu.matmul %88, %90, %cst_71 {dimension_numbers = #tpu.dot_dimension_numbers<[1], [0], [0], [1], [0, 0, 1, 1], [], []>} : vector<128x256xbf16>, vector<256x128xbf16>, vector<128x128xf32> -> vector<128x128xf32>
    %92 = arith.addf %83, %91 : vector<128x128xf32>
    %c2_72 = arith.constant 2 : index
    %c15_73 = arith.constant 15 : index
    %c0_74 = arith.constant 0 : index
    %93 = vector.load %arg16[%c2_72, %c15_73, %c0_74] : memref<18x48x128xbf16, #tpu.memory_space<vmem>>, vector<8x16x128xbf16>
    %94 = vector.shape_cast %93 : vector<8x16x128xbf16> to vector<128x128xbf16>
    %c2_75 = arith.constant 2 : index
    %c16_76 = arith.constant 16 : index
    %c0_77 = arith.constant 0 : index
    %95 = vector.load %arg16[%c2_75, %c16_76, %c0_77] : memref<18x48x128xbf16, #tpu.memory_space<vmem>>, vector<8x16x128xbf16>
    %96 = vector.shape_cast %95 : vector<8x16x128xbf16> to vector<128x128xbf16>
    %97 = tpu.concatenate %94, %96 in 1 : vector<128x128xbf16>, vector<128x128xbf16> -> vector<128x256xbf16>
    %c3 = arith.constant 3 : index
    %c0_78 = arith.constant 0 : index
    %c0_79 = arith.constant 0 : index
    %98 = vector.load %arg8[%c3, %c0_78, %c0_79] : memref<4x256x128xbf16, #tpu.memory_space<vmem>>, vector<1x256x128xbf16>
    %99 = vector.shape_cast %98 : vector<1x256x128xbf16> to vector<256x128xbf16>
    %cst_80 = arith.constant dense<0.000000e+00> : vector<128x128xf32>
    %100 = tpu.matmul %97, %99, %cst_80 {dimension_numbers = #tpu.dot_dimension_numbers<[1], [0], [0], [1], [0, 0, 1, 1], [], []>} : vector<128x256xbf16>, vector<256x128xbf16>, vector<128x128xf32> -> vector<128x128xf32>
    %101 = arith.addf %92, %100 : vector<128x128xf32>
    %c2_81 = arith.constant 2 : index
    %c17_82 = arith.constant 17 : index
    %c0_83 = arith.constant 0 : index
    %102 = vector.load %arg16[%c2_81, %c17_82, %c0_83] : memref<18x48x128xbf16, #tpu.memory_space<vmem>>, vector<8x16x128xbf16>
    %103 = vector.shape_cast %102 : vector<8x16x128xbf16> to vector<128x128xbf16>
    %c0_84 = arith.constant 0 : index
    %c0_85 = arith.constant 0 : index
    %104 = vector.load %arg9[%c0_84, %c0_85] : memref<128x128xbf16, #tpu.memory_space<vmem>>, vector<128x128xbf16>
    %cst_86 = arith.constant dense<0.000000e+00> : vector<128x128xf32>
    %105 = tpu.matmul %103, %104, %cst_86 {dimension_numbers = #tpu.dot_dimension_numbers<[1], [0], [0], [1], [0, 0, 1, 1], [], []>} : vector<128x128xbf16>, vector<128x128xbf16>, vector<128x128xf32> -> vector<128x128xf32>
    %106 = arith.addf %101, %105 : vector<128x128xf32>
    %c0_87 = arith.constant 0 : index
    %c0_88 = arith.constant 0 : index
    %107 = vector.load %arg17[%c0_87, %c0_88] : memref<256x128xf32, #tpu.memory_space<vmem>>, vector<128x128xf32>
    tpu.vector_store %arg17[%c0_87, %c0_88], %106 {strides = array<i32>} : memref<256x128xf32, #tpu.memory_space<vmem>>, vector<128x128xf32>,
    %cst_89 = arith.constant dense<0.000000e+00> : vector<128xf32>
    %108 = vector.multi_reduction <add>, %106, %cst_89 [0] : vector<128x128xf32> to vector<128xf32>
    %109 = vector.shape_cast %108 : vector<128xf32> to vector<1x128xf32>
    %110 = arith.addf %63, %109 : vector<1x128xf32>
    %111 = arith.mulf %106, %106 : vector<128x128xf32>
    %cst_90 = arith.constant dense<0.000000e+00> : vector<128xf32>
    %112 = vector.multi_reduction <add>, %111, %cst_90 [0] : vector<128x128xf32> to vector<128xf32>
    %113 = vector.shape_cast %112 : vector<128xf32> to vector<1x128xf32>
    %114 = arith.addf %64, %113 : vector<1x128xf32>
    %c0_91 = arith.constant 0 : index
    %c0_92 = arith.constant 0 : index
    %c0_93 = arith.constant 0 : index
    %115 = vector.load %arg2[%c0_91, %c0_92, %c0_93] : memref<1x256x4xbf16, #tpu.memory_space<vmem>>, vector<1x128x4xbf16>
    %116 = vector.shape_cast %115 : vector<1x128x4xbf16> to vector<128x4xbf16>
    %c0_94 = arith.constant 0 : index
    %c0_95 = arith.constant 0 : index
    %117 = vector.load %arg12[%c0_94, %c0_95] : memref<4x128xbf16, #tpu.memory_space<vmem>>, vector<4x128xbf16>
    %cst_96 = arith.constant dense<0.000000e+00> : vector<128x128xf32>
    %118 = tpu.matmul %116, %117, %cst_96 {dimension_numbers = #tpu.dot_dimension_numbers<[1], [0], [0], [1], [0, 0, 1, 1], [], []>} : vector<128x4xbf16>, vector<4x128xbf16>, vector<128x128xf32> -> vector<128x128xf32>
    %cst_97 = arith.constant dense<0.000000e+00> : vector<128xf32>
    %119 = vector.multi_reduction <add>, %118, %cst_97 [0] : vector<128x128xf32> to vector<128xf32>
    %120 = vector.shape_cast %119 : vector<128xf32> to vector<1x128xf32>
    %121 = arith.addf %65, %120 : vector<1x128xf32>
    %122 = arith.mulf %118, %118 : vector<128x128xf32>
    %cst_98 = arith.constant dense<0.000000e+00> : vector<128xf32>
    %123 = vector.multi_reduction <add>, %122, %cst_98 [0] : vector<128x128xf32> to vector<128xf32>
    %124 = vector.shape_cast %123 : vector<128xf32> to vector<1x128xf32>
    %125 = arith.addf %66, %124 : vector<1x128xf32>
    %c8 = arith.constant 8 : index
    %c15_99 = arith.constant 15 : index
    %c0_100 = arith.constant 0 : index
    %126 = vector.load %arg16[%c8, %c15_99, %c0_100] : memref<18x48x128xbf16, #tpu.memory_space<vmem>>, vector<8x16x128xbf16>
    %127 = vector.shape_cast %126 : vector<8x16x128xbf16> to vector<128x128xbf16>
    %c8_101 = arith.constant 8 : index
    %c16_102 = arith.constant 16 : index
    %c0_103 = arith.constant 0 : index
    %128 = vector.load %arg16[%c8_101, %c16_102, %c0_103] : memref<18x48x128xbf16, #tpu.memory_space<vmem>>, vector<8x16x128xbf16>
    %129 = vector.shape_cast %128 : vector<8x16x128xbf16> to vector<128x128xbf16>
    %130 = tpu.concatenate %127, %129 in 1 : vector<128x128xbf16>, vector<128x128xbf16> -> vector<128x256xbf16>
    %c0_104 = arith.constant 0 : index
    %c0_105 = arith.constant 0 : index
    %c0_106 = arith.constant 0 : index
    %131 = vector.load %arg8[%c0_104, %c0_105, %c0_106] : memref<4x256x128xbf16, #tpu.memory_space<vmem>>, vector<1x256x128xbf16>
    %132 = vector.shape_cast %131 : vector<1x256x128xbf16> to vector<256x128xbf16>
    %cst_107 = arith.constant dense<0.000000e+00> : vector<128x128xf32>
    %133 = tpu.matmul %130, %132, %cst_107 {dimension_numbers = #tpu.dot_dimension_numbers<[1], [0], [0], [1], [0, 0, 1, 1], [], []>} : vector<128x256xbf16>, vector<256x128xbf16>, vector<128x128xf32> -> vector<128x128xf32>
    %c8_108 = arith.constant 8 : index
    %c17_109 = arith.constant 17 : index
    %c0_110 = arith.constant 0 : index
    %134 = vector.load %arg16[%c8_108, %c17_109, %c0_110] : memref<18x48x128xbf16, #tpu.memory_space<vmem>>, vector<8x16x128xbf16>
    %135 = vector.shape_cast %134 : vector<8x16x128xbf16> to vector<128x128xbf16>
    %c9 = arith.constant 9 : index
    %c15_111 = arith.constant 15 : index
    %c0_112 = arith.constant 0 : index
    %136 = vector.load %arg16[%c9, %c15_111, %c0_112] : memref<18x48x128xbf16, #tpu.memory_space<vmem>>, vector<8x16x128xbf16>
    %137 = vector.shape_cast %136 : vector<8x16x128xbf16> to vector<128x128xbf16>
    %138 = tpu.concatenate %135, %137 in 1 : vector<128x128xbf16>, vector<128x128xbf16> -> vector<128x256xbf16>
    %c1_113 = arith.constant 1 : index
    %c0_114 = arith.constant 0 : index
    %c0_115 = arith.constant 0 : index
    %139 = vector.load %arg8[%c1_113, %c0_114, %c0_115] : memref<4x256x128xbf16, #tpu.memory_space<vmem>>, vector<1x256x128xbf16>
    %140 = vector.shape_cast %139 : vector<1x256x128xbf16> to vector<256x128xbf16>
    %cst_116 = arith.constant dense<0.000000e+00> : vector<128x128xf32>
    %141 = tpu.matmul %138, %140, %cst_116 {dimension_numbers = #tpu.dot_dimension_numbers<[1], [0], [0], [1], [0, 0, 1, 1], [], []>} : vector<128x256xbf16>, vector<256x128xbf16>, vector<128x128xf32> -> vector<128x128xf32>
    %142 = arith.addf %133, %141 : vector<128x128xf32>
    %c9_117 = arith.constant 9 : index
    %c16_118 = arith.constant 16 : index
    %c0_119 = arith.constant 0 : index
    %143 = vector.load %arg16[%c9_117, %c16_118, %c0_119] : memref<18x48x128xbf16, #tpu.memory_space<vmem>>, vector<8x16x128xbf16>
    %144 = vector.shape_cast %143 : vector<8x16x128xbf16> to vector<128x128xbf16>
    %c9_120 = arith.constant 9 : index
    %c17_121 = arith.constant 17 : index
    %c0_122 = arith.constant 0 : index
    %145 = vector.load %arg16[%c9_120, %c17_121, %c0_122] : memref<18x48x128xbf16, #tpu.memory_space<vmem>>, vector<8x16x128xbf16>
    %146 = vector.shape_cast %145 : vector<8x16x128xbf16> to vector<128x128xbf16>
    %147 = tpu.concatenate %144, %146 in 1 : vector<128x128xbf16>, vector<128x128xbf16> -> vector<128x256xbf16>
    %c2_123 = arith.constant 2 : index
    %c0_124 = arith.constant 0 : index
    %c0_125 = arith.constant 0 : index
    %148 = vector.load %arg8[%c2_123, %c0_124, %c0_125] : memref<4x256x128xbf16, #tpu.memory_space<vmem>>, vector<1x256x128xbf16>
    %149 = vector.shape_cast %148 : vector<1x256x128xbf16> to vector<256x128xbf16>
    %cst_126 = arith.constant dense<0.000000e+00> : vector<128x128xf32>
    %150 = tpu.matmul %147, %149, %cst_126 {dimension_numbers = #tpu.dot_dimension_numbers<[1], [0], [0], [1], [0, 0, 1, 1], [], []>} : vector<128x256xbf16>, vector<256x128xbf16>, vector<128x128xf32> -> vector<128x128xf32>
    %151 = arith.addf %142, %150 : vector<128x128xf32>
    %c10 = arith.constant 10 : index
    %c15_127 = arith.constant 15 : index
    %c0_128 = arith.constant 0 : index
    %152 = vector.load %arg16[%c10, %c15_127, %c0_128] : memref<18x48x128xbf16, #tpu.memory_space<vmem>>, vector<8x16x128xbf16>
    %153 = vector.shape_cast %152 : vector<8x16x128xbf16> to vector<128x128xbf16>
    %c10_129 = arith.constant 10 : index
    %c16_130 = arith.constant 16 : index
    %c0_131 = arith.constant 0 : index
    %154 = vector.load %arg16[%c10_129, %c16_130, %c0_131] : memref<18x48x128xbf16, #tpu.memory_space<vmem>>, vector<8x16x128xbf16>
    %155 = vector.shape_cast %154 : vector<8x16x128xbf16> to vector<128x128xbf16>
    %156 = tpu.concatenate %153, %155 in 1 : vector<128x128xbf16>, vector<128x128xbf16> -> vector<128x256xbf16>
    %c3_132 = arith.constant 3 : index
    %c0_133 = arith.constant 0 : index
    %c0_134 = arith.constant 0 : index
    %157 = vector.load %arg8[%c3_132, %c0_133, %c0_134] : memref<4x256x128xbf16, #tpu.memory_space<vmem>>, vector<1x256x128xbf16>
    %158 = vector.shape_cast %157 : vector<1x256x128xbf16> to vector<256x128xbf16>
    %cst_135 = arith.constant dense<0.000000e+00> : vector<128x128xf32>
    %159 = tpu.matmul %156, %158, %cst_135 {dimension_numbers = #tpu.dot_dimension_numbers<[1], [0], [0], [1], [0, 0, 1, 1], [], []>} : vector<128x256xbf16>, vector<256x128xbf16>, vector<128x128xf32> -> vector<128x128xf32>
    %160 = arith.addf %151, %159 : vector<128x128xf32>
    %c10_136 = arith.constant 10 : index
    %c17_137 = arith.constant 17 : index
    %c0_138 = arith.constant 0 : index
    %161 = vector.load %arg16[%c10_136, %c17_137, %c0_138] : memref<18x48x128xbf16, #tpu.memory_space<vmem>>, vector<8x16x128xbf16>
    %162 = vector.shape_cast %161 : vector<8x16x128xbf16> to vector<128x128xbf16>
    %c0_139 = arith.constant 0 : index
    %c0_140 = arith.constant 0 : index
    %163 = vector.load %arg9[%c0_139, %c0_140] : memref<128x128xbf16, #tpu.memory_space<vmem>>, vector<128x128xbf16>
    %cst_141 = arith.constant dense<0.000000e+00> : vector<128x128xf32>
    %164 = tpu.matmul %162, %163, %cst_141 {dimension_numbers = #tpu.dot_dimension_numbers<[1], [0], [0], [1], [0, 0, 1, 1], [], []>} : vector<128x128xbf16>, vector<128x128xbf16>, vector<128x128xf32> -> vector<128x128xf32>
    %165 = arith.addf %160, %164 : vector<128x128xf32>
    %c128 = arith.constant 128 : index
    %c0_142 = arith.constant 0 : index
    %166 = vector.load %arg17[%c128, %c0_142] : memref<256x128xf32, #tpu.memory_space<vmem>>, vector<128x128xf32>
    tpu.vector_store %arg17[%c128, %c0_142], %165 {strides = array<i32>} : memref<256x128xf32, #tpu.memory_space<vmem>>, vector<128x128xf32>,
    %cst_143 = arith.constant dense<0.000000e+00> : vector<128xf32>
    %167 = vector.multi_reduction <add>, %165, %cst_143 [0] : vector<128x128xf32> to vector<128xf32>
    %168 = vector.shape_cast %167 : vector<128xf32> to vector<1x128xf32>
    %169 = arith.addf %110, %168 : vector<1x128xf32>
    %170 = arith.mulf %165, %165 : vector<128x128xf32>
    %cst_144 = arith.constant dense<0.000000e+00> : vector<128xf32>
    %171 = vector.multi_reduction <add>, %170, %cst_144 [0] : vector<128x128xf32> to vector<128xf32>
    %172 = vector.shape_cast %171 : vector<128xf32> to vector<1x128xf32>
    %173 = arith.addf %114, %172 : vector<1x128xf32>
    %c0_145 = arith.constant 0 : index
    %c128_146 = arith.constant 128 : index
    %c0_147 = arith.constant 0 : index
    %174 = vector.load %arg2[%c0_145, %c128_146, %c0_147] : memref<1x256x4xbf16, #tpu.memory_space<vmem>>, vector<1x128x4xbf16>
    %175 = vector.shape_cast %174 : vector<1x128x4xbf16> to vector<128x4xbf16>
    %c0_148 = arith.constant 0 : index
    %c0_149 = arith.constant 0 : index
    %176 = vector.load %arg12[%c0_148, %c0_149] : memref<4x128xbf16, #tpu.memory_space<vmem>>, vector<4x128xbf16>
    %cst_150 = arith.constant dense<0.000000e+00> : vector<128x128xf32>
    %177 = tpu.matmul %175, %176, %cst_150 {dimension_numbers = #tpu.dot_dimension_numbers<[1], [0], [0], [1], [0, 0, 1, 1], [], []>} : vector<128x4xbf16>, vector<4x128xbf16>, vector<128x128xf32> -> vector<128x128xf32>
    %cst_151 = arith.constant dense<0.000000e+00> : vector<128xf32>
    %178 = vector.multi_reduction <add>, %177, %cst_151 [0] : vector<128x128xf32> to vector<128xf32>
    %179 = vector.shape_cast %178 : vector<128xf32> to vector<1x128xf32>
    %180 = arith.addf %121, %179 : vector<1x128xf32>
    %181 = arith.mulf %177, %177 : vector<128x128xf32>
    %cst_152 = arith.constant dense<0.000000e+00> : vector<128xf32>
    %182 = vector.multi_reduction <add>, %181, %cst_152 [0] : vector<128x128xf32> to vector<128xf32>
    %183 = vector.shape_cast %182 : vector<128xf32> to vector<1x128xf32>
    %184 = arith.addf %125, %183 : vector<1x128xf32>
    %cst_153 = arith.constant 3.906250e-03 : f32
    %185 = vector.broadcast %cst_153 : f32 to vector<1x128xf32>
    %186 = arith.mulf %169, %185 : vector<1x128xf32>
    %cst_154 = arith.constant 3.906250e-03 : f32
    %187 = vector.broadcast %cst_154 : f32 to vector<1x128xf32>
    %188 = arith.mulf %173, %187 : vector<1x128xf32>
    %189 = arith.mulf %186, %186 : vector<1x128xf32>
    %190 = arith.subf %188, %189 : vector<1x128xf32>
    %cst_155 = arith.constant 9.99999974E-6 : f32
    %191 = vector.broadcast %cst_155 : f32 to vector<1x128xf32>
    %192 = arith.addf %190, %191 : vector<1x128xf32>
    %193 = math.rsqrt %192 : vector<1x128xf32>
    %c0_156 = arith.constant 0 : index
    %c0_157 = arith.constant 0 : index
    %194 = vector.load %arg10[%c0_156, %c0_157] : memref<1x128xf32, #tpu.memory_space<vmem>>, vector<1x128xf32>
    %195 = arith.mulf %193, %194 : vector<1x128xf32>
    %c0_158 = arith.constant 0 : index
    %c0_159 = arith.constant 0 : index
    %196 = vector.load %arg11[%c0_158, %c0_159] : memref<1x128xf32, #tpu.memory_space<vmem>>, vector<1x128xf32>
    %197 = arith.mulf %186, %195 : vector<1x128xf32>
    %198 = arith.subf %196, %197 : vector<1x128xf32>
    %cst_160 = arith.constant 3.906250e-03 : f32
    %199 = vector.broadcast %cst_160 : f32 to vector<1x128xf32>
    %200 = arith.mulf %180, %199 : vector<1x128xf32>
    %cst_161 = arith.constant 3.906250e-03 : f32
    %201 = vector.broadcast %cst_161 : f32 to vector<1x128xf32>
    %202 = arith.mulf %184, %201 : vector<1x128xf32>
    %203 = arith.mulf %200, %200 : vector<1x128xf32>
    %204 = arith.subf %202, %203 : vector<1x128xf32>
    %cst_162 = arith.constant 9.99999974E-6 : f32
    %205 = vector.broadcast %cst_162 : f32 to vector<1x128xf32>
    %206 = arith.addf %204, %205 : vector<1x128xf32>
    %207 = math.rsqrt %206 : vector<1x128xf32>
    %c0_163 = arith.constant 0 : index
    %c0_164 = arith.constant 0 : index
    %208 = vector.load %arg13[%c0_163, %c0_164] : memref<1x128xf32, #tpu.memory_space<vmem>>, vector<1x128xf32>
    %209 = arith.mulf %207, %208 : vector<1x128xf32>
    %c0_165 = arith.constant 0 : index
    %c0_166 = arith.constant 0 : index
    %210 = vector.load %arg14[%c0_165, %c0_166] : memref<1x128xf32, #tpu.memory_space<vmem>>, vector<1x128xf32>
    %211 = arith.mulf %200, %209 : vector<1x128xf32>
    %212 = arith.subf %210, %211 : vector<1x128xf32>
    %c0_167 = arith.constant 0 : index
    %c0_168 = arith.constant 0 : index
    %c0_169 = arith.constant 0 : index
    %213 = vector.load %arg2[%c0_167, %c0_168, %c0_169] : memref<1x256x4xbf16, #tpu.memory_space<vmem>>, vector<1x128x4xbf16>
    %214 = vector.shape_cast %213 : vector<1x128x4xbf16> to vector<128x4xbf16>
    %c0_170 = arith.constant 0 : index
    %c0_171 = arith.constant 0 : index
    %215 = vector.load %arg12[%c0_170, %c0_171] : memref<4x128xbf16, #tpu.memory_space<vmem>>, vector<4x128xbf16>
    %cst_172 = arith.constant dense<0.000000e+00> : vector<128x128xf32>
    %216 = tpu.matmul %214, %215, %cst_172 {dimension_numbers = #tpu.dot_dimension_numbers<[1], [0], [0], [1], [0, 0, 1, 1], [], []>} : vector<128x4xbf16>, vector<4x128xbf16>, vector<128x128xf32> -> vector<128x128xf32>
    %c0_173 = arith.constant 0 : index
    %c0_174 = arith.constant 0 : index
    %217 = vector.load %arg17[%c0_173, %c0_174] : memref<256x128xf32, #tpu.memory_space<vmem>>, vector<128x128xf32>
    %218 = vector.broadcast %195 : vector<1x128xf32> to vector<128x128xf32>
    %219 = arith.mulf %217, %218 : vector<128x128xf32>
    %220 = vector.broadcast %198 : vector<1x128xf32> to vector<128x128xf32>
    %221 = arith.addf %219, %220 : vector<128x128xf32>
    %222 = vector.broadcast %209 : vector<1x128xf32> to vector<128x128xf32>
    %223 = arith.mulf %216, %222 : vector<128x128xf32>
    %224 = arith.addf %221, %223 : vector<128x128xf32>
    %225 = vector.broadcast %212 : vector<1x128xf32> to vector<128x128xf32>
    %226 = arith.addf %224, %225 : vector<128x128xf32>
    %cst_175 = arith.constant 0.000000e+00 : f32
    %227 = vector.broadcast %cst_175 : f32 to vector<128x128xf32>
    %228 = arith.cmpf oge, %226, %227 : vector<128x128xf32>
    %cst_176 = arith.constant 0.00999999977 : f32
    %229 = vector.broadcast %cst_176 : f32 to vector<128x128xf32>
    %230 = arith.mulf %229, %226 : vector<128x128xf32>
    %231 = arith.select %228, %226, %230 : vector<128x128xi1>, vector<128x128xf32>
    %232 = arith.truncf %231 : vector<128x128xf32> to vector<128x128xbf16>
    %c0_177 = arith.constant 0 : index
    %c0_178 = arith.constant 0 : index
    %c0_179 = arith.constant 0 : index
    %233 = vector.load %arg15[%c0_177, %c0_178, %c0_179] : memref<1x256x128xbf16, #tpu.memory_space<vmem>>, vector<1x128x128xbf16>
    %234 = vector.shape_cast %233 : vector<1x128x128xbf16> to vector<128x128xbf16>
    %235 = vector.shape_cast %232 : vector<128x128xbf16> to vector<1x128x128xbf16>
    tpu.vector_store %arg15[%c0_177, %c0_178, %c0_179], %235 {strides = array<i32>} : memref<1x256x128xbf16, #tpu.memory_space<vmem>>, vector<1x128x128xbf16>,
    %c0_180 = arith.constant 0 : index
    %c128_181 = arith.constant 128 : index
    %c0_182 = arith.constant 0 : index
    %236 = vector.load %arg2[%c0_180, %c128_181, %c0_182] : memref<1x256x4xbf16, #tpu.memory_space<vmem>>, vector<1x128x4xbf16>
    %237 = vector.shape_cast %236 : vector<1x128x4xbf16> to vector<128x4xbf16>
    %c0_183 = arith.constant 0 : index
    %c0_184 = arith.constant 0 : index
    %238 = vector.load %arg12[%c0_183, %c0_184] : memref<4x128xbf16, #tpu.memory_space<vmem>>, vector<4x128xbf16>
    %cst_185 = arith.constant dense<0.000000e+00> : vector<128x128xf32>
    %239 = tpu.matmul %237, %238, %cst_185 {dimension_numbers = #tpu.dot_dimension_numbers<[1], [0], [0], [1], [0, 0, 1, 1], [], []>} : vector<128x4xbf16>, vector<4x128xbf16>, vector<128x128xf32> -> vector<128x128xf32>
    %c128_186 = arith.constant 128 : index
    %c0_187 = arith.constant 0 : index
    %240 = vector.load %arg17[%c128_186, %c0_187] : memref<256x128xf32, #tpu.memory_space<vmem>>, vector<128x128xf32>
    %241 = vector.broadcast %195 : vector<1x128xf32> to vector<128x128xf32>
    %242 = arith.mulf %240, %241 : vector<128x128xf32>
    %243 = vector.broadcast %198 : vector<1x128xf32> to vector<128x128xf32>
    %244 = arith.addf %242, %243 : vector<128x128xf32>
    %245 = vector.broadcast %209 : vector<1x128xf32> to vector<128x128xf32>
    %246 = arith.mulf %239, %245 : vector<128x128xf32>
    %247 = arith.addf %244, %246 : vector<128x128xf32>
    %248 = vector.broadcast %212 : vector<1x128xf32> to vector<128x128xf32>
    %249 = arith.addf %247, %248 : vector<128x128xf32>
    %cst_188 = arith.constant 0.000000e+00 : f32
    %250 = vector.broadcast %cst_188 : f32 to vector<128x128xf32>
    %251 = arith.cmpf oge, %249, %250 : vector<128x128xf32>
    %cst_189 = arith.constant 0.00999999977 : f32
    %252 = vector.broadcast %cst_189 : f32 to vector<128x128xf32>
    %253 = arith.mulf %252, %249 : vector<128x128xf32>
    %254 = arith.select %251, %249, %253 : vector<128x128xi1>, vector<128x128xf32>
    %255 = arith.truncf %254 : vector<128x128xf32> to vector<128x128xbf16>
    %c0_190 = arith.constant 0 : index
    %c128_191 = arith.constant 128 : index
    %c0_192 = arith.constant 0 : index
    %256 = vector.load %arg15[%c0_190, %c128_191, %c0_192] : memref<1x256x128xbf16, #tpu.memory_space<vmem>>, vector<1x128x128xbf16>
    %257 = vector.shape_cast %256 : vector<1x128x128xbf16> to vector<128x128xbf16>
    %258 = vector.shape_cast %255 : vector<128x128xbf16> to vector<1x128x128xbf16>
    tpu.vector_store %arg15[%c0_190, %c128_191, %c0_192], %258 {strides = array<i32>} : memref<1x256x128xbf16, #tpu.memory_space<vmem>>, vector<1x128x128xbf16>,
    return
  }
  func.func @transform_0(%arg0: i32) -> (i32, i32, i32) {
    %c0_i32 = arith.constant 0 : i32
    %c0_i32_0 = arith.constant 0 : i32
    %c0_i32_1 = arith.constant 0 : i32
    return %arg0, %c0_i32, %c0_i32_0 : i32, i32, i32
  }
  func.func @transform_1(%arg0: i32) -> (i32, i32, i32) {
    %c0_i32 = arith.constant 0 : i32
    %c0_i32_0 = arith.constant 0 : i32
    %c0_i32_1 = arith.constant 0 : i32
    return %arg0, %c0_i32, %c0_i32_0 : i32, i32, i32
  }
  func.func @transform_2(%arg0: i32) -> (i32, i32) {
    %c0_i32 = arith.constant 0 : i32
    %c0_i32_0 = arith.constant 0 : i32
    %c0_i32_1 = arith.constant 0 : i32
    return %c0_i32, %c0_i32_0 : i32, i32
  }
  func.func @transform_3(%arg0: i32) -> (i32, i32) {
    %c0_i32 = arith.constant 0 : i32
    %c0_i32_0 = arith.constant 0 : i32
    %c0_i32_1 = arith.constant 0 : i32
    return %c0_i32, %c0_i32_0 : i32, i32
  }
  func.func @transform_4(%arg0: i32) -> (i32, i32) {
    %c0_i32 = arith.constant 0 : i32
    %c0_i32_0 = arith.constant 0 : i32
    %c0_i32_1 = arith.constant 0 : i32
    return %c0_i32, %c0_i32_0 : i32, i32
  }
  func.func @transform_5(%arg0: i32) -> (i32, i32) {
    %c0_i32 = arith.constant 0 : i32
    %c0_i32_0 = arith.constant 0 : i32
    %c0_i32_1 = arith.constant 0 : i32
    return %c0_i32, %c0_i32_0 : i32, i32
  }
  func.func @transform_6(%arg0: i32) -> (i32, i32) {
    %c0_i32 = arith.constant 0 : i32
    %c0_i32_0 = arith.constant 0 : i32
    %c0_i32_1 = arith.constant 0 : i32
    return %c0_i32, %c0_i32_0 : i32, i32
  }
  func.func @transform_7(%arg0: i32) -> (i32, i32, i32) {
    %c0_i32 = arith.constant 0 : i32
    %c0_i32_0 = arith.constant 0 : i32
    %c0_i32_1 = arith.constant 0 : i32
    %c0_i32_2 = arith.constant 0 : i32
    return %c0_i32, %c0_i32_0, %c0_i32_1 : i32, i32, i32
  }
  func.func @transform_8(%arg0: i32) -> (i32, i32) {
    %c0_i32 = arith.constant 0 : i32
    %c0_i32_0 = arith.constant 0 : i32
    %c0_i32_1 = arith.constant 0 : i32
    return %c0_i32, %c0_i32_0 : i32, i32
  }
  func.func @transform_9(%arg0: i32) -> (i32, i32) {
    %c0_i32 = arith.constant 0 : i32
    %c0_i32_0 = arith.constant 0 : i32
    %c0_i32_1 = arith.constant 0 : i32
    return %c0_i32, %c0_i32_0 : i32, i32
  }
  func.func @transform_10(%arg0: i32) -> (i32, i32) {
    %c0_i32 = arith.constant 0 : i32
    %c0_i32_0 = arith.constant 0 : i32
    %c0_i32_1 = arith.constant 0 : i32
    return %c0_i32, %c0_i32_0 : i32, i32
  }
  func.func @transform_11(%arg0: i32) -> (i32, i32) {
    %c0_i32 = arith.constant 0 : i32
    %c0_i32_0 = arith.constant 0 : i32
    %c0_i32_1 = arith.constant 0 : i32
    return %c0_i32, %c0_i32_0 : i32, i32
  }
  func.func @transform_12(%arg0: i32) -> (i32, i32) {
    %c0_i32 = arith.constant 0 : i32
    %c0_i32_0 = arith.constant 0 : i32
    %c0_i32_1 = arith.constant 0 : i32
    return %c0_i32, %c0_i32_0 : i32, i32
  }
  func.func @transform_13(%arg0: i32) -> (i32, i32) {
    %c0_i32 = arith.constant 0 : i32
    %c0_i32_0 = arith.constant 0 : i32
    %c0_i32_1 = arith.constant 0 : i32
    return %c0_i32, %c0_i32_0 : i32, i32
  }
  func.func @transform_14(%arg0: i32) -> (i32, i32, i32) {
    %c0_i32 = arith.constant 0 : i32
    %c0_i32_0 = arith.constant 0 : i32
    %c0_i32_1 = arith.constant 0 : i32
    return %arg0, %c0_i32, %c0_i32_0 : i32, i32, i32
  }
}

</mosaic_0001>

<bundles_post_ra>
// kernel: omc_forward.1
= control target key start
LH: loop header
LB: loop body
LE: loop exit
PB: predicated region body
PF: predicated region fallthrough
CT: control target
= control target key end

     0   :  { %s8525_s29 = smov 0   ;;  %s11064_s0 = inlined_call_operand.vmem [shape: bf16[2,256,36], index: 0, kind: input, shape index: {}]   ;;  %s11065_s1 = inlined_call_operand.vmem [shape: bf16[2,256,4], index: 1, kind: input, shape index: {}]   ;;  %s11066_s2 = inlined_call_operand.vmem [shape: bf16[36,128], index: 2, kind: input, shape index: {}]   ;;  %s11067_s3 = inlined_call_operand.vmem [shape: f32[1,128], index: 3, kind: input, shape index: {}]   ;;  %s11068_s4 = inlined_call_operand.vmem [shape: f32[1,128], index: 4, kind: input, shape index: {}]   ;;  %s11069_s5 = inlined_call_operand.vmem [shape: bf16[128,128], index: 5, kind: input, shape index: {}]   ;;  %s11070_s6 = inlined_call_operand.vmem [shape: bf16[128,128], index: 6, kind: input, shape index: {}]   ;;  %s11071_s7 = inlined_call_operand.vmem [shape: bf16[4,256,128], index: 7, kind: input, shape index: {}]   ;;  %s11072_s8 = inlined_call_operand.vmem [shape: bf16[128,128], index: 8, kind: input, shape index: {}]   ;;  %s11073_s9 = inlined_call_operand.vmem [shape: f32[1,128], index: 9, kind: input, shape index: {}]   ;;  %s11074_s10 = inlined_call_operand.vmem [shape: f32[1,128], index: 10, kind: input, shape index: {}]   ;;  %s11075_s11 = inlined_call_operand.vmem [shape: bf16[4,128], index: 11, kind: input, shape index: {}]   ;;  %s11076_s12 = inlined_call_operand.vmem [shape: f32[1,128], index: 12, kind: input, shape index: {}]   ;;  %s11077_s13 = inlined_call_operand.vmem [shape: f32[1,128], index: 13, kind: input, shape index: {}]   ;;  %s11078_s14 = inlined_call_operand.vmem [shape: bf16[2,256,128], index: 14, kind: output, shape index: {}]  }
   0x1 LB: > { %s6738_s30 = sadd.s32 4294967295, %s8445_s29   ;;  %p6742_p0 = scmp.ge.s32.totalorder %s8445_s29, 1  ;;  %s8445_s29 = sphi %s8525_s29, %s24_s29  }
   0x2   : > { %p422_p1 = scmp.lt.s32.totalorder %s8445_s29, 3 }
   0x4   : > { %p423_p2 = pnand %p6742_p0, %p422_p1 }
   0x6   : > { %426 = sbr.rel (%p423_p2) target bundleno = 1563 (0x61b), region = 76 }
   0xd   : > { %v8216_v0 = vld [vmem:[%s11066_s2] sm:$0xff]   ;;  %v8217_v1 = vld [vmem:[%s11066_s2 + $0x8] sm:$0xff]   ;;  %p473_p3 = scmp.lt.s32.totalorder %s6738_s30, 1  ;;  %v8218_v2 = vld [vmem:[%s11066_s2 + $0x10] ss:$0 sps:$4 sm:$0x33]  }
   0xe   : > { %7983 = vmatprep.subr.bf16.mxu0 %v8216_v0  ;;  %vm670_vm0 = vcmask 1041408   ;;  %vm621_vm1 = vcmask 293888   ;;  %vm8448_vm2 = vmmov 0  }
   0xf   : > { %7984 = vmatpush3.bf16.msra.mxu0 %v8216_v0  ;;  %s11155_s30 = smov (!%p473_p3, %s6738_s30), 1  ;;  %v672_v4 = vsel %vm670_vm0, %v8218_v2, 0 }
  0x10   : > { %7985 = vmatprep.subr.bf16.mxu0 %v8217_v1  ;;  %s8542_s21 = sshll.u32 %s11155_s30, 7 }
  0x11   : > { %s8548_s24 = scalar_lea.vmem %s11064_s0, %s8542_s21  ;;  %s8588_s27 = scalar_lea.vmem %s11065_s1, %s8542_s21 }
  0x12   : > { %v8219_v3 = vld [vmem:[%s8548_s24] sm:$0xff]   ;;  %v8220_v5 = vld [vmem:[%s8548_s24 + $0x8] sm:$0xff]   ;;  %v8221_v6 = vld [vmem:[%s8548_s24 + $0x10] sm:$0xff]   ;;  %s10943_s30 = scalar_lea.vmem %s11078_s14, %s8542_s21 }
  0x13   : > { %7986 = vmatpush3.bf16.msra.mxu0 %v8217_v1  ;;  %7989 = vmatprep.mubr.msk.bf16.mxu0 %vm621_vm1, %v8219_v3  ;;  %v8222_v7 = vld [vmem:[%s8548_s24 + $0x18] sm:$0xff]   ;;  %v8223_v8 = vld [vmem:[%s8548_s24 + $0x20] sm:$0xff]   ;;  %v8224_v9 = vld [vmem:[%s8548_s24 + $0x28] sm:$0xff]  }
  0x14   : > { %8199 = vmatprep.subr.msk.bf16.mxu0 %vm670_vm0, %v8218_v2  ;;  %v8225_v10 = vld [vmem:[%s8548_s24 + $0x30] sm:$0xff]   ;;  %v8226_v11 = vld [vmem:[%s8548_s24 + $0x38] sm:$0xff]   ;;  %v8227_v12 = vld [vmem:[%s8548_s24 + $0x40] sm:$0xff]  }
  0x15   : > { %v8228_v13 = vld [vmem:[%s8548_s24 + $0x48] sm:$0xff]   ;;  %v8229_v14 = vld [vmem:[%s8548_s24 + $0x50] sm:$0xff]   ;;  %v8230_v15 = vld [vmem:[%s8548_s24 + $0x58] sm:$0xff]  }
  0x16   : > { %v8231_v16 = vld [vmem:[%s8548_s24 + $0x60] sm:$0xff]   ;;  %v8232_v17 = vld [vmem:[%s8548_s24 + $0x68] sm:$0xff]   ;;  %v8233_v18 = vld [vmem:[%s8548_s24 + $0x70] sm:$0xff]  }
  0x17   : > { %7988 = vmatpush3.bf16.msra.mxu0 %v672_v4  ;;  %v8234_v19 = vld [vmem:[%s8548_s24 + $0x78] sm:$0xff]  }
  0x1a   : > { %7990 = vmatmul.mubr.msk.bf16.vlgmr.msra.gmra.mrb[0].mxu0 %vm621_vm1, %v8220_v5 }
  0x1b   : > { %7993 = vmatprep.mubr.msk.bf16.mxu0 %vm621_vm1, %v8221_v6 }
  0x22   : > { %7994 = vmatmul.mubr.msk.bf16.gmra.mrb[4].mxu0 %vm621_vm1, %v8222_v7 }
  0x23   : > { %7997 = vmatprep.mubr.msk.bf16.mxu0 %vm621_vm1, %v8223_v8 }
  0x2a   : > { %7998 = vmatmul.mubr.msk.bf16.gmra.mrb[8].mxu0 %vm621_vm1, %v8224_v9 }
  0x2b   : > { %8001 = vmatprep.mubr.msk.bf16.mxu0 %vm621_vm1, %v8225_v10 }
  0x32   : > { %8002 = vmatmul.mubr.msk.bf16.gmra.mrb[12].mxu0 %vm621_vm1, %v8226_v11 }
  0x33   : > { %8005 = vmatprep.mubr.msk.bf16.mxu0 %vm621_vm1, %v8227_v12 }
  0x3a   : > { %8006 = vmatmul.mubr.msk.bf16.gmra.mrb[16].mxu0 %vm621_vm1, %v8228_v13 }
  0x3b   : > { %8009 = vmatprep.mubr.msk.bf16.mxu0 %vm621_vm1, %v8229_v14 }
  0x42   : > { %8010 = vmatmul.mubr.msk.bf16.gmra.mrb[20].mxu0 %vm621_vm1, %v8230_v15 }
  0x43   : > { %8013 = vmatprep.mubr.msk.bf16.mxu0 %vm621_vm1, %v8231_v16 }
  0x4a   : > { %8014 = vmatmul.mubr.msk.bf16.gmra.mrb[24].mxu0 %vm621_vm1, %v8232_v17 }
  0x4b   : > { %8017 = vmatprep.mubr.msk.bf16.mxu0 %vm621_vm1, %v8233_v18 }
  0x52   : > { %8018 = vmatmul.mubr.msk.bf16.gmra.mrb[28].mxu0 %vm621_vm1, %v8234_v19 }
  0xed   : > { %v8590_v20 = vpop.f32.mrb[0].mxu0 }
  0xee   : > { %v8592_v21 = vpop.f32.mrb[1].mxu0  ;;  %v874_v27 = vmul.f32 %v8590_v20, %v8590_v20 }
  0xef   : > { %v8594_v22 = vpop.f32.mrb[2].mxu0  ;;  %v872_v24 = vmul.f32 %v8592_v21, %v8592_v21 }
  0xf0   : > { %v8596_v23 = vpop.f32.mrb[3].mxu0  ;;  %v875_v30 = vmul.f32 %v8594_v22, %v8594_v22 }
  0xf1   : > { %v835_v25 = vadd.f32 %v8596_v23, %v8592_v21  ;;  %v873_v26 = vmul.f32 %v8596_v23, %v8596_v23 }
  0xf3   : > { %v836_v28 = vadd.f32 %v8590_v20, %v835_v25  ;;  %v904_v29 = vadd.f32 %v873_v26, %v872_v24 }
  0xf5   : > { %v905_v31 = vadd.f32 %v904_v29, %v874_v27  ;;  %v8609_v32 = vpop.f32.mrb[4].mxu0  ;;  %v837_v33 = vadd.f32 %v8594_v22, %v836_v28 }
  0xf6   : > { %v8612_v34 = vpop.f32.mrb[5].mxu0  ;;  %v878_v43 = vmul.f32 %v8609_v32, %v8609_v32 }
  0xf7   : > { %v838_v35 = vadd.f32 %v837_v33, %v8612_v34  ;;  %v876_v36 = vmul.f32 %v8612_v34, %v8612_v34  ;;  %v906_v37 = vadd.f32 %v905_v31, %v875_v30  ;;  %v8617_v38 = vpop.f32.mrb[6].mxu0 }
  0xf8   : > { %v8619_v39 = vpop.f32.mrb[7].mxu0  ;;  %v879_v46 = vmul.f32 %v8617_v38, %v8617_v38 }
  0xf9   : > { %v907_v40 = vadd.f32 %v906_v37, %v876_v36  ;;  %v839_v41 = vadd.f32 %v838_v35, %v8619_v39  ;;  %v877_v42 = vmul.f32 %v8619_v39, %v8619_v39 }
  0xfb   : > { %v840_v44 = vadd.f32 %v8609_v32, %v839_v41  ;;  %v908_v45 = vadd.f32 %v907_v40, %v877_v42 }
  0xfd   : > { %v909_v47 = vadd.f32 %v908_v45, %v878_v43  ;;  %v8629_v48 = vpop.f32.mrb[8].mxu0  ;;  %v841_v49 = vadd.f32 %v8617_v38, %v840_v44 }
  0xfe   : > { %v8632_v50 = vpop.f32.mrb[9].mxu0  ;;  %v882_v59 = vmul.f32 %v8629_v48, %v8629_v48 }
  0xff   : > { %v842_v51 = vadd.f32 %v841_v49, %v8632_v50  ;;  %v880_v52 = vmul.f32 %v8632_v50, %v8632_v50  ;;  %v910_v53 = vadd.f32 %v909_v47, %v879_v46  ;;  %v8637_v54 = vpop.f32.mrb[10].mxu0 }
 0x100   : > { %v8639_v55 = vpop.f32.mrb[11].mxu0  ;;  %v883_v62 = vmul.f32 %v8637_v54, %v8637_v54 }
 0x101   : > { %v911_v56 = vadd.f32 %v910_v53, %v880_v52  ;;  %v843_v57 = vadd.f32 %v842_v51, %v8639_v55  ;;  %v881_v58 = vmul.f32 %v8639_v55, %v8639_v55 }
 0x103   : > { %v844_v60 = vadd.f32 %v8629_v48, %v843_v57  ;;  %v912_v61 = vadd.f32 %v911_v56, %v881_v58 }
 0x105   : > { %v913_v63 = vadd.f32 %v912_v61, %v882_v59  ;;  %v8649_v0 = vpop.f32.mrb[12].mxu0  ;;  %v845_v1 = vadd.f32 %v8637_v54, %v844_v60 }
 0x106   : > { %v8652_v2 = vpop.f32.mrb[13].mxu0  ;;  %v886_v11 = vmul.f32 %v8649_v0, %v8649_v0 }
 0x107   : > { %v846_v3 = vadd.f32 %v845_v1, %v8652_v2  ;;  %v884_v4 = vmul.f32 %v8652_v2, %v8652_v2  ;;  %v914_v5 = vadd.f32 %v913_v63, %v883_v62  ;;  %v8657_v6 = vpop.f32.mrb[14].mxu0 }
 0x108   : > { %v8659_v7 = vpop.f32.mrb[15].mxu0  ;;  %v887_v14 = vmul.f32 %v8657_v6, %v8657_v6 }
 0x109   : > { %v915_v8 = vadd.f32 %v914_v5, %v884_v4  ;;  %v847_v9 = vadd.f32 %v846_v3, %v8659_v7  ;;  %v885_v10 = vmul.f32 %v8659_v7, %v8659_v7 }
 0x10b   : > { %v848_v12 = vadd.f32 %v8649_v0, %v847_v9  ;;  %v916_v13 = vadd.f32 %v915_v8, %v885_v10 }
 0x10d   : > { %v917_v15 = vadd.f32 %v916_v13, %v886_v11  ;;  %v8669_v16 = vpop.f32.mrb[16].mxu0  ;;  %v849_v17 = vadd.f32 %v8657_v6, %v848_v12 }
 0x10e   : > { %v8672_v18 = vpop.f32.mrb[17].mxu0  ;;  %v890_v31 = vmul.f32 %v8669_v16, %v8669_v16 }
 0x10f   : > { %v850_v19 = vadd.f32 %v849_v17, %v8672_v18  ;;  %v888_v24 = vmul.f32 %v8672_v18, %v8672_v18  ;;  %v918_v25 = vadd.f32 %v917_v15, %v887_v14  ;;  %v8677_v26 = vpop.f32.mrb[18].mxu0 }
 0x110   : > { %v8679_v27 = vpop.f32.mrb[19].mxu0  ;;  %v891_v36 = vmul.f32 %v8677_v26, %v8677_v26 }
 0x111   : > { %v919_v28 = vadd.f32 %v918_v25, %v888_v24  ;;  %v851_v29 = vadd.f32 %v850_v19, %v8679_v27  ;;  %v889_v30 = vmul.f32 %v8679_v27, %v8679_v27 }
 0x113   : > { %v852_v33 = vadd.f32 %v8669_v16, %v851_v29  ;;  %v920_v35 = vadd.f32 %v919_v28, %v889_v30 }
 0x115   : > { %v921_v37 = vadd.f32 %v920_v35, %v890_v31  ;;  %v8689_v40 = vpop.f32.mrb[20].mxu0  ;;  %v853_v41 = vadd.f32 %v8677_v26, %v852_v33 }
 0x116   : > { %v8692_v42 = vpop.f32.mrb[21].mxu0  ;;  %v894_v53 = vmul.f32 %v8689_v40, %v8689_v40 }
 0x117   : > { %v854_v43 = vadd.f32 %v853_v41, %v8692_v42  ;;  %v892_v44 = vmul.f32 %v8692_v42, %v8692_v42  ;;  %v922_v45 = vadd.f32 %v921_v37, %v891_v36  ;;  %v8697_v46 = vpop.f32.mrb[22].mxu0 }
 0x118   : > { %v8699_v47 = vpop.f32.mrb[23].mxu0  ;;  %v895_v58 = vmul.f32 %v8697_v46, %v8697_v46 }
 0x119   : > { %v923_v49 = vadd.f32 %v922_v45, %v892_v44  ;;  %v855_v51 = vadd.f32 %v854_v43, %v8699_v47  ;;  %v893_v52 = vmul.f32 %v8699_v47, %v8699_v47  ;;  %v8235_v44 = vld [vmem:[%s11069_s5] sm:$0xff]   ;;  %v8447_v45 = vmov 0.0  }
 0x11a   : > { %8021 = vmatprep.subr.bf16.mxu1 %v8447_v45  ;;  %8037 = vmatprep.mubr.msk.bf16.mxu1 %vm8448_vm2, %v8447_v45 }
 0x11b   : > { %v856_v56 = vadd.f32 %v8689_v40, %v855_v51  ;;  %v924_v57 = vadd.f32 %v923_v49, %v893_v52  ;;  %8022 = vmatpush3.bf16.msra.mxu1 %v8235_v44 }
 0x11c   : > { %8023 = vmatprep.subr.bf16.mxu1 %v8447_v45 }
 0x11d   : > { %v925_v59 = vadd.f32 %v924_v57, %v894_v53  ;;  %v8709_v60 = vpop.f32.mrb[24].mxu0  ;;  %v857_v61 = vadd.f32 %v8697_v46, %v856_v56  ;;  %v8236_v57 = vld [vmem:[%s11069_s5 + $0x8] sm:$0xff]  }
 0x11e   : > { %v8712_v62 = vpop.f32.mrb[25].mxu0  ;;  %v898_v11 = vmul.f32 %v8709_v60, %v8709_v60 }
 0x11f   : > { %v858_v63 = vadd.f32 %v857_v61, %v8712_v62  ;;  %v896_v1 = vmul.f32 %v8712_v62, %v8712_v62  ;;  %v926_v3 = vadd.f32 %v925_v59, %v895_v58  ;;  %v8717_v4 = vpop.f32.mrb[26].mxu0  ;;  %8024 = vmatpush3.bf16.msra.mxu1 %v8236_v57 }
 0x120   : > { %v8719_v5 = vpop.f32.mrb[27].mxu0  ;;  %v899_v14 = vmul.f32 %v8717_v4, %v8717_v4  ;;  %8025 = vmatprep.subr.bf16.mxu1 %v8447_v45 }
 0x121   : > { %v927_v8 = vadd.f32 %v926_v3, %v896_v1  ;;  %v859_v9 = vadd.f32 %v858_v63, %v8719_v5  ;;  %v897_v10 = vmul.f32 %v8719_v5, %v8719_v5  ;;  %v8237_v1 = vld [vmem:[%s11069_s5 + $0x10] sm:$0xff]  }
 0x123   : > { %v860_v12 = vadd.f32 %v8709_v60, %v859_v9  ;;  %v928_v13 = vadd.f32 %v927_v8, %v897_v10  ;;  %8026 = vmatpush3.bf16.msra.mxu1 %v8237_v1  ;;  %v8238_v9 = vld [vmem:[%s11069_s5 + $0x18] sm:$0xff]  }
 0x124   : > { %8027 = vmatprep.subr.bf16.mxu1 %v8447_v45 }
 0x125   : > { %v929_v15 = vadd.f32 %v928_v13, %v898_v11  ;;  %v8729_v17 = vpop.f32.mrb[28].mxu0  ;;  %v861_v19 = vadd.f32 %v8717_v4, %v860_v12 }
 0x126   : > { %v8732_v24 = vpop.f32.mrb[29].mxu0  ;;  %v902_v37 = vmul.f32 %v8729_v17, %v8729_v17 }
 0x127   : > { %v862_v25 = vadd.f32 %v861_v19, %v8732_v24  ;;  %v900_v28 = vmul.f32 %v8732_v24, %v8732_v24  ;;  %v930_v29 = vadd.f32 %v929_v15, %v899_v14  ;;  %v8737_v30 = vpop.f32.mrb[30].mxu0  ;;  %8028 = vmatpush3.bf16.msra.mxu1 %v8238_v9  ;;  %v8239_v14 = vld [vmem:[%s11069_s5 + $0x20] sm:$0xff]  }
 0x128   : > { %v8739_v31 = vpop.f32.mrb[31].mxu0  ;;  %v903_v49 = vmul.f32 %v8737_v30, %v8737_v30  ;;  %8029 = vmatprep.subr.bf16.mxu1 %v8447_v45 }
 0x129   : > { %v931_v33 = vadd.f32 %v930_v29, %v900_v28  ;;  %v863_v35 = vadd.f32 %v862_v25, %v8739_v31  ;;  %v901_v36 = vmul.f32 %v8739_v31, %v8739_v31 }
 0x12b   : > { %v864_v41 = vadd.f32 %v8729_v17, %v863_v35  ;;  %v932_v43 = vadd.f32 %v931_v33, %v901_v36  ;;  %8030 = vmatpush3.bf16.msra.mxu1 %v8239_v14  ;;  %v8240_v35 = vld [vmem:[%s11069_s5 + $0x28] sm:$0xff]  }
 0x12c   : > { %8031 = vmatprep.subr.bf16.mxu1 %v8447_v45 }
 0x12d   : > { %v865_v51 = vadd.f32 %v8737_v30, %v864_v41  ;;  %v933_v52 = vadd.f32 %v932_v43, %v902_v37 }
 0x12f   : > { %v866_v53 = vrot.slane %v865_v51, 4  ;;  %v934_v56 = vadd.f32 %v933_v52, %v903_v49  ;;  %8032 = vmatpush3.bf16.msra.mxu1 %v8240_v35 }
 0x130   : > { %8033 = vmatprep.subr.bf16.mxu1 %v8447_v45 }
 0x131   : > { %v867_v58 = vadd.f32 %v866_v53, %v865_v51  ;;  %v935_v59 = vrot.slane %v934_v56, 4 }
 0x133   : > { %v868_v61 = vrot.slane %v867_v58, 2  ;;  %v936_v63 = vadd.f32 %v935_v59, %v934_v56 }
 0x135   : > { %v869_v3 = vadd.f32 %v868_v61, %v867_v58  ;;  %v937_v8 = vrot.slane %v936_v63, 2 }
 0x137   : > { %v870_v10 = vrot.slane %v869_v3, 1  ;;  %v938_v11 = vadd.f32 %v937_v8, %v936_v63 }
 0x139   : > { %v871_v12 = vadd.f32 %v870_v10, %v869_v3  ;;  %v939_v13 = vrot.slane %v938_v11, 1 }
 0x13b   : > { %v940_v15 = vadd.f32 %v939_v13, %v938_v11  ;;  %v8772_v19 = vmul.f32 0.00390625, %v871_v12 }
 0x13d   : > { %v942_v25 = vmul.f32 0.00390625, %v940_v15  ;;  %v943_v28 = vmul.f32 %v8772_v19, %v8772_v19  ;;  %v974_v29 = vsub.f32 %v8739_v31, %v8772_v19  ;;  %v945_v33 = vsub.f32 %v8592_v21, %v8772_v19 }
 0x13e   : > { %v946_v36 = vsub.f32 %v8596_v23, %v8772_v19  ;;  %v947_v37 = vsub.f32 %v8590_v20, %v8772_v19  ;;  %v948_v41 = vsub.f32 %v8594_v22, %v8772_v19  ;;  %v949_v31 = vsub.f32 %v8612_v34, %v8772_v19 }
 0x13f   : > { %v944_v21 = vsub.f32 %v942_v25, %v943_v28  ;;  %v950_v43 = vsub.f32 %v8619_v39, %v8772_v19  ;;  %v951_v44 = vsub.f32 %v8609_v32, %v8772_v19  ;;  %v952_v23 = vsub.f32 %v8617_v38, %v8772_v19 }
 0x140   : > { %v953_v20 = vsub.f32 %v8632_v50, %v8772_v19  ;;  %v954_v22 = vsub.f32 %v8639_v55, %v8772_v19  ;;  %v955_v34 = vsub.f32 %v8629_v48, %v8772_v19  ;;  %v956_v49 = vsub.f32 %v8637_v54, %v8772_v19  ;;  %v8241_v50 = vld [vmem:[%s11069_s5 + $0x30] sm:$0xff]  }
 0x141   : > { %v977_v51 = vadd.f32 1e-05, %v944_v21  ;;  %v957_v39 = vsub.f32 %v8652_v2, %v8772_v19  ;;  %v958_v32 = vsub.f32 %v8659_v7, %v8772_v19  ;;  %v959_v38 = vsub.f32 %v8649_v0, %v8772_v19  ;;  %8034 = vmatpush3.bf16.msra.mxu1 %v8241_v50  ;;  %v8898_v21 = vld [vmem:[%s11067_s3] ss:$0 sm:$0xff] }
 0x142   : > { %v960_v48 = vsub.f32 %v8657_v6, %v8772_v19  ;;  %v961_v54 = vsub.f32 %v8672_v18, %v8772_v19  ;;  %v962_v55 = vsub.f32 %v8679_v27, %v8772_v19  ;;  %v963_v2 = vsub.f32 %v8669_v16, %v8772_v19  ;;  %8035 = vmatprep.subr.bf16.mxu1 %v8447_v45 }
 0x143   : > { %8427 = vrsqrt.f32 %v977_v51  ;;  %v964_v0 = vsub.f32 %v8677_v26, %v8772_v19  ;;  %v965_v7 = vsub.f32 %v8692_v42, %v8772_v19  ;;  %v966_v6 = vsub.f32 %v8699_v47, %v8772_v19 }
 0x144   : > { %v967_v18 = vsub.f32 %v8689_v40, %v8772_v19  ;;  %v968_v27 = vsub.f32 %v8697_v46, %v8772_v19  ;;  %v969_v16 = vsub.f32 %v8712_v62, %v8772_v19  ;;  %v970_v52 = vsub.f32 %v8719_v5, %v8772_v19  ;;  %v8242_v46 = vld [vmem:[%s11069_s5 + $0x38] sm:$0xff]  }
 0x145   : > { %v971_v26 = vsub.f32 %v8709_v60, %v8772_v19  ;;  %v972_v42 = vsub.f32 %v8717_v4, %v8772_v19  ;;  %v973_v47 = vsub.f32 %v8732_v24, %v8772_v19  ;;  %v975_v40 = vsub.f32 %v8729_v17, %v8772_v19  ;;  %8036 = vmatpush3.bf16.msra.mxu1 %v8242_v46 }
 0x146   : > { %v976_v62 = vsub.f32 %v8737_v30, %v8772_v19  ;;  %8041 = vmatprep.subr.bf16.mxu1 %v8447_v45 }
 0x14d   : > { %v8428_v60 = vpop.eup %8427 }
 0x14e   : > { %v8853_v4 = vmul.f32 %v8428_v60, %v974_v29  ;;  %v979_v5 = vmul.f32 %v8428_v60, %v945_v33  ;;  %v980_v24 = vmul.f32 %v8428_v60, %v946_v36  ;;  %v981_v53 = vmul.f32 %v8428_v60, %v947_v37 }
 0x14f   : > { %v982_v17 = vmul.f32 %v8428_v60, %v948_v41  ;;  %v983_v56 = vmul.f32 %v8428_v60, %v949_v31  ;;  %v984_v57 = vmul.f32 %v8428_v60, %v950_v43  ;;  %v985_v58 = vmul.f32 %v8428_v60, %v951_v44 }
 0x150   : > { %v986_v59 = vmul.f32 %v8428_v60, %v952_v23  ;;  %v987_v61 = vmul.f32 %v8428_v60, %v953_v20  ;;  %v988_v63 = vmul.f32 %v8428_v60, %v954_v22  ;;  %v989_v1 = vmul.f32 %v8428_v60, %v955_v34  ;;  %v8905_v23 = vld [vmem:[%s11068_s4] ss:$0 sm:$0xff] }
 0x151   : > { %v8855_v30 = vmul.f32 %v8428_v60, %v956_v49  ;;  %v8857_v3 = vmul.f32 %v8428_v60, %v957_v39  ;;  %v8859_v8 = vmul.f32 %v8428_v60, %v958_v32  ;;  %v8861_v9 = vmul.f32 %v8428_v60, %v959_v38 }
 0x152   : > { %v8863_v10 = vmul.f32 %v8428_v60, %v960_v48  ;;  %v8865_v11 = vmul.f32 %v8428_v60, %v961_v54  ;;  %v8867_v12 = vmul.f32 %v8428_v60, %v962_v55  ;;  %v8869_v13 = vmul.f32 %v8428_v60, %v963_v2 }
 0x153   : > { %v8871_v14 = vmul.f32 %v8428_v60, %v964_v0  ;;  %v8873_v15 = vmul.f32 %v8428_v60, %v965_v7  ;;  %v8875_v19 = vmul.f32 %v8428_v60, %v966_v6  ;;  %v8877_v25 = vmul.f32 %v8428_v60, %v967_v18 }
 0x154   : > { %v8879_v28 = vmul.f32 %v8428_v60, %v968_v27  ;;  %v8881_v29 = vmul.f32 %v8428_v60, %v969_v16  ;;  %v8883_v33 = vmul.f32 %v8428_v60, %v970_v52  ;;  %v8885_v35 = vmul.f32 %v8428_v60, %v971_v26 }
 0x155   : > { %v8887_v36 = vmul.f32 %v8428_v60, %v972_v42  ;;  %v8889_v37 = vmul.f32 %v8428_v60, %v973_v47  ;;  %v8891_v41 = vmul.f32 %v8428_v60, %v975_v40  ;;  %v8893_v31 = vmul.f32 %v8428_v60, %v976_v62 }
 0x156   : > { %v1018_v43 = vmul.f32 %v8898_v21, %v979_v5  ;;  %v1019_v44 = vmul.f32 %v8898_v21, %v980_v24  ;;  %v1020_v20 = vmul.f32 %v8898_v21, %v981_v53  ;;  %v1021_v49 = vmul.f32 %v8898_v21, %v982_v17 }
 0x157   : > { %v1022_v51 = vmul.f32 %v8898_v21, %v983_v56  ;;  %v1023_v50 = vmul.f32 %v8898_v21, %v984_v57  ;;  %v1024_v54 = vmul.f32 %v8898_v21, %v985_v58  ;;  %v1025_v6 = vmul.f32 %v8898_v21, %v986_v59 }
 0x158   : > { %v1057_v22 = vadd.f32 %v8905_v23, %v1018_v43  ;;  %v1058_v34 = vadd.f32 %v8905_v23, %v1019_v44  ;;  %v1059_v39 = vadd.f32 %v8905_v23, %v1020_v20  ;;  %v1060_v48 = vadd.f32 %v8905_v23, %v1021_v49 }
 0x159   : > { %v1061_v55 = vadd.f32 %v8905_v23, %v1022_v51  ;;  %v1062_v18 = vadd.f32 %v8905_v23, %v1023_v50  ;;  %v1026_v52 = vmul.f32 %v8898_v21, %v987_v61  ;;  %v1063_v26 = vadd.f32 %v8905_v23, %v1024_v54 }
 0x15a   : > { %v1121_v32 = vmul.f32 0.01, %v1057_v22  ;;  %v1122_v38 = vmul.f32 0.01, %v1058_v34  ;;  %vm1089_vm3 = vcmp.ge.f32.partialorder %v1057_v22, 0.0  ;;  %vm1090_vm4 = vcmp.ge.f32.partialorder %v1058_v34, 0.0 }
 0x15b   : > { %v1123_v2 = vmul.f32 0.01, %v1059_v39  ;;  %vm1091_vm5 = vcmp.ge.f32.partialorder %v1059_v39, 0.0  ;;  %v1124_v27 = vmul.f32 0.01, %v1060_v48  ;;  %vm1092_vm6 = vcmp.ge.f32.partialorder %v1060_v48, 0.0 }
 0x15c   : > { %v8917_v0 = vsel %vm1089_vm3, %v1057_v22, %v1121_v32  ;;  %v8919_v7 = vsel %vm1090_vm4, %v1058_v34, %v1122_v38  ;;  %v1125_v42 = vmul.f32 0.01, %v1061_v55  ;;  %vm1093_vm7 = vcmp.ge.f32.partialorder %v1061_v55, 0.0 }
 0x15d   : > { %v1185_v16 = vadd.f32 %v8919_v7, %v8917_v0  ;;  %v8927_v47 = vsel %vm1091_vm5, %v1059_v39, %v1123_v2  ;;  %v1027_v46 = vmul.f32 %v8898_v21, %v988_v63  ;;  %v1064_v62 = vadd.f32 %v8905_v23, %v1025_v6 }
 0x15e   : > { %v1126_v60 = vmul.f32 0.01, %v1062_v18  ;;  %v8932_v5 = vsel %vm1092_vm6, %v1060_v48, %v1124_v27  ;;  %vm1094_vm8 = vcmp.ge.f32.partialorder %v1062_v18, 0.0  ;;  %v1028_v53 = vmul.f32 %v8898_v21, %v989_v1 }
 0x15f   : > { %v1186_v40 = vadd.f32 %v1185_v16, %v8927_v47  ;;  %v1065_v17 = vadd.f32 %v8905_v23, %v1026_v52  ;;  %v1127_v56 = vmul.f32 0.01, %v1063_v26  ;;  %v8937_v57 = vsel %vm1093_vm7, %v1061_v55, %v1125_v42 }
 0x160   : > { %vm1095_vm9 = vcmp.ge.f32.partialorder %v1063_v26, 0.0  ;;  %v1029_v59 = vmul.f32 %v8898_v21, %v8855_v30  ;;  %v1066_v61 = vadd.f32 %v8905_v23, %v1027_v46  ;;  %v1128_v63 = vmul.f32 0.01, %v1064_v62 }
 0x161   : > { %v1187_v24 = vadd.f32 %v1186_v40, %v8932_v5  ;;  %v8943_v43 = vsel %vm1094_vm8, %v1062_v18, %v1126_v60  ;;  %vm1096_vm10 = vcmp.ge.f32.partialorder %v1064_v62, 0.0  ;;  %v1030_v1 = vmul.f32 %v8898_v21, %v8857_v3 }
 0x162   : > { %v1067_v20 = vadd.f32 %v8905_v23, %v1028_v53  ;;  %v1129_v22 = vmul.f32 0.01, %v1065_v17  ;;  %v8949_v34 = vsel %vm1095_vm9, %v1063_v26, %v1127_v56  ;;  %vm1097_vm11 = vcmp.ge.f32.partialorder %v1065_v17, 0.0 }
 0x163   : > { %v1188_v58 = vadd.f32 %v1187_v24, %v8937_v57  ;;  %v1031_v30 = vmul.f32 %v8898_v21, %v8859_v8  ;;  %v1068_v51 = vadd.f32 %v8905_v23, %v1029_v59  ;;  %v1130_v39 = vmul.f32 0.01, %v1066_v61 }
 0x164   : > { %v8955_v32 = vsel %vm1096_vm10, %v1064_v62, %v1128_v63  ;;  %vm1098_vm12 = vcmp.ge.f32.partialorder %v1066_v61, 0.0  ;;  %v1032_v3 = vmul.f32 %v8898_v21, %v8861_v9  ;;  %v1069_v50 = vadd.f32 %v8905_v23, %v1030_v1 }
 0x165   : > { %v1189_v44 = vadd.f32 %v1188_v58, %v8943_v43  ;;  %v1131_v48 = vmul.f32 0.01, %v1067_v20  ;;  %v8961_v54 = vsel %vm1097_vm11, %v1065_v17, %v1129_v22  ;;  %vm1099_vm13 = vcmp.ge.f32.partialorder %v1067_v20, 0.0 }
 0x166   : > { %v1033_v8 = vmul.f32 %v8898_v21, %v8863_v10  ;;  %v1070_v2 = vadd.f32 %v8905_v23, %v1031_v30  ;;  %v1132_v6 = vmul.f32 0.01, %v1068_v51  ;;  %v8967_v18 = vsel %vm1098_vm12, %v1066_v61, %v1130_v39 }
 0x167   : > { %v1190_v49 = vadd.f32 %v1189_v44, %v8949_v34  ;;  %vm1100_vm14 = vcmp.ge.f32.partialorder %v1068_v51, 0.0  ;;  %v1034_v9 = vmul.f32 %v8898_v21, %v8865_v11  ;;  %v1071_v16 = vadd.f32 %v8905_v23, %v1032_v3 }
 0x168   : > { %v1133_v52 = vmul.f32 0.01, %v1069_v50  ;;  %v8973_v26 = vsel %vm1099_vm13, %v1067_v20, %v1131_v48  ;;  %vm1101_vm15 = vcmp.ge.f32.partialorder %v1069_v50, 0.0  ;;  %v1035_v10 = vmul.f32 %v8898_v21, %v8867_v12 }
 0x169   : > { %v1191_v38 = vadd.f32 %v1190_v49, %v8955_v32  ;;  %v1072_v40 = vadd.f32 %v8905_v23, %v1033_v8  ;;  %v1134_v46 = vmul.f32 0.01, %v1070_v2  ;;  %v8979_v62 = vsel %vm1100_vm14, %v1068_v51, %v1132_v6 }
 0x16a   : > { %vm1102_vm1 = vcmp.ge.f32.partialorder %v1070_v2, 0.0  ;;  %v1036_v11 = vmul.f32 %v8898_v21, %v8869_v13  ;;  %v1073_v24 = vadd.f32 %v8905_v23, %v1034_v9  ;;  %v1135_v53 = vmul.f32 0.01, %v1071_v16 }
 0x16b   : > { %v1192_v55 = vadd.f32 %v1191_v38, %v8961_v54  ;;  %v8985_v17 = vsel %vm1101_vm15, %v1069_v50, %v1133_v52  ;;  %vm1103_vm3 = vcmp.ge.f32.partialorder %v1071_v16, 0.0  ;;  %v1037_v12 = vmul.f32 %v8898_v21, %v8871_v14 }
 0x16c   : > { %v1074_v58 = vadd.f32 %v8905_v23, %v1035_v10  ;;  %v1136_v59 = vmul.f32 0.01, %v1072_v40  ;;  %v8991_v61 = vsel %vm1102_vm1, %v1070_v2, %v1134_v46  ;;  %vm1104_vm4 = vcmp.ge.f32.partialorder %v1072_v40, 0.0 }
 0x16d   : > { %v1193_v27 = vadd.f32 %v1192_v55, %v8967_v18  ;;  %v1038_v13 = vmul.f32 %v8898_v21, %v8873_v15  ;;  %v1075_v44 = vadd.f32 %v8905_v23, %v1036_v11  ;;  %v1137_v1 = vmul.f32 0.01, %v1073_v24 }
 0x16e   : > { %v8997_v20 = vsel %vm1103_vm3, %v1071_v16, %v1135_v53  ;;  %vm1105_vm5 = vcmp.ge.f32.partialorder %v1073_v24, 0.0  ;;  %v1039_v14 = vmul.f32 %v8898_v21, %v8875_v19  ;;  %v1076_v49 = vadd.f32 %v8905_v23, %v1037_v12 }
 0x16f   : > { %v1194_v42 = vadd.f32 %v1193_v27, %v8973_v26  ;;  %v1138_v30 = vmul.f32 0.01, %v1074_v58  ;;  %v9003_v51 = vsel %vm1104_vm4, %v1072_v40, %v1136_v59  ;;  %vm1106_vm6 = vcmp.ge.f32.partialorder %v1074_v58, 0.0 }
 0x170   : > { %v1040_v15 = vmul.f32 %v8898_v21, %v8877_v25  ;;  %v1077_v38 = vadd.f32 %v8905_v23, %v1038_v13  ;;  %v1139_v3 = vmul.f32 0.01, %v1075_v44  ;;  %v9009_v50 = vsel %vm1105_vm5, %v1073_v24, %v1137_v1 }
 0x171   : > { %v1195_v60 = vadd.f32 %v1194_v42, %v8979_v62  ;;  %vm1107_vm7 = vcmp.ge.f32.partialorder %v1075_v44, 0.0  ;;  %v1041_v19 = vmul.f32 %v8898_v21, %v8879_v28  ;;  %v1078_v55 = vadd.f32 %v8905_v23, %v1039_v14 }
 0x172   : > { %v1140_v8 = vmul.f32 0.01, %v1076_v49  ;;  %v9015_v2 = vsel %vm1106_vm6, %v1074_v58, %v1138_v30  ;;  %vm1108_vm8 = vcmp.ge.f32.partialorder %v1076_v49, 0.0  ;;  %v1042_v25 = vmul.f32 %v8898_v21, %v8881_v29 }
 0x173   : > { %v1196_v56 = vadd.f32 %v1195_v60, %v8985_v17  ;;  %v1079_v27 = vadd.f32 %v8905_v23, %v1040_v15  ;;  %v1141_v9 = vmul.f32 0.01, %v1077_v38  ;;  %v9021_v16 = vsel %vm1107_vm7, %v1075_v44, %v1139_v3 }
 0x174   : > { %vm1109_vm9 = vcmp.ge.f32.partialorder %v1077_v38, 0.0  ;;  %v1043_v28 = vmul.f32 %v8898_v21, %v8883_v33  ;;  %v1080_v42 = vadd.f32 %v8905_v23, %v1041_v19  ;;  %v1142_v10 = vmul.f32 0.01, %v1078_v55 }
 0x175   : > { %v1197_v63 = vadd.f32 %v1196_v56, %v8991_v61  ;;  %v9027_v40 = vsel %vm1108_vm8, %v1076_v49, %v1140_v8  ;;  %vm1110_vm10 = vcmp.ge.f32.partialorder %v1078_v55, 0.0  ;;  %v1044_v29 = vmul.f32 %v8898_v21, %v8885_v35 }
 0x176   : > { %v1081_v60 = vadd.f32 %v8905_v23, %v1042_v25  ;;  %v1143_v11 = vmul.f32 0.01, %v1079_v27  ;;  %v9033_v24 = vsel %vm1109_vm9, %v1077_v38, %v1141_v9  ;;  %vm1111_vm11 = vcmp.ge.f32.partialorder %v1079_v27, 0.0 }
 0x177   : > { %v1198_v22 = vadd.f32 %v1197_v63, %v8997_v20  ;;  %v1045_v33 = vmul.f32 %v8898_v21, %v8887_v36  ;;  %v1082_v56 = vadd.f32 %v8905_v23, %v1043_v28  ;;  %v1144_v12 = vmul.f32 0.01, %v1080_v42 }
 0x178   : > { %v9039_v58 = vsel %vm1110_vm10, %v1078_v55, %v1142_v10  ;;  %vm1112_vm12 = vcmp.ge.f32.partialorder %v1080_v42, 0.0  ;;  %v1046_v35 = vmul.f32 %v8898_v21, %v8889_v37  ;;  %v1083_v63 = vadd.f32 %v8905_v23, %v1044_v29 }
 0x179   : > { %v1199_v39 = vadd.f32 %v1198_v22, %v9003_v51  ;;  %v1145_v13 = vmul.f32 0.01, %v1081_v60  ;;  %v9045_v44 = vsel %vm1111_vm11, %v1079_v27, %v1143_v11  ;;  %vm1113_vm13 = vcmp.ge.f32.partialorder %v1081_v60, 0.0 }
 0x17a   : > { %v1047_v36 = vmul.f32 %v8898_v21, %v8853_v4  ;;  %v1084_v22 = vadd.f32 %v8905_v23, %v1045_v33  ;;  %v1146_v14 = vmul.f32 0.01, %v1082_v56  ;;  %v9051_v49 = vsel %vm1112_vm12, %v1080_v42, %v1144_v12 }
 0x17b   : > { %v1200_v48 = vadd.f32 %v1199_v39, %v9009_v50  ;;  %vm1114_vm14 = vcmp.ge.f32.partialorder %v1082_v56, 0.0  ;;  %v1048_v37 = vmul.f32 %v8898_v21, %v8891_v41  ;;  %v1085_v39 = vadd.f32 %v8905_v23, %v1046_v35 }
 0x17c   : > { %v1147_v15 = vmul.f32 0.01, %v1083_v63  ;;  %v9057_v38 = vsel %vm1113_vm13, %v1081_v60, %v1145_v13  ;;  %vm1115_vm15 = vcmp.ge.f32.partialorder %v1083_v63, 0.0  ;;  %v1086_v4 = vadd.f32 %v8905_v23, %v1047_v36  ;;  %v8243_v36 = vld [vmem:[%s11070_s6] sm:$0xff]  }
 0x17d   : > { %v1201_v6 = vadd.f32 %v1200_v48, %v9015_v2  ;;  %v1049_v48 = vmul.f32 %v8898_v21, %v8893_v31  ;;  %v1148_v19 = vmul.f32 0.01, %v1084_v22  ;;  %v9063_v55 = vsel %vm1114_vm14, %v1082_v56, %v1146_v14  ;;  %v8244_v14 = vld [vmem:[%s11070_s6 + $0x8] sm:$0xff]  }
 0x17e   : > { %vm1116_vm1 = vcmp.ge.f32.partialorder %v1084_v22, 0.0  ;;  %v1087_v41 = vadd.f32 %v8905_v23, %v1048_v37  ;;  %v9067_v25 = vsel %vm1115_vm15, %v1083_v63, %v1147_v15  ;;  %vm1117_vm3 = vcmp.ge.f32.partialorder %v1085_v39, 0.0  ;;  %v8246_v37 = vld [vmem:[%s11070_s6 + $0x18] sm:$0xff]   ;;  %v8248_v15 = vld [vmem:[%s11070_s6 + $0x28] sm:$0xff]  }
 0x17f   : > { %v1202_v52 = vadd.f32 %v1201_v6, %v9021_v16  ;;  %v1149_v6 = vmul.f32 0.01, %v1085_v39  ;;  %v1150_v9 = vmul.f32 0.01, %v1086_v4  ;;  %v9071_v28 = vsel %vm1116_vm1, %v1084_v22, %v1148_v19  ;;  %v8252_v19 = vld [vmem:[%s11071_s7 + $0x80] sm:$0xff]  }
 0x180   : > { %vm1118_vm4 = vcmp.ge.f32.partialorder %v1086_v4, 0.0  ;;  %v1151_v21 = vmul.f32 0.01, %v1087_v41  ;;  %vm1119_vm5 = vcmp.ge.f32.partialorder %v1087_v41, 0.0  ;;  %vm1484_vm7 = vcmask 1047559  }
 0x181   : > { %v1203_v46 = vadd.f32 %v1202_v52, %v9027_v40  ;;  %v1088_v52 = vadd.f32 %v8905_v23, %v1049_v48  ;;  %v9074_v42 = vsel %vm1117_vm3, %v1085_v39, %v1149_v6  ;;  %v8247_v39 = vld [vmem:[%s11070_s6 + $0x20] sm:$0xff]   ;;  %vm1485_vm8 = vsmask.f32 7966 }
 0x182   : > { %v9080_v11 = vsel %vm1119_vm5, %v1087_v41, %v1151_v21  ;;  %v8251_v48 = vld [vmem:[%s11071_s7 + $0xc0] sm:$0xff]   ;;  %vm9197_vm9 = vmand %vm1484_vm7, %vm1485_vm8  ;;  %vm1535_vm10 = vcmask 1040384   ;;  %vm1778_vm12 = vsmask.f32 7424  ;;  %vm3537_vm13 = vcmask 31744  }
 0x183   : > { %v1204_v53 = vadd.f32 %v1203_v46, %v9033_v24  ;;  %v9077_v46 = vsel %vm1118_vm4, %v1086_v4, %v1150_v9  ;;  %v1152_v29 = vmul.f32 0.01, %v1088_v52  ;;  %vm1120_vm6 = vcmp.ge.f32.partialorder %v1088_v52, 0.0  ;;  %v8250_v4 = vld [vmem:[%s11070_s6 + $0x38] sm:$0xff]   ;;  %7403 = vmatprep.subr.bf16.mxu0 %v8251_v48  ;;  %v8258_v21 = vld [vmem:[%s11071_s7 + $0x40] sm:$0xff]  }
 0x184   : > { %7404 = vmatpush3.bf16.msra.mxu0 %v8252_v19  ;;  %v1487_v48 = vld [vmem:[#allocation2 + $0x18] sm:$0x80]  ;;  %v1490_v19 = vld [vmem:[#allocation2 + $0x30] sm:$0x80] }
 0x185   : > { %v1205_v59 = vadd.f32 %v1204_v53, %v9039_v58  ;;  %v9083_v53 = vsel %vm1120_vm6, %v1088_v52, %v1152_v29  ;;  %v8261_v29 = vld [vmem:[%s11071_s7 + $0x48] sm:$0xff]  }
 0x187   : > { %v1206_v1 = vadd.f32 %v1205_v59, %v9045_v44 }
 0x189   : > { %v1207_v30 = vadd.f32 %v1206_v1, %v9051_v49 }
 0x18b   : > { %v1208_v3 = vadd.f32 %v1207_v30, %v9057_v38  ;;  %v8245_v30 = vld [vmem:[%s11070_s6 + $0x10] sm:$0xff]  }
 0x18d   : > { %v1209_v8 = vadd.f32 %v1208_v3, %v9063_v55  ;;  %v8249_v3 = vld [vmem:[%s11070_s6 + $0x30] sm:$0xff]  }
 0x18f   : > { %v1210_v27 = vadd.f32 %v1209_v8, %v9067_v25  ;;  %v8253_v8 = vld [vmem:[%s11071_s7 + $0xc8] sm:$0xff]  }
 0x190   : > { %7405 = vmatprep.subr.bf16.mxu0 %v8253_v8  ;;  %v8279_v8 = vld [vmem:[%s11071_s7 + $0x78] sm:$0xff]  }
 0x191   : > { %v1211_v31 = vadd.f32 %v1210_v27, %v9071_v28 }
 0x193   : > { %v1212_v10 = vadd.f32 %v1211_v31, %v9074_v42 }
 0x195   : > { %v1213_v60 = vadd.f32 %v1212_v10, %v9077_v46  ;;  %v8260_v10 = vld [vmem:[%s11071_s7] sm:$0xff]  }
 0x197   : > { %v1214_v23 = vadd.f32 %v1213_v60, %v9080_v11  ;;  %v8262_v60 = vld [vmem:[%s11071_s7 + $0x8] sm:$0xff]  }
 0x199   : > { %v1215_v33 = vadd.f32 %v1214_v23, %v9083_v53  ;;  %v8264_v23 = vld [vmem:[%s11071_s7 + $0x50] sm:$0xff]  }
 0x19b   : > { %v1216_v56 = vrot.slane %v1215_v33, 4 }
 0x19d   : > { %v1217_v12 = vadd.f32 %v1216_v56, %v1215_v33  ;;  %v8266_v33 = vld [vmem:[%s11071_s7 + $0x10] sm:$0xff]   ;;  %v8267_v56 = vld [vmem:[%s11071_s7 + $0x58] sm:$0xff]  }
 0x19f   : > { %v1218_v59 = vrot.slane %v1217_v12, 2 }
 0x1a1   : > { %v1219_v35 = vadd.f32 %v1218_v59, %v1217_v12  ;;  %v8268_v12 = vld [vmem:[%s11071_s7 + $0x18] sm:$0xff]   ;;  %v8270_v59 = vld [vmem:[%s11071_s7 + $0x60] sm:$0xff]  }
 0x1a3   : > { %v1220_v63 = vrot.slane %v1219_v35, 1 }
 0x1a5   : > { %v1221_v13 = vadd.f32 %v1220_v63, %v1219_v35  ;;  %v8255_v35 = vld [vmem:[%s11071_s7 + $0xd0] sm:$0xff]   ;;  %v8272_v63 = vld [vmem:[%s11071_s7 + $0x20] sm:$0xff]  }
 0x1a7   : > { %v1222_v1 = vmul.f32 0.00390625, %v1221_v13  ;;  %v8256_v13 = vld [vmem:[%s11071_s7 + $0x90] sm:$0xff]  }
 0x1a9   : > { %v1223_v22 = vpack.c.bf16 %v1222_v1, %v1222_v1  ;;  %v8273_v1 = vld [vmem:[%s11071_s7 + $0x68] sm:$0xff]  }
 0x1ab   : > { %8038 = vmatmul.mubr.bf16.vlgmr.msra.gmra.mrb[0].mxu1 %v1223_v22  ;;  %v8274_v22 = vld [vmem:[%s11071_s7 + $0x28] sm:$0xff]  }
 0x1ac   : > { %8042 = vmatpush3.bf16.msra.mxu1 %v8243_v36  ;;  %8057 = vmatprep.mubr.msk.bf16.mxu1 %vm8448_vm2, %v8447_v45  ;;  %v8257_v36 = vld [vmem:[%s11071_s7 + $0xd8] sm:$0xff]   ;;  %vm1536_vm2 = vsmask.f32 256 }
 0x1ad   : > { %8043 = vmatprep.subr.bf16.mxu1 %v8447_v45  ;;  %vm9209_vm11 = vmand %vm1535_vm10, %vm1536_vm2 }
 0x1b0   : > { %8044 = vmatpush3.bf16.msra.mxu1 %v8244_v14  ;;  %v8449_v14 = vmov 0  }
 0x1b1   : > { %8045 = vmatprep.subr.bf16.mxu1 %v8447_v45  ;;  %1477 = vst [vmem:[#allocation2 + $0x8] sm:$0xff] %v8449_v14  ;;  %1476 = vst [vmem:[#allocation2] sm:$0xff] %v8449_v14 }
 0x1b2   : > { %1478 = vst [vmem:[#allocation2 + $0x10] sm:$0xff] %v8449_v14  ;;  %1480 = vst [vmem:[#allocation2 + $0x198] sm:$0xff] %v8449_v14 }
 0x1b3   : > { %1482 = vst [vmem:[#allocation2 + $0x1a8] sm:$0xff] %v8449_v14 }
 0x1b4   : > { %8046 = vmatpush3.bf16.msra.mxu1 %v8245_v30  ;;  %v8259_v30 = vld [vmem:[%s11071_s7 + $0x98] sm:$0xff]  }
 0x1b5   : > { %8047 = vmatprep.subr.bf16.mxu1 %v8447_v45 }
 0x1b8   : > { %8048 = vmatpush3.bf16.msra.mxu1 %v8246_v37  ;;  %v8276_v37 = vld [vmem:[%s11071_s7 + $0x70] sm:$0xff]  }
 0x1b9   : > { %8049 = vmatprep.subr.bf16.mxu1 %v8447_v45 }
 0x1bc   : > { %8050 = vmatpush3.bf16.msra.mxu1 %v8247_v39  ;;  %v8263_v39 = vld [vmem:[%s11071_s7 + $0xe0] sm:$0xff]  }
 0x1bd   : > { %8051 = vmatprep.subr.bf16.mxu1 %v8447_v45 }
 0x1c0   : > { %8052 = vmatpush3.bf16.msra.mxu1 %v8248_v15  ;;  %v8278_v15 = vld [vmem:[%s11071_s7 + $0x30] sm:$0xff]  }
 0x1c1   : > { %8053 = vmatprep.subr.bf16.mxu1 %v8447_v45 }
 0x1c4   : > { %8054 = vmatpush3.bf16.msra.mxu1 %v8249_v3  ;;  %v8265_v3 = vld [vmem:[%s11071_s7 + $0xa0] sm:$0xff]  }
 0x1c5   : > { %8055 = vmatprep.subr.bf16.mxu1 %v8447_v45  ;;  %v8254_v45 = vld [vmem:[%s11071_s7 + $0x88] sm:$0xff]  }
 0x1c6   : > { %7406 = vmatpush3.bf16.msra.mxu0 %v8254_v45  ;;  %v1618_v45 = vld [vmem:[#allocation2] sm:$0x80] }
 0x1c7   : > { %7407 = vmatprep.subr.bf16.mxu0 %v8255_v35  ;;  %v1496_v35 = vld [vmem:[#allocation2 + $0x60] sm:$0x80] }
 0x1c8   : > { %8056 = vmatpush3.bf16.msra.mxu1 %v8250_v4 }
 0x1c9   : > { %7467 = vmatprep.subr.bf16.mxu1 %v8258_v21  ;;  %v1635_v21 = vshrl.u32 %v1618_v45, 16  ;;  %v8283_v45 = vld [vmem:[%s11071_s7 + $0x140] sm:$0xff]  }
 0x1ca   : > { %7408 = vmatpush3.bf16.msra.mxu0 %v8256_v13  ;;  %v8275_v13 = vld [vmem:[%s11071_s7 + $0xf0] sm:$0xff]  }
 0x1cb   : > { %7409 = vmatprep.subr.bf16.mxu0 %v8257_v36  ;;  %v1497_v36 = vsel %vm9197_vm9, 0, %v1496_v35  ;;  %v8294_v35 = vld [vmem:[%s11071_s7 + $0x188] sm:$0xff]  }
 0x1cc   : > { %1498 = vst [vmem:[#allocation2 + $0x60] sm:$0x80] %v1497_v36 }
 0x1ce   : > { %7410 = vmatpush3.bf16.msra.mxu0 %v8259_v30  ;;  %v8277_v30 = vld [vmem:[%s11071_s7 + $0xb0] sm:$0xff]  }
 0x1cf   : > { %7411 = vmatprep.subr.bf16.mxu0 %v8263_v39  ;;  %v1547_v39 = vld [vmem:[#allocation2 + $0x70] sm:$0x1] }
 0x1d2   : > { %7412 = vmatpush3.bf16.msra.mxu0 %v8265_v3  ;;  %v8281_v3 = vld [vmem:[%s11071_s7 + $0xf8] sm:$0xff]  }
 0x27e   : > { %v1322_v41 = vpop.f32.mrb[0].mxu1 }
 0x27f   : > { %v1328_v6 = vmax.f32 %v1322_v41, 0.0  ;;  %v8039_v27 = vpop.f32.mrb[1].mxu1  ;;  %v1488_v41 = vsel %vm9197_vm9, 0, %v1487_v48 }
 0x280   : > { %v1325_v9 = vpop.f32.mrb[2].mxu1  ;;  %1489 = vst [vmem:[#allocation2 + $0x18] sm:$0x80] %v1488_v41  ;;  %v9355_v27 = vld [vmem:[%s11075_s11] sm:$0x3] }
 0x281   : > { %v1329_v52 = vpack.c.bf16 %v1328_v6, %v1328_v6  ;;  %v8040_v31 = vpop.f32.mrb[3].mxu1  ;;  %v1491_v6 = vsel %vm9197_vm9, 0, %v1490_v19  ;;  %v8269_v9 = vld [vmem:[%s11071_s7 + $0xe8] sm:$0xff]   ;;  %v1548_v19 = vsel %vm9209_vm11, 0, %v1547_v39  ;;  %v8300_v39 = vld [vmem:[%s11071_s7 + $0x198] sm:$0xff]  }
 0x282   : > { %v1641_v31 = vrot.slane %v8449_v14, 7  ;;  %1492 = vst [vmem:[#allocation2 + $0x30] sm:$0x80] %v1491_v6  ;;  %7413 = vmatprep.subr.bf16.mxu0 %v8269_v9  ;;  %1549 = vst [vmem:[#allocation2 + $0x70] sm:$0x1] %v1548_v19 }
 0x283   : > { %8058 = vmatmul.mubr.bf16.vlgmr.msra.gmra.mrb[4].mxu1 %v1329_v52  ;;  %v8280_v52 = vld [vmem:[%s11071_s7 + $0x38] sm:$0xff]   ;;  %v1550_v6 = vld [vmem:[#allocation2 + $0x88] sm:$0x1]  ;;  %v1505_v9 = vld [vmem:[#allocation2 + $0xa8] sm:$0x80] }
 0x284   : > { %7468 = vmatpush3.bf16.msra.mxu1 %v8260_v10  ;;  %2317 = vmatprep.mubr.bf16.mxu1 %v8449_v14  ;;  %v8271_v10 = vld [vmem:[%s11071_s7 + $0xa8] sm:$0xff]  }
 0x285   : > { %7469 = vmatprep.subr.bf16.mxu1 %v8261_v29  ;;  %v1538_v29 = vld [vmem:[#allocation2 + $0x28] sm:$0x1]  ;;  %7414 = vmatpush3.bf16.msra.mxu0 %v8271_v10 }
 0x286   : > { %7415 = vmatprep.subr.bf16.mxu0 %v8275_v13 }
 0x288   : > { %7470 = vmatpush3.bf16.msra.mxu1 %v8262_v60  ;;  %v1493_v60 = vld [vmem:[#allocation2 + $0x48] sm:$0x80] }
 0x289   : > { %7471 = vmatprep.subr.bf16.mxu1 %v8264_v23  ;;  %v1637_v23 = vrot.slane %v1635_v21, 7  ;;  %7416 = vmatpush3.bf16.msra.mxu0 %v8277_v30  ;;  %v1553_v21 = vld [vmem:[#allocation2 + $0xa0] sm:$0x1]  ;;  %v8298_v30 = vld [vmem:[%s11071_s7 + $0x190] sm:$0xff]  }
 0x28a   : > { %7417 = vmatprep.subr.bf16.mxu0 %v8281_v3  ;;  %v1554_v10 = vsel %vm9209_vm11, 0, %v1553_v21  ;;  %v1562_v3 = vld [vmem:[#allocation2 + $0xe8] sm:$0x1]  ;;  %v1520_v21 = vld [vmem:[#allocation2 + $0x120] sm:$0x80] }
 0x28b   : > { %1555 = vst [vmem:[#allocation2 + $0xa0] sm:$0x1] %v1554_v10  ;;  %v1563_v19 = vsel %vm9209_vm11, 0, %v1562_v3  ;;  %v8306_v10 = vld [vmem:[%s11071_s7 + $0x1a8] sm:$0xff]  }
 0x28c   : > { %7472 = vmatpush3.bf16.msra.mxu1 %v8266_v33  ;;  %v1539_v33 = vsel %vm9209_vm11, 0, %v1538_v29  ;;  %v1508_v29 = vld [vmem:[#allocation2 + $0xc0] sm:$0x80]  ;;  %1564 = vst [vmem:[#allocation2 + $0xe8] sm:$0x1] %v1563_v19 }
 0x28d   : > { %7473 = vmatprep.subr.bf16.mxu1 %v8267_v56  ;;  %v1494_v56 = vsel %vm9197_vm9, 0, %v1493_v60  ;;  %1540 = vst [vmem:[#allocation2 + $0x28] sm:$0x1] %v1539_v33  ;;  %v1509_v60 = vsel %vm9197_vm9, 0, %v1508_v29  ;;  %v1521_v29 = vsel %vm9197_vm9, 0, %v1520_v21 }
 0x28e   : > { %1495 = vst [vmem:[#allocation2 + $0x48] sm:$0x80] %v1494_v56  ;;  %1510 = vst [vmem:[#allocation2 + $0xc0] sm:$0x80] %v1509_v60  ;;  %v8290_v56 = vld [vmem:[%s11071_s7 + $0x1c0] sm:$0xff]  }
 0x28f   : > { %v1568_v60 = vld [vmem:[#allocation2 + $0x118] sm:$0x1]  ;;  %1522 = vst [vmem:[#allocation2 + $0x120] sm:$0x80] %v1521_v29  ;;  %v1532_v19 = vld [vmem:[#allocation2 + $0x180] sm:$0x80] }
 0x290   : > { %7474 = vmatpush3.bf16.msra.mxu1 %v8268_v12  ;;  %v1541_v12 = vld [vmem:[#allocation2 + $0x40] sm:$0x1] }
 0x291   : > { %7475 = vmatprep.subr.bf16.mxu1 %v8270_v59  ;;  %v1542_v59 = vsel %vm9209_vm11, 0, %v1541_v12  ;;  %v8292_v12 = vld [vmem:[%s11071_s7 + $0x180] sm:$0xff]  }
 0x292   : > { %1543 = vst [vmem:[#allocation2 + $0x40] sm:$0x1] %v1542_v59  ;;  %v8293_v59 = vld [vmem:[%s11071_s7 + $0x1c8] sm:$0xff]  }
 0x294   : > { %7476 = vmatpush3.bf16.msra.mxu1 %v8272_v63  ;;  %v1544_v63 = vld [vmem:[#allocation2 + $0x58] sm:$0x1] }
 0x295   : > { %7477 = vmatprep.subr.bf16.mxu1 %v8273_v1  ;;  %v1645_v1 = vsel %vm1536_vm2, %v1637_v23, %v1641_v31  ;;  %v1506_v31 = vsel %vm9197_vm9, 0, %v1505_v9  ;;  %v1556_v23 = vld [vmem:[#allocation2 + $0xb8] sm:$0x1]  ;;  %v1565_v9 = vld [vmem:[#allocation2 + $0x100] sm:$0x1] }
 0x296   : > { %1507 = vst [vmem:[#allocation2 + $0xa8] sm:$0x80] %v1506_v31  ;;  %v1557_v33 = vsel %vm9209_vm11, 0, %v1556_v23  ;;  %v1566_v31 = vsel %vm9209_vm11, 0, %v1565_v9  ;;  %v1523_v23 = vld [vmem:[#allocation2 + $0x138] sm:$0x80] }
 0x297   : > { %1558 = vst [vmem:[#allocation2 + $0xb8] sm:$0x1] %v1557_v33  ;;  %1567 = vst [vmem:[#allocation2 + $0x100] sm:$0x1] %v1566_v31  ;;  %v1569_v33 = vsel %vm9209_vm11, 0, %v1568_v60 }
 0x298   : > { %7478 = vmatpush3.bf16.msra.mxu1 %v8274_v22  ;;  %v1545_v22 = vsel %vm9209_vm11, 0, %v1544_v63  ;;  %v1511_v63 = vld [vmem:[#allocation2 + $0xd8] sm:$0x80]  ;;  %1570 = vst [vmem:[#allocation2 + $0x118] sm:$0x1] %v1569_v33  ;;  %v1440_v33 = vlaneseq }
 0x299   : > { %7479 = vmatprep.subr.bf16.mxu1 %v8276_v37  ;;  %1546 = vst [vmem:[#allocation2 + $0x58] sm:$0x1] %v1545_v22  ;;  %v1499_v37 = vld [vmem:[#allocation2 + $0x78] sm:$0x80]  ;;  %v1512_v13 = vsel %vm9197_vm9, 0, %v1511_v63  ;;  %v8296_v22 = vld [vmem:[%s11071_s7 + $0x1d0] sm:$0xff]  }
 0x29a   : > { %v1500_v48 = vsel %vm9197_vm9, 0, %v1499_v37  ;;  %1513 = vst [vmem:[#allocation2 + $0xd8] sm:$0x80] %v1512_v13  ;;  %v8299_v37 = vld [vmem:[%s11071_s7 + $0x1d8] sm:$0xff]   ;;  %v1574_v63 = vld [vmem:[#allocation2 + $0x148] sm:$0x1] }
 0x29b   : > { %1501 = vst [vmem:[#allocation2 + $0x78] sm:$0x80] %v1500_v48  ;;  %v1514_v48 = vld [vmem:[#allocation2 + $0xf0] sm:$0x80] }
 0x29c   : > { %7480 = vmatpush3.bf16.msra.mxu1 %v8278_v15  ;;  %v9241_v15 = vrot.slane %v8449_v14, 1  ;;  %v1502_v14 = vld [vmem:[#allocation2 + $0x90] sm:$0x80] }
 0x29d   : > { %7481 = vmatprep.subr.bf16.mxu1 %v8279_v8  ;;  %v8282_v8 = vld [vmem:[%s11071_s7 + $0xb8] sm:$0xff]   ;;  %v1503_v41 = vsel %vm9197_vm9, 0, %v1502_v14  ;;  %v1517_v14 = vld [vmem:[#allocation2 + $0x108] sm:$0x80]  ;;  %v8308_v13 = vld [vmem:[%s11071_s7 + $0x1f0] sm:$0xff]  }
 0x29e   : > { %7418 = vmatpush3.bf16.msra.mxu0 %v8282_v8  ;;  %1504 = vst [vmem:[#allocation2 + $0x90] sm:$0x80] %v1503_v41  ;;  %v1515_v8 = vsel %vm9197_vm9, 0, %v1514_v48  ;;  %v8304_v41 = vld [vmem:[%s11071_s7 + $0x1a0] sm:$0xff]  }
 0x29f   : > { %7531 = vmatprep.subr.bf16.mxu0 %v8283_v45  ;;  %1516 = vst [vmem:[#allocation2 + $0xf0] sm:$0x80] %v1515_v8  ;;  %v8302_v45 = vld [vmem:[%s11071_s7 + $0x1e0] sm:$0xff]  }
 0x2a0   : > { %7482 = vmatpush3.bf16.msra.mxu1 %v8280_v52  ;;  %v1551_v52 = vsel %vm9209_vm11, 0, %v1550_v6  ;;  %v1518_v6 = vsel %vm9197_vm9, 0, %v1517_v14  ;;  %v1577_v48 = vld [vmem:[#allocation2 + $0x160] sm:$0x1]  ;;  %v1533_v14 = vsel %vm9197_vm9, 0, %v1532_v19 }
 0x2a1   : > { %1552 = vst [vmem:[#allocation2 + $0x88] sm:$0x1] %v1551_v52  ;;  %7595 = vmatprep.subr.bf16.mxu1 %v8290_v56  ;;  %v8305_v52 = vld [vmem:[%s11071_s7 + $0x1e8] sm:$0xff]   ;;  %1519 = vst [vmem:[#allocation2 + $0x108] sm:$0x80] %v1518_v6  ;;  %v1524_v56 = vsel %vm9197_vm9, 0, %v1523_v23 }
 0x2a2   : > { %1525 = vst [vmem:[#allocation2 + $0x138] sm:$0x80] %v1524_v56  ;;  %v1578_v8 = vsel %vm9209_vm11, 0, %v1577_v48  ;;  %1534 = vst [vmem:[#allocation2 + $0x180] sm:$0x80] %v1533_v14  ;;  %v1441_v56 = vshrl.u32 %v1440_v33, 7 }
 0x2a3   : > { %2318 = vmatmul.mubr.bf16.vlgmr.msra.gmra.mrb[8].mxu1 %v1645_v1  ;;  %v1559_v1 = vld [vmem:[#allocation2 + $0xd0] sm:$0x1]  ;;  %1579 = vst [vmem:[#allocation2 + $0x160] sm:$0x1] %v1578_v8 }
 0x2a4   : > { %7596 = vmatpush3.bf16.msra.mxu1 %v8292_v12  ;;  %v1560_v36 = vsel %vm9209_vm11, 0, %v1559_v1  ;;  %v1571_v12 = vld [vmem:[#allocation2 + $0x130] sm:$0x1] }
 0x2a5   : > { %7597 = vmatprep.subr.bf16.mxu1 %v8293_v59  ;;  %1561 = vst [vmem:[#allocation2 + $0xd0] sm:$0x1] %v1560_v36  ;;  %v1526_v59 = vld [vmem:[#allocation2 + $0x150] sm:$0x80]  ;;  %v1575_v36 = vsel %vm9209_vm11, 0, %v1574_v63 }
 0x2a6   : > { %v1527_v1 = vsel %vm9197_vm9, 0, %v1526_v59  ;;  %1576 = vst [vmem:[#allocation2 + $0x148] sm:$0x1] %v1575_v36  ;;  %v1583_v6 = vld [vmem:[#allocation2 + $0x190] sm:$0x1] }
 0x2a7   : > { %1528 = vst [vmem:[#allocation2 + $0x150] sm:$0x80] %v1527_v1  ;;  %v1584_v9 = vsel %vm9209_vm11, 0, %v1583_v6  ;;  %v9357_v59 = vld [vmem:[#allocation2 + $0x18] sm:$0x80] }
 0x2a8   : > { %7598 = vmatpush3.bf16.msra.mxu1 %v8294_v35  ;;  %v1572_v35 = vsel %vm9209_vm11, 0, %v1571_v12  ;;  %1585 = vst [vmem:[#allocation2 + $0x190] sm:$0x1] %v1584_v9  ;;  %v9350_v12 = vsub.s32 0, %v1441_v56  ;;  %v9361_v63 = vld [vmem:[#allocation2 + $0x10] sm:$0x1] }
 0x2a9   : > { %7599 = vmatprep.subr.bf16.mxu1 %v8296_v22  ;;  %1573 = vst [vmem:[#allocation2 + $0x130] sm:$0x1] %v1572_v35  ;;  %v8310_v22 = vld [vmem:[%s11071_s7 + $0x1b0] sm:$0xff]   ;;  %v9359_v35 = vld [vmem:[#allocation2 + $0x18] sm:$0x80]  ;;  %v1860_v36 = vshrl.u32 %v9357_v59, 16 }
 0x2ab   : > { %v1862_v56 = vrot.slane %v1860_v36, 7  ;;  %v1771_v36 = vld [vmem:[#allocation2 + $0x28] sm:$0x1] }
 0x2ac   : > { %7600 = vmatpush3.bf16.msra.mxu1 %v8298_v30  ;;  %v8311_v30 = vld [vmem:[%s11071_s7 + $0x1f8] sm:$0xff]  }
 0x2ad   : > { %7601 = vmatprep.subr.bf16.mxu1 %v8299_v37  ;;  %v8312_v37 = vld [vmem:[%s11071_s7 + $0x1b8] sm:$0xff]  }
 0x2b0   : > { %7602 = vmatpush3.bf16.msra.mxu1 %v8300_v39  ;;  %v1529_v39 = vld [vmem:[#allocation2 + $0x168] sm:$0x80] }
 0x2b1   : > { %7603 = vmatprep.subr.bf16.mxu1 %v8302_v45  ;;  %v1530_v3 = vsel %vm9197_vm9, 0, %v1529_v39  ;;  %v1580_v45 = vld [vmem:[#allocation2 + $0x178] sm:$0x1] }
 0x2b2   : > { %1531 = vst [vmem:[#allocation2 + $0x168] sm:$0x80] %v1530_v3 }
 0x2b4   : > { %7604 = vmatpush3.bf16.msra.mxu1 %v8304_v41  ;;  %v1581_v41 = vsel %vm9209_vm11, 0, %v1580_v45 }
 0x2b5   : > { %7605 = vmatprep.subr.bf16.mxu1 %v8305_v52  ;;  %1582 = vst [vmem:[#allocation2 + $0x178] sm:$0x1] %v1581_v41 }
 0x2b8   : > { %7606 = vmatpush3.bf16.msra.mxu1 %v8306_v10 }
 0x2b9   : > { %7607 = vmatprep.subr.bf16.mxu1 %v8308_v13 }
 0x2bc   : > { %7608 = vmatpush3.bf16.msra.mxu1 %v8310_v22  ;;  %v1647_v22 = vshrl.u32 %v9359_v35, 16 }
 0x2bd   : > { %7609 = vmatprep.subr.bf16.mxu1 %v8311_v30  ;;  %v1782_v30 = vshll.u32 %v9361_v63, 16 }
 0x2c0   : > { %7610 = vmatpush3.bf16.msra.mxu1 %v8312_v37 }
 0x2c1   : > { %8200 = vmatprep.subr.msk.bf16.mxu1 %vm670_vm0, %v9355_v27 }
 0x356   : > { %v1428_v52 = vpop.f32.mrb[4].mxu1 }
 0x357   : > { %v1434_v31 = vsub.f32 0.0, %v1428_v52  ;;  %v8059_v21 = vpop.f32.mrb[5].mxu1 }
 0x358   : > { %v1431_v10 = vpop.f32.mrb[6].mxu1 }
 0x359   : > { %v1435_v29 = vmul.f32 1.442695, %v1434_v31  ;;  %v8060_v60 = vpop.f32.mrb[7].mxu1 }
 0x35b   : > { %8429 = vpow2.f32 %v1435_v29 }
 0x365   : > { %v8430_v4 = vpop.eup %8429 }
 0x366   : > { %v1437_v23 = vadd.f32 1.0, %v8430_v4 }
 0x368   : > { %8431 = vrcp.f32 %v1437_v23 }
 0x372   : > { %v8432_v13 = vpop.eup %8431 }
 0x373   : > { %v1443_v1 = vrot.slane %v8432_v13, %v9350_v12  ;;  %v1649_v13 = vrot.slane %v1647_v22, 7  ;;  %v8284_v22 = vld [vmem:[%s11071_s7 + $0x100] sm:$0xff]  }
 0x375   : > { %v1444_v37 = vmul.f32 %v1443_v1, %v8917_v0  ;;  %v1445_v39 = vmul.f32 %v1443_v1, %v8919_v7  ;;  %v1446_v3 = vmul.f32 %v1443_v1, %v8927_v47  ;;  %v1447_v48 = vmul.f32 %v1443_v1, %v8932_v5 }
 0x376   : > { %v1448_v19 = vmul.f32 %v1443_v1, %v8937_v57  ;;  %v1449_v8 = vmul.f32 %v1443_v1, %v8943_v43  ;;  %v1450_v14 = vmul.f32 %v1443_v1, %v8949_v34  ;;  %v1451_v45 = vmul.f32 %v1443_v1, %v8955_v32 }
 0x377   : > { %v1452_v41 = vmul.f32 %v1443_v1, %v8961_v54  ;;  %v1453_v6 = vmul.f32 %v1443_v1, %v8967_v18  ;;  %v1454_v0 = vmul.f32 %v1443_v1, %v8973_v26  ;;  %v1455_v7 = vmul.f32 %v1443_v1, %v8979_v62 }
 0x378   : > { %v1456_v47 = vmul.f32 %v1443_v1, %v8985_v17  ;;  %v1457_v5 = vmul.f32 %v1443_v1, %v8991_v61  ;;  %v1458_v57 = vmul.f32 %v1443_v1, %v8997_v20  ;;  %v1459_v43 = vmul.f32 %v1443_v1, %v9003_v51 }
 0x379   : > { %v1460_v34 = vmul.f32 %v1443_v1, %v9009_v50  ;;  %v1461_v32 = vmul.f32 %v1443_v1, %v9015_v2  ;;  %v1462_v54 = vmul.f32 %v1443_v1, %v9021_v16  ;;  %v1463_v18 = vmul.f32 %v1443_v1, %v9027_v40 }
 0x37a   : > { %v1464_v26 = vmul.f32 %v1443_v1, %v9033_v24  ;;  %v1465_v62 = vmul.f32 %v1443_v1, %v9039_v58  ;;  %v1466_v17 = vmul.f32 %v1443_v1, %v9045_v44  ;;  %v1467_v61 = vmul.f32 %v1443_v1, %v9051_v49 }
 0x37b   : > { %v1468_v20 = vmul.f32 %v1443_v1, %v9057_v38  ;;  %v1469_v51 = vmul.f32 %v1443_v1, %v9063_v55  ;;  %v1470_v50 = vmul.f32 %v1443_v1, %v9067_v25  ;;  %v1471_v2 = vmul.f32 %v1443_v1, %v9071_v28 }
 0x37c   : > { %v1472_v16 = vmul.f32 %v1443_v1, %v9074_v42  ;;  %v1473_v40 = vmul.f32 %v1443_v1, %v9077_v46  ;;  %v1474_v24 = vmul.f32 %v1443_v1, %v9080_v11  ;;  %v1475_v58 = vmul.f32 %v1443_v1, %v9083_v53  ;;  %v1845_v46 = vld [vmem:[#allocation2 + $0x30] sm:$0x80] }
 0x37d   : > { %v9401_v9 = vpack.c.bf16 %v1445_v39, %v1444_v37  ;;  %v9403_v44 = vpack.c.bf16 %v1447_v48, %v1446_v3  ;;  %v9405_v49 = vpack.c.bf16 %v1449_v8, %v1448_v19  ;;  %v9407_v38 = vpack.c.bf16 %v1451_v45, %v1450_v14  ;;  %v1622_v19 = vld [vmem:[#allocation2 + $0x30] sm:$0x80] }
 0x37e   : > { %v9409_v55 = vpack.c.bf16 %v1453_v6, %v1452_v41  ;;  %v9411_v25 = vpack.c.bf16 %v1455_v7, %v1454_v0  ;;  %v9413_v28 = vpack.c.bf16 %v1457_v5, %v1456_v47  ;;  %v9415_v42 = vpack.c.bf16 %v1459_v43, %v1458_v57  ;;  %v8285_v0 = vld [vmem:[%s11071_s7 + $0x148] sm:$0xff]  }
 0x37f   : > { %v1594_v11 = vpack.c.bf16 %v1461_v32, %v1460_v34  ;;  %v1595_v52 = vpack.c.bf16 %v1463_v18, %v1462_v54  ;;  %v1596_v53 = vpack.c.bf16 %v1465_v62, %v1464_v26  ;;  %v1597_v31 = vpack.c.bf16 %v1467_v61, %v1466_v17  ;;  %1602 = vst [vmem:[#allocation2 + $0x20] sm:$0xff] %v9401_v9  ;;  %v8286_v43 = vld [vmem:[%s11071_s7 + $0x108] sm:$0xff]   ;;  %v8287_v54 = vld [vmem:[%s11071_s7 + $0x150] sm:$0xff]  }
 0x380   : > { %1603 = vst [vmem:[#allocation2 + $0x38] sm:$0xff] %v9403_v44  ;;  %1604 = vst [vmem:[#allocation2 + $0x50] sm:$0xff] %v9405_v49  ;;  %2325 = vmatprep.mubr.bf16.mxu1 %v9401_v9  ;;  %v1598_v21 = vpack.c.bf16 %v1469_v51, %v1468_v20  ;;  %v1599_v10 = vpack.c.bf16 %v1471_v2, %v1470_v50  ;;  %v1600_v29 = vpack.c.bf16 %v1473_v40, %v1472_v16  ;;  %v1624_v62 = vld [vmem:[#allocation2 + $0x48] sm:$0x80]  ;;  %v1772_v20 = vld [vmem:[#allocation2 + $0x40] sm:$0x1] }
 0x381   : > { %1605 = vst [vmem:[#allocation2 + $0x68] sm:$0xff] %v9407_v38  ;;  %v1601_v60 = vpack.c.bf16 %v1475_v58, %v1474_v24  ;;  %1606 = vst [vmem:[#allocation2 + $0x80] sm:$0xff] %v9409_v55  ;;  %v1651_v4 = vshrl.u32 %v9401_v9, 16  ;;  %v1663_v23 = vshrl.u32 %v9403_v44, 16  ;;  %v1872_v33 = vshrl.u32 %v1845_v46, 16  ;;  %v8288_v50 = vld [vmem:[%s11071_s7 + $0x110] sm:$0xff]  }
 0x382   : > { %1607 = vst [vmem:[#allocation2 + $0x98] sm:$0xff] %v9411_v25  ;;  %1608 = vst [vmem:[#allocation2 + $0xb0] sm:$0xff] %v9413_v28  ;;  %v1784_v1 = vrot.slane %v1782_v30, 1  ;;  %v1654_v39 = vshll.u32 %v9401_v9, 16  ;;  %v1666_v48 = vshll.u32 %v9403_v44, 16  ;;  %v1675_v35 = vshrl.u32 %v9405_v49, 16 }
 0x383   : > { %1609 = vst [vmem:[#allocation2 + $0xc8] sm:$0xff] %v9415_v42  ;;  %1610 = vst [vmem:[#allocation2 + $0xe0] sm:$0xff] %v1594_v11  ;;  %v1653_v37 = vrot.slane %v1651_v4, 7  ;;  %v1665_v3 = vrot.slane %v1663_v23, 7  ;;  %v1874_v59 = vrot.slane %v1872_v33, 7  ;;  %v1659_v6 = vshrl.u32 %v1622_v19, 16 }
 0x384   : > { %1611 = vst [vmem:[#allocation2 + $0xf8] sm:$0xff] %v1595_v52  ;;  %1612 = vst [vmem:[#allocation2 + $0x110] sm:$0xff] %v1596_v53  ;;  %v1785_v63 = vsel %vm1778_vm12, %v9241_v15, %v1784_v1  ;;  %v1847_v30 = vld [vmem:[#allocation2 + $0x48] sm:$0x80]  ;;  %v1786_v7 = vrot.slane %v1654_v39, 1  ;;  %v1789_v47 = vshll.u32 %v1771_v36, 16 }
 0x385   : > { %1613 = vst [vmem:[#allocation2 + $0x128] sm:$0xff] %v1597_v31  ;;  %1614 = vst [vmem:[#allocation2 + $0x140] sm:$0xff] %v1598_v21  ;;  %v1656_v8 = vor.u32 %v1654_v39, %v1653_v37  ;;  %v9438_v14 = vor.u32 %v1666_v48, %v1665_v3  ;;  %v1677_v5 = vrot.slane %v1675_v35, 7  ;;  %v1884_v57 = vshrl.u32 %v1847_v30, 16  ;;  %v1849_v2 = vld [vmem:[#allocation2 + $0x60] sm:$0x80] }
 0x386   : > { %1615 = vst [vmem:[#allocation2 + $0x158] sm:$0xff] %v1599_v10  ;;  %1616 = vst [vmem:[#allocation2 + $0x170] sm:$0xff] %v1600_v29  ;;  %v1661_v34 = vrot.slane %v1659_v6, 7  ;;  %v1678_v32 = vshll.u32 %v9405_v49, 16  ;;  %v1787_v18 = vor.u32 %v1786_v7, %v1651_v4  ;;  %v1791_v26 = vrot.slane %v1789_v47, 1  ;;  %v8289_v24 = vld [vmem:[%s11071_s7 + $0x158] sm:$0xff]  }
 0x387   : > { %1617 = vst [vmem:[#allocation2 + $0x188] sm:$0xff] %v1601_v60  ;;  %v1870_v45 = vsel %vm1536_vm2, %v1862_v56, %v1656_v8  ;;  %v1657_v41 = vsel %vm1536_vm2, %v1649_v13, %v1656_v8  ;;  %v1882_v15 = vsel %vm1536_vm2, %v1874_v59, %v9438_v14  ;;  %v1886_v61 = vrot.slane %v1884_v57, 7  ;;  %v8291_v21 = vld [vmem:[%s11071_s7 + $0x118] sm:$0xff]   ;;  %v8295_v60 = vld [vmem:[%s11071_s7 + $0x160] sm:$0xff]   ;;  %v9502_v6 = vld [vmem:[#allocation2 + $0x50] sm:$0xff] }
 0x388   : > { %2124 = vmatprep.mubr.bf16.mxu0 %v1870_v45  ;;  %2326 = vmatmul.mubr.bf16.gmra.mrb[12].mxu1 %v1657_v41  ;;  %v1680_v17 = vor.u32 %v1678_v32, %v1677_v5  ;;  %v1687_v51 = vshrl.u32 %v9407_v38, 16  ;;  %v1669_v16 = vsel %vm1536_vm2, %v1661_v34, %v9438_v14  ;;  %v1671_v40 = vshrl.u32 %v1624_v62, 16  ;;  %v1626_v56 = vld [vmem:[#allocation2 + $0x60] sm:$0x80]  ;;  %v1773_v37 = vld [vmem:[#allocation2 + $0x58] sm:$0x1] }
 0x389   : > { %2125 = vmatmul.mubr.bf16.vlgmr.msra.gmra.mrb[32].mxu0 %v1785_v63  ;;  %2333 = vmatprep.mubr.bf16.mxu1 %v9403_v44  ;;  %v1793_v58 = vrot.slane %v1666_v48, 1  ;;  %v1792_v46 = vsel %vm1778_vm12, %v1787_v18, %v1791_v26  ;;  %v1796_v11 = vshll.u32 %v1772_v20, 16  ;;  %v1896_v31 = vshrl.u32 %v1849_v2, 16  ;;  %v1851_v3 = vld [vmem:[#allocation2 + $0x78] sm:$0x80]  ;;  %v8297_v48 = vld [vmem:[%s11071_s7 + $0x120] sm:$0xff]  }
 0x38a   : > { %7532 = vmatpush3.bf16.msra.mxu0 %v8284_v22  ;;  %2132 = vmatprep.mubr.bf16.mxu0 %v1882_v15  ;;  %v1894_v52 = vsel %vm1536_vm2, %v1886_v61, %v1680_v17  ;;  %v1689_v53 = vrot.slane %v1687_v51, 7  ;;  %v1673_v10 = vrot.slane %v1671_v40, 7  ;;  %v1690_v29 = vshll.u32 %v9407_v38, 16  ;;  %v8303_v41 = vld [vmem:[%s11071_s7 + $0x128] sm:$0xff]   ;;  %v8307_v47 = vld [vmem:[%s11071_s7 + $0x170] sm:$0xff]  }
 0x38b   : > { %7533 = vmatprep.subr.bf16.mxu0 %v8285_v0  ;;  %v1794_v4 = vor.u32 %v1793_v58, %v1663_v23  ;;  %v1798_v33 = vrot.slane %v1796_v11, 1  ;;  %v1898_v1 = vrot.slane %v1896_v31, 7  ;;  %v1699_v39 = vshrl.u32 %v9409_v55, 16  ;;  %v8301_v23 = vld [vmem:[%s11071_s7 + $0x168] sm:$0xff]   ;;  %v1628_v57 = vld [vmem:[#allocation2 + $0x78] sm:$0x80] }
 0x38c   : > { %v1692_v13 = vor.u32 %v1690_v29, %v1689_v53  ;;  %v1681_v19 = vsel %vm1536_vm2, %v1673_v10, %v1680_v17  ;;  %v1683_v8 = vshrl.u32 %v1626_v56, 16  ;;  %v1800_v59 = vrot.slane %v1678_v32, 1  ;;  %v1853_v18 = vld [vmem:[#allocation2 + $0x90] sm:$0x80]  ;;  %v8314_v11 = vld [vmem:[%s11071_s7 + $0x138] sm:$0xff]   ;;  %v9534_v31 = vld [vmem:[%s11072_s8] sm:$0xff]  }
 0x38d   : > { %v1799_v36 = vsel %vm1778_vm12, %v1794_v4, %v1798_v33  ;;  %v1803_v63 = vshll.u32 %v1773_v37, 16  ;;  %v1701_v30 = vrot.slane %v1699_v39, 7  ;;  %v1908_v45 = vshrl.u32 %v1851_v3, 16  ;;  %v8309_v62 = vld [vmem:[%s11071_s7 + $0x130] sm:$0xff]   ;;  %v1775_v56 = vld [vmem:[#allocation2 + $0x88] sm:$0x1] }
 0x38e   : > { %7534 = vmatpush3.bf16.msra.mxu0 %v8286_v43  ;;  %v1906_v22 = vsel %vm1536_vm2, %v1898_v1, %v1692_v13  ;;  %v1685_v0 = vrot.slane %v1683_v8, 7  ;;  %v1702_v7 = vshll.u32 %v9409_v55, 16  ;;  %v1801_v15 = vor.u32 %v1800_v59, %v1675_v35  ;;  %v1774_v43 = vld [vmem:[#allocation2 + $0x70] sm:$0x1]  ;;  %v8313_v35 = vld [vmem:[%s11071_s7 + $0x178] sm:$0xff]  }
 0x38f   : > { %7535 = vmatprep.subr.bf16.mxu0 %v8287_v54  ;;  %v1805_v5 = vrot.slane %v1803_v63, 1  ;;  %v1910_v32 = vrot.slane %v1908_v45, 7  ;;  %v1711_v54 = vshrl.u32 %v9411_v25, 16  ;;  %v2781_v26 = vshll.u32 %v9502_v6, 16  ;;  %v1855_v1 = vld [vmem:[#allocation2 + $0xa8] sm:$0x80] }
 0x390   : > { %2334 = vmatmul.mubr.bf16.gmra.mrb[16].mxu1 %v1669_v16  ;;  %v1704_v34 = vor.u32 %v1702_v7, %v1701_v30  ;;  %v1693_v17 = vsel %vm1536_vm2, %v1685_v0, %v1692_v13  ;;  %v1695_v61 = vshrl.u32 %v1628_v57, 16  ;;  %v1807_v20 = vrot.slane %v1690_v29, 1  ;;  %v1632_v45 = vld [vmem:[#allocation2 + $0xa8] sm:$0x80] }
 0x391   : > { %2133 = vmatmul.mubr.bf16.gmra.mrb[36].mxu0 %v1792_v46  ;;  %2341 = vmatprep.mubr.bf16.mxu1 %v9405_v49  ;;  %v1810_v2 = vshll.u32 %v1774_v43, 16  ;;  %v1920_v16 = vshrl.u32 %v1853_v18, 16  ;;  %v2778_v58 = vshrl.u32 %v9502_v6, 16  ;;  %v3140_v46 = vrot.slane %v2781_v26, 1 }
 0x392   : > { %2140 = vmatprep.mubr.bf16.mxu0 %v1894_v52  ;;  %7536 = vmatpush3.bf16.msra.mxu0 %v8288_v50  ;;  %v1806_v50 = vsel %vm1778_vm12, %v1801_v15, %v1805_v5  ;;  %v1918_v40 = vsel %vm1536_vm2, %v1910_v32, %v1704_v34  ;;  %v1697_v52 = vrot.slane %v1695_v61, 7  ;;  %v1714_v53 = vshll.u32 %v9411_v25, 16  ;;  %v1857_v15 = vld [vmem:[#allocation2 + $0xc0] sm:$0x80] }
 0x393   : > { %7537 = vmatprep.subr.bf16.mxu0 %v8289_v24  ;;  %v1713_v24 = vrot.slane %v1711_v54, 7  ;;  %v1808_v10 = vor.u32 %v1807_v20, %v1687_v51  ;;  %v1812_v29 = vrot.slane %v1810_v2, 1  ;;  %v1922_v33 = vrot.slane %v1920_v16, 7  ;;  %v2745_v2 = vld [vmem:[#allocation2 + $0x30] sm:$0x80] }
 0x394   : > { %v1723_v13 = vshrl.u32 %v9413_v28, 16  ;;  %v1705_v37 = vsel %vm1536_vm2, %v1697_v52, %v1704_v34  ;;  %v1817_v8 = vshll.u32 %v1775_v56, 16  ;;  %v1932_v59 = vshrl.u32 %v1855_v1, 16  ;;  %v2384_v56 = vld [vmem:[#allocation2 + $0x38] sm:$0xff] }
 0x395   : > { %v1716_v4 = vor.u32 %v1714_v53, %v1713_v24  ;;  %v1726_v63 = vshll.u32 %v9413_v28, 16  ;;  %v1719_v57 = vshrl.u32 %v1632_v45, 16  ;;  %v1821_v43 = vrot.slane %v1714_v53, 1  ;;  %v1777_v24 = vld [vmem:[#allocation2 + $0xb8] sm:$0x1]  ;;  %v9573_v45 = vld [vmem:[#allocation2 + $0x68] sm:$0xff] }
 0x396   : > { %7538 = vmatpush3.bf16.msra.mxu0 %v8291_v21  ;;  %v9538_v21 = vor.u32 %v3140_v46, %v2778_v58  ;;  %v1819_v30 = vrot.slane %v1817_v8, 1  ;;  %v1934_v0 = vrot.slane %v1932_v59, 7  ;;  %v1944_v18 = vshrl.u32 %v1857_v15, 16  ;;  %v9567_v8 = vld [vmem:[#allocation2 + $0x188] sm:$0xff] }
 0x397   : > { %7539 = vmatprep.subr.bf16.mxu0 %v8295_v60  ;;  %v1630_v60 = vld [vmem:[#allocation2 + $0x90] sm:$0x80]  ;;  %v1930_v51 = vsel %vm1536_vm2, %v1922_v33, %v1716_v4  ;;  %v1721_v61 = vrot.slane %v1719_v57, 7  ;;  %v1822_v20 = vor.u32 %v1821_v43, %v1711_v54  ;;  %v2762_v53 = vshrl.u32 %v2745_v2, 16 }
 0x398   : > { %2342 = vmatmul.mubr.bf16.gmra.mrb[20].mxu1 %v1681_v19  ;;  %v1707_v3 = vshrl.u32 %v1630_v60, 16  ;;  %v1813_v19 = vsel %vm1778_vm12, %v1808_v10, %v1812_v29  ;;  %v1946_v16 = vrot.slane %v1944_v18, 7  ;;  %v1828_v10 = vrot.slane %v1726_v63, 1 }
 0x399   : > { %2141 = vmatmul.mubr.bf16.gmra.mrb[40].mxu0 %v1799_v36  ;;  %2349 = vmatprep.mubr.bf16.mxu1 %v9407_v38  ;;  %v1831_v60 = vshll.u32 %v1777_v24, 16  ;;  %v2764_v1 = vrot.slane %v2762_v53, 7  ;;  %v2413_v59 = vshll.u32 %v2384_v56, 16  ;;  %v2411_v57 = vshrl.u32 %v2384_v56, 16  ;;  %v2389_v53 = vld [vmem:[#allocation2 + $0x70] sm:$0x1] }
 0x39a   : > { %2148 = vmatprep.mubr.bf16.mxu0 %v1906_v22  ;;  %7540 = vmatpush3.bf16.msra.mxu0 %v8297_v48  ;;  %v1814_v48 = vrot.slane %v1702_v7, 1  ;;  %v1709_v36 = vrot.slane %v1707_v3, 7  ;;  %v1776_v7 = vld [vmem:[#allocation2 + $0xa0] sm:$0x1]  ;;  %v2747_v3 = vld [vmem:[#allocation2 + $0x48] sm:$0x80] }
 0x39b   : > { %7541 = vmatprep.subr.bf16.mxu0 %v8301_v23  ;;  %v1725_v23 = vrot.slane %v1723_v13, 7  ;;  %v1824_v32 = vshll.u32 %v1776_v7, 16  ;;  %v4053_v43 = vshrl.u32 %v9567_v8, 16 }
 0x39c   : > { %v1815_v22 = vor.u32 %v1814_v48, %v1699_v39  ;;  %v1717_v5 = vsel %vm1536_vm2, %v1709_v36, %v1716_v4  ;;  %v1829_v48 = vor.u32 %v1828_v10, %v1723_v13  ;;  %v2774_v36 = vshrl.u32 %v2747_v3, 16  ;;  %v8325_v13 = vld [vmem:[%s11071_s7 + $0x40] sm:$0xff]  }
 0x39e   : > { %7542 = vmatpush3.bf16.msra.mxu0 %v8303_v41  ;;  %v1728_v41 = vor.u32 %v1726_v63, %v1725_v23  ;;  %v1820_v34 = vsel %vm1778_vm12, %v1815_v22, %v1819_v30  ;;  %v2385_v63 = vld [vmem:[#allocation2 + $0x40] sm:$0x1]  ;;  %v2772_v22 = vsel %vm1536_vm2, %v2764_v1, %v9438_v14  ;;  %v2780_v30 = vrot.slane %v2778_v58, 7 }
 0x39f   : > { %7543 = vmatprep.subr.bf16.mxu0 %v8307_v47  ;;  %v1948_v47 = vshrl.u32 %v9415_v42, 16  ;;  %v2415_v58 = vrot.slane %v2413_v59, 1  ;;  %v2776_v15 = vrot.slane %v2774_v36, 7  ;;  %v2442_v1 = vshll.u32 %v2389_v53, 16 }
 0x3a0   : > { %2350 = vmatmul.mubr.bf16.gmra.mrb[24].mxu1 %v1693_v17  ;;  %v1942_v39 = vsel %vm1536_vm2, %v1934_v0, %v1728_v41  ;;  %v2382_v17 = vld [vmem:[#allocation2 + $0x20] sm:$0xff]  ;;  %v1729_v52 = vsel %vm1536_vm2, %v1721_v61, %v1728_v41  ;;  %v3563_v41 = vsel %vm670_vm0, %v9355_v27, 0  ;;  %v4056_v0 = vshll.u32 %v9567_v8, 16 }
 0x3a1   : > { %2149 = vmatmul.mubr.bf16.gmra.mrb[44].mxu0 %v1806_v50  ;;  %2357 = vmatprep.mubr.bf16.mxu1 %v9409_v55  ;;  %v1826_v50 = vrot.slane %v1824_v32, 1  ;;  %v2401_v46 = vshll.u32 %v2382_v17, 16  ;;  %v2790_v27 = vshrl.u32 %v9573_v45, 16  ;;  %v2749_v32 = vld [vmem:[#allocation2 + $0x60] sm:$0x80]  ;;  %v2444_v59 = vrot.slane %v2442_v1, 1 }
 0x3a2   : > { %2156 = vmatprep.mubr.bf16.mxu0 %v1918_v40  ;;  %7544 = vmatpush3.bf16.msra.mxu0 %v8309_v62  ;;  %v1950_v62 = vrot.slane %v1948_v47, 7  ;;  %v2418_v47 = vshll.u32 %v2385_v63, 16  ;;  %v2391_v63 = vld [vmem:[#allocation2 + $0x88] sm:$0x1] }
 0x3a3   : > { %7545 = vmatprep.subr.bf16.mxu0 %v8313_v35  ;;  %v1951_v35 = vshll.u32 %v9415_v42, 16  ;;  %v1827_v29 = vsel %vm1778_vm12, %v1822_v20, %v1826_v50  ;;  %v2403_v4 = vrot.slane %v2401_v46, 1  ;;  %v9600_v20 = vld [vmem:[#allocation2 + $0x80] sm:$0xff]  ;;  %v2793_v50 = vshll.u32 %v9573_v45, 16 }
 0x3a4   : > { %v2420_v18 = vrot.slane %v2418_v47, 1  ;;  %v2802_v46 = vshrl.u32 %v9600_v20, 16 }
 0x3a5   : > { %v1953_v40 = vor.u32 %v1951_v35, %v1950_v62  ;;  %v8316_v35 = vld [vmem:[%s11072_s8 + $0x8] sm:$0xff]   ;;  %v2439_v56 = vrot.slane %v2793_v50, 1 }
 0x3a6   : > { %7546 = vmatpush3.bf16.msra.mxu0 %v8314_v11  ;;  %v2383_v11 = vld [vmem:[#allocation2 + $0x28] sm:$0x1] }
 0x3a7   : > { %8061 = vmatprep.subr.bf16.mxu0 %v9534_v31  ;;  %v1954_v54 = vsel %vm1536_vm2, %v1946_v16, %v1953_v40  ;;  %v2406_v33 = vshll.u32 %v2383_v11, 16  ;;  %v2751_v11 = vld [vmem:[#allocation2 + $0x78] sm:$0x80] }
 0x3a8   : > { %2358 = vmatmul.mubr.bf16.gmra.mrb[28].mxu1 %v1705_v37  ;;  %v2399_v37 = vshrl.u32 %v2382_v17, 16  ;;  %v2387_v17 = vld [vmem:[#allocation2 + $0x58] sm:$0x1] }
 0x3a9   : > { %2157 = vmatmul.mubr.bf16.gmra.mrb[48].mxu0 %v1813_v19  ;;  %2365 = vmatprep.mubr.bf16.mxu1 %v9411_v25  ;;  %v1833_v19 = vrot.slane %v1831_v60, 1  ;;  %v2408_v23 = vrot.slane %v2406_v33, 1  ;;  %v2430_v16 = vshll.u32 %v2387_v17, 16  ;;  %v2798_v60 = vshrl.u32 %v2751_v11, 16  ;;  %v2755_v17 = vld [vmem:[#allocation2 + $0xa8] sm:$0x80] }
 0x3aa   : > { %2164 = vmatprep.mubr.bf16.mxu0 %v1930_v51  ;;  %v2404_v51 = vor.u32 %v2403_v4, %v2399_v37  ;;  %v2805_v4 = vshll.u32 %v9600_v20, 16 }
 0x3ab   : > { %v1834_v7 = vsel %vm1778_vm12, %v1829_v48, %v1833_v19  ;;  %v2800_v3 = vrot.slane %v2798_v60, 7  ;;  %v2753_v19 = vld [vmem:[#allocation2 + $0x90] sm:$0x80] }
 0x3ac   : > { %v2409_v14 = vsel %vm1778_vm12, %v2404_v51, %v2408_v23  ;;  %v7483_v51 = vpop.f32.mrb[8].mxu1  ;;  %v9627_v23 = vor.u32 %v2790_v27, %v2439_v56  ;;  %v9668_v56 = vld [vmem:[#allocation2 + $0xe0] sm:$0xff] }
 0x3ad   : > { %v7484_v36 = vpop.f32.mrb[9].mxu1 }
 0x3ae   : > { %v2445_v47 = vsel %vm1778_vm12, %v9627_v23, %v2444_v59  ;;  %v2759_v59 = vld [vmem:[#allocation2 + $0xd8] sm:$0x80] }
 0x3b0   : > { %2366 = vmatmul.mubr.bf16.gmra.mrb[32].mxu1 %v1717_v5  ;;  %v2783_v5 = vor.u32 %v2781_v26, %v2780_v30  ;;  %v2786_v26 = vshrl.u32 %v2749_v32, 16 }
 0x3b1   : > { %2165 = vmatmul.mubr.bf16.gmra.mrb[52].mxu0 %v1820_v34  ;;  %2373 = vmatprep.mubr.bf16.mxu1 %v9413_v28  ;;  %v5302_v34 = vrot.slane %v4056_v0, 1 }
 0x3b2   : > { %2172 = vmatprep.mubr.bf16.mxu0 %v1942_v39  ;;  %v9590_v39 = vor.u32 %v2415_v58, %v2411_v57  ;;  %v2784_v61 = vsel %vm1536_vm2, %v2776_v15, %v2783_v5  ;;  %v2788_v24 = vrot.slane %v2786_v26, 7  ;;  %v2451_v15 = vrot.slane %v2805_v4, 1  ;;  %v2393_v26 = vld [vmem:[#allocation2 + $0xa0] sm:$0x1] }
 0x3b3   : > { %v9594_v62 = vor.u32 %v5302_v34, %v4053_v43 }
 0x3b4   : > { %v2421_v2 = vsel %vm1778_vm12, %v9590_v39, %v2420_v18 }
 0x3b8   : > { %2374 = vmatmul.mubr.bf16.gmra.mrb[36].mxu1 %v1729_v52  ;;  %v2432_v52 = vrot.slane %v2430_v16, 1  ;;  %v9654_v16 = vld [vmem:[#allocation2 + $0xc8] sm:$0xff] }
 0x3b9   : > { %2173 = vmatmul.mubr.bf16.gmra.mrb[56].mxu0 %v1827_v29  ;;  %3026 = vmatprep.mubr.bf16.mxu1 %v9403_v44  ;;  %v2804_v29 = vrot.slane %v2802_v46, 7  ;;  %v2838_v53 = vshrl.u32 %v9654_v16, 16  ;;  %v2841_v1 = vshll.u32 %v9654_v16, 16 }
 0x3ba   : > { %2180 = vmatprep.mubr.bf16.mxu0 %v1954_v54  ;;  %v9616_v54 = vld [vmem:[#allocation2 + $0x98] sm:$0xff]  ;;  %v2433_v33 = vsel %vm1778_vm12, %v9538_v21, %v2432_v52 }
 0x3bb   : > { %v2807_v37 = vor.u32 %v2805_v4, %v2804_v29  ;;  %v2814_v48 = vshrl.u32 %v9616_v54, 16  ;;  %v2817_v58 = vshll.u32 %v9616_v54, 16  ;;  %v2840_v4 = vrot.slane %v2838_v53, 7 }
 0x3bd   : > { %v2808_v30 = vsel %vm1536_vm2, %v2800_v3, %v2807_v37 }
 0x3c0   : > { %3027 = vmatmul.mubr.bf16.vlgmr.msra.gmra.mrb[40].mxu1 %v2772_v22  ;;  %v9629_v22 = vadd.f32 %v7484_v36, %v7483_v51  ;;  %v2850_v51 = vshrl.u32 %v9668_v56, 16 }
 0x3c1   : > { %2181 = vmatmul.mubr.bf16.gmra.mrb[60].mxu0 %v1834_v7  ;;  %3034 = vmatprep.mubr.bf16.mxu1 %v9502_v6  ;;  %v2792_v6 = vrot.slane %v2790_v27, 7  ;;  %v9635_v7 = vld [vmem:[#allocation2 + $0xb0] sm:$0xff]  ;;  %v2454_v27 = vshll.u32 %v2391_v63, 16 }
 0x3c2   : > { %2663 = vmatprep.mubr.bf16.mxu0 %v2409_v14  ;;  %8094 = vmatpush3.bf16.msra.mxu1 %v3563_v41  ;;  %v2810_v41 = vshrl.u32 %v2753_v19, 16  ;;  %v7486_v14 = vpop.f32.mrb[10].mxu1  ;;  %v2826_v18 = vshrl.u32 %v9635_v7, 16 }
 0x3c3   : > { %7748 = vmatprep.subr.bf16.mxu1 %v8325_v13  ;;  %v2795_v40 = vor.u32 %v2793_v50, %v2792_v6  ;;  %v8320_v13 = vld [vmem:[%s11072_s8 + $0x28] sm:$0xff]   ;;  %v7487_v5 = vpop.f32.mrb[11].mxu1  ;;  %v2456_v6 = vrot.slane %v2454_v27, 1  ;;  %v2822_v50 = vshrl.u32 %v2755_v17, 16 }
 0x3c4   : > { %v9642_v57 = vadd.f32 %v7487_v5, %v7486_v14  ;;  %v2812_v32 = vrot.slane %v2810_v41, 7  ;;  %v2846_v41 = vshrl.u32 %v2759_v59, 16  ;;  %v2487_v14 = vrot.slane %v2841_v1, 1  ;;  %v8324_v17 = vld [vmem:[%s8588_s27 + $0x8] sm:$0xff]  }
 0x3c5   : > { %v2796_v10 = vsel %vm1536_vm2, %v2788_v24, %v2795_v40  ;;  %v2829_v40 = vshll.u32 %v9635_v7, 16  ;;  %v2824_v52 = vrot.slane %v2822_v50, 7  ;;  %v8329_v50 = vld [vmem:[%s8588_s27 + $0x10] sm:$0xff]  }
 0x3c6   : > { %v9693_v27 = vor.u32 %v2838_v53, %v2487_v14  ;;  %v3114_v53 = vld [vmem:[#allocation2 + $0x88] sm:$0x1]  ;;  %v3120_v14 = vld [vmem:[#allocation2 + $0xd0] sm:$0x1] }
 0x3c7   : > { %v2475_v3 = vrot.slane %v2829_v40, 1 }
 0x3c8   : > { %3035 = vmatmul.mubr.bf16.gmra.mrb[44].mxu1 %v2784_v61  ;;  %v9648_v61 = vor.u32 %v2802_v46, %v2451_v15  ;;  %v2463_v46 = vrot.slane %v2817_v58, 1  ;;  %v2848_v15 = vrot.slane %v2846_v41, 7  ;;  %v8345_v41 = vld [vmem:[%s11071_s7 + $0xd8] sm:$0xff]  }
 0x3c9   : > { %2664 = vmatmul.mubr.bf16.vlgmr.msra.gmra.mrb[64].mxu0 %v9401_v9  ;;  %3042 = vmatprep.mubr.bf16.mxu1 %v9573_v45  ;;  %v8317_v9 = vld [vmem:[%s11072_s8 + $0x10] sm:$0xff]   ;;  %v2816_v45 = vrot.slane %v2814_v48, 7  ;;  %v9678_v36 = vor.u32 %v2826_v18, %v2475_v3 }
 0x3ca   : > { %8062 = vmatpush3.bf16.msra.mxu0 %v9534_v31  ;;  %2671 = vmatprep.mubr.bf16.mxu0 %v2421_v2  ;;  %v8318_v31 = vld [vmem:[%s11072_s8 + $0x18] sm:$0xff]   ;;  %v2457_v24 = vsel %vm1778_vm12, %v9648_v61, %v2456_v6  ;;  %v9665_v29 = vor.u32 %v2814_v48, %v2463_v46  ;;  %v8326_v6 = vld [vmem:[%s11071_s7] sm:$0xff]  }
 0x3cb   : > { %8063 = vmatprep.subr.bf16.mxu0 %v8316_v35  ;;  %v2819_v34 = vor.u32 %v2817_v58, %v2816_v45  ;;  %v8323_v2 = vld [vmem:[%s11072_s8 + $0x38] sm:$0xff]   ;;  %v2852_v45 = vrot.slane %v2850_v51, 7 }
 0x3ce   : > { %8064 = vmatpush3.bf16.msra.mxu0 %v8316_v35  ;;  %v2820_v35 = vsel %vm1536_vm2, %v2812_v32, %v2819_v34  ;;  %v3108_v34 = vld [vmem:[#allocation2 + $0x40] sm:$0x1] }
 0x3cf   : > { %8065 = vmatprep.subr.bf16.mxu0 %v8317_v9 }
 0x3d0   : > { %3043 = vmatmul.mubr.bf16.gmra.mrb[48].mxu1 %v2796_v10  ;;  %v2757_v10 = vld [vmem:[#allocation2 + $0xc0] sm:$0x80] }
 0x3d1   : > { %2672 = vmatmul.mubr.bf16.gmra.mrb[68].mxu0 %v9403_v44  ;;  %3050 = vmatprep.mubr.bf16.mxu1 %v9600_v20  ;;  %v8319_v44 = vld [vmem:[%s11072_s8 + $0x20] sm:$0xff]   ;;  %v2828_v20 = vrot.slane %v2826_v18, 7 }
 0x3d2   : > { %2679 = vmatprep.mubr.bf16.mxu0 %v2433_v33  ;;  %8066 = vmatpush3.bf16.msra.mxu0 %v8317_v9  ;;  %v2466_v9 = vshll.u32 %v2393_v26, 16  ;;  %v2834_v33 = vshrl.u32 %v2757_v10, 16  ;;  %v3116_v10 = vld [vmem:[#allocation2 + $0xa0] sm:$0x1] }
 0x3d3   : > { %8067 = vmatprep.subr.bf16.mxu0 %v8318_v31  ;;  %v2831_v11 = vor.u32 %v2829_v40, %v2828_v20  ;;  %v8327_v20 = vld [vmem:[%s11071_s7 + $0x48] sm:$0xff]   ;;  %v3179_v3 = vshll.u32 %v3116_v10, 16 }
 0x3d4   : > { %v2468_v60 = vrot.slane %v2466_v9, 1  ;;  %v2836_v19 = vrot.slane %v2834_v33, 7  ;;  %v8332_v9 = vld [vmem:[%s11071_s7 + $0x50] sm:$0xff]   ;;  %v3167_v33 = vshll.u32 %v3114_v53, 16  ;;  %v9812_v53 = vld [vmem:[#allocation2 + $0xf8] sm:$0xff] }
 0x3d6   : > { %8068 = vmatpush3.bf16.msra.mxu0 %v8318_v31  ;;  %v2395_v31 = vld [vmem:[#allocation2 + $0xb8] sm:$0x1]  ;;  %v2469_v37 = vsel %vm1778_vm12, %v9665_v29, %v2468_v60  ;;  %v8335_v60 = vld [vmem:[%s11071_s7 + $0xc8] sm:$0xff]   ;;  %v3169_v59 = vrot.slane %v3167_v33, 1  ;;  %v3768_v33 = vshrl.u32 %v9812_v53, 16 }
 0x3d7   : > { %8069 = vmatprep.subr.bf16.mxu0 %v8319_v44  ;;  %v2478_v48 = vshll.u32 %v2395_v31, 16  ;;  %v8336_v31 = vld [vmem:[%s11071_s7 + $0x58] sm:$0xff]  }
 0x3d8   : > { %3051 = vmatmul.mubr.bf16.gmra.mrb[52].mxu1 %v2808_v30 }
 0x3d9   : > { %2680 = vmatmul.mubr.bf16.gmra.mrb[72].mxu0 %v9405_v49  ;;  %3058 = vmatprep.mubr.bf16.mxu1 %v9616_v54  ;;  %v8321_v49 = vld [vmem:[%s11072_s8 + $0x30] sm:$0xff]   ;;  %v2832_v54 = vsel %vm1536_vm2, %v2824_v52, %v2831_v11  ;;  %v2480_v63 = vrot.slane %v2478_v48, 1  ;;  %v8330_v11 = vld [vmem:[%s8588_s27 + $0x18] sm:$0xff]   ;;  %v8337_v48 = vld [vmem:[%s11071_s7 + $0x88] sm:$0xff]  }
 0x3da   : > { %2687 = vmatprep.mubr.bf16.mxu0 %v2445_v47  ;;  %8070 = vmatpush3.bf16.msra.mxu0 %v8319_v44  ;;  %v9675_v44 = vor.u32 %v2841_v1, %v2840_v4  ;;  %v8339_v4 = vld [vmem:[%s8588_s27 + $0x20] sm:$0xff]  }
 0x3db   : > { %8071 = vmatprep.subr.bf16.mxu0 %v8320_v13 }
 0x3dc   : > { %v2844_v30 = vsel %vm1536_vm2, %v2836_v19, %v9675_v44  ;;  %v8340_v19 = vld [vmem:[%s8588_s27 + $0x28] sm:$0xff]  }
 0x3de   : > { %8072 = vmatpush3.bf16.msra.mxu0 %v8320_v13  ;;  %v2853_v13 = vshll.u32 %v9668_v56, 16 }
 0x3df   : > { %8073 = vmatprep.subr.bf16.mxu0 %v8321_v49 }
 0x3e0   : > { %3059 = vmatmul.mubr.bf16.gmra.mrb[56].mxu1 %v2820_v35  ;;  %v9691_v47 = vor.u32 %v2853_v13, %v2852_v45  ;;  %v3110_v35 = vld [vmem:[#allocation2 + $0x58] sm:$0x1]  ;;  %v8343_v45 = vld [vmem:[%s11071_s7 + $0x90] sm:$0xff]  }
 0x3e1   : > { %2688 = vmatmul.mubr.bf16.gmra.mrb[76].mxu0 %v9407_v38  ;;  %3066 = vmatprep.mubr.bf16.mxu1 %v9635_v7  ;;  %v8331_v38 = vld [vmem:[%s11071_s7 + $0xc0] sm:$0xff]   ;;  %v2481_v7 = vsel %vm1778_vm12, %v9678_v36, %v2480_v63 }
 0x3e2   : > { %2695 = vmatprep.mubr.bf16.mxu0 %v2457_v24  ;;  %8074 = vmatpush3.bf16.msra.mxu0 %v8321_v49  ;;  %v2856_v32 = vsel %vm1536_vm2, %v2848_v15, %v9691_v47  ;;  %v3131_v49 = vshll.u32 %v3108_v34, 16  ;;  %v8328_v24 = vld [vmem:[%s11071_s7 + $0x8] sm:$0xff]   ;;  %v8344_v63 = vld [vmem:[%s11071_s7 + $0x20] sm:$0xff]   ;;  %v8349_v15 = vld [vmem:[%s8588_s27 + $0x30] sm:$0xff]  }
 0x3e3   : > { %8075 = vmatprep.subr.bf16.mxu0 %v8323_v2  ;;  %v8348_v34 = vld [vmem:[%s11071_s7 + $0x28] sm:$0xff]  }
 0x3e4   : > { %v3133_v26 = vrot.slane %v3131_v49, 1  ;;  %v8350_v49 = vld [vmem:[%s8588_s27 + $0x38] sm:$0xff]  }
 0x3e6   : > { %8076 = vmatpush3.bf16.msra.mxu0 %v8323_v2  ;;  %v3143_v2 = vshll.u32 %v3110_v35, 16  ;;  %v3134_v40 = vsel %vm1778_vm12, %v9590_v39, %v3133_v26  ;;  %v8334_v39 = vld [vmem:[%s11071_s7 + $0x10] sm:$0xff]   ;;  %v3122_v35 = vld [vmem:[#allocation2 + $0xe8] sm:$0x1] }
 0x3e7   : > { %7684 = vmatprep.subr.bf16.mxu0 %v8331_v38  ;;  %v8333_v38 = vld [vmem:[%s11071_s7 + $0x80] sm:$0xff]   ;;  %v8354_v26 = vld [vmem:[%s11071_s7 + $0x30] sm:$0xff]  }
 0x3e8   : > { %3067 = vmatmul.mubr.bf16.gmra.mrb[60].mxu1 %v2832_v54 }
 0x3e9   : > { %2696 = vmatmul.mubr.bf16.gmra.mrb[80].mxu0 %v9409_v55  ;;  %3074 = vmatprep.mubr.bf16.mxu1 %v9654_v16  ;;  %v2397_v55 = vld [vmem:[#allocation2 + $0xd0] sm:$0x1] }
 0x3ea   : > { %2703 = vmatprep.mubr.bf16.mxu0 %v2469_v37  ;;  %v2490_v58 = vshll.u32 %v2397_v55, 16  ;;  %v8338_v37 = vld [vmem:[%s11071_s7 + $0x18] sm:$0xff]   ;;  %v3181_v55 = vrot.slane %v3179_v3, 1 }
 0x3ec   : > { %v2492_v5 = vrot.slane %v2490_v58, 1  ;;  %v3170_v58 = vsel %vm1778_vm12, %v9648_v61, %v3169_v59  ;;  %v8352_v61 = vld [vmem:[%s11071_s7 + $0x70] sm:$0xff]   ;;  %v8373_v59 = vld [vmem:[%s11071_s7 + $0x1c8] sm:$0xff]  }
 0x3ee   : > { %v2493_v18 = vsel %vm1778_vm12, %v9693_v27, %v2492_v5 }
 0x3f0   : > { %3075 = vmatmul.mubr.bf16.gmra.mrb[64].mxu1 %v2844_v30  ;;  %v3118_v30 = vld [vmem:[#allocation2 + $0xb8] sm:$0x1] }
 0x3f1   : > { %2704 = vmatmul.mubr.bf16.gmra.mrb[84].mxu0 %v9411_v25  ;;  %3082 = vmatprep.mubr.bf16.mxu1 %v9668_v56  ;;  %v8322_v25 = vld [vmem:[%s8588_s27] sm:$0xff]   ;;  %v3191_v5 = vshll.u32 %v3118_v30, 16  ;;  %v8362_v30 = vld [vmem:[%s11071_s7 + $0xb8] sm:$0xff]  }
 0x3f2   : > { %2711 = vmatprep.mubr.bf16.mxu0 %v2481_v7  ;;  %v8346_v7 = vld [vmem:[%s11071_s7 + $0x68] sm:$0xff]  }
 0x3f8   : > { %3083 = vmatmul.mubr.bf16.gmra.mrb[68].mxu1 %v2856_v32  ;;  %v8347_v32 = vld [vmem:[%s11071_s7 + $0x98] sm:$0xff]  }
 0x3f9   : > { %2712 = vmatmul.mubr.bf16.gmra.mrb[88].mxu0 %v9413_v28  ;;  %8095 = vmatprep.mubr.msk.bf16.mxu1 %vm3537_vm13, %v8322_v25  ;;  %v3112_v28 = vld [vmem:[#allocation2 + $0x70] sm:$0x1]  ;;  %v3182_v25 = vsel %vm1778_vm12, %v9665_v29, %v3181_v55  ;;  %v8351_v29 = vld [vmem:[%s11071_s7 + $0xe0] sm:$0xff]  }
 0x3fa   : > { %2719 = vmatprep.mubr.bf16.mxu0 %v2493_v18  ;;  %v3155_v46 = vshll.u32 %v3112_v28, 16  ;;  %v3203_v18 = vshll.u32 %v3120_v14, 16  ;;  %v3771_v14 = vshll.u32 %v9812_v53, 16 }
 0x3fc   : > { %v3157_v52 = vrot.slane %v3155_v46, 1  ;;  %v3205_v28 = vrot.slane %v3203_v18, 1  ;;  %v8356_v46 = vld [vmem:[%s11071_s7 + $0x78] sm:$0xff]  }
 0x3fe   : > { %v3158_v1 = vsel %vm1778_vm12, %v9627_v23, %v3157_v52  ;;  %v8341_v23 = vld [vmem:[%s11071_s7 + $0xd0] sm:$0xff]   ;;  %v8357_v52 = vld [vmem:[%s11071_s7 + $0xa8] sm:$0xff]  }
 0x400   : > { %8096 = vmatmul.mubr.msk.bf16.vlgmr.msra.gmra.mrb[72].mxu1 %vm3537_vm13, %v8324_v17  ;;  %v3193_v17 = vrot.slane %v3191_v5, 1  ;;  %v3727_v5 = vld [vmem:[#allocation2 + $0xf0] sm:$0x80] }
 0x401   : > { %2720 = vmatmul.mubr.bf16.gmra.mrb[92].mxu0 %v9415_v42  ;;  %7749 = vmatpush3.bf16.msra.mxu1 %v8326_v6  ;;  %v3145_v42 = vrot.slane %v3143_v2, 1  ;;  %v3723_v6 = vld [vmem:[#allocation2 + $0xc0] sm:$0x80]  ;;  %v8355_v2 = vld [vmem:[%s11071_s7 + $0xe8] sm:$0xff]  }
 0x402   : > { %8077 = vmatprep.mubr.bf16.mxu0 %v3134_v40  ;;  %7750 = vmatprep.subr.bf16.mxu1 %v8327_v20  ;;  %v8353_v20 = vld [vmem:[%s11071_s7 + $0xa0] sm:$0xff]   ;;  %v3740_v40 = vshrl.u32 %v3723_v6, 16  ;;  %v3764_v6 = vshrl.u32 %v3727_v5, 16  ;;  %v8388_v5 = vld [vmem:[%s11071_s7 + $0x1f0] sm:$0xff]  }
 0x403   : > { %8099 = vmatprep.mubr.msk.bf16.mxu1 %vm3537_vm13, %v8329_v50  ;;  %v3146_v54 = vsel %vm1778_vm12, %v9538_v21, %v3145_v42  ;;  %v8342_v21 = vld [vmem:[%s11071_s7 + $0x60] sm:$0xff]   ;;  %v3948_v50 = vld [vmem:[#allocation2 + $0xd8] sm:$0x80] }
 0x404   : > { %v8358_v42 = vld [vmem:[%s11071_s7 + $0x38] sm:$0xff]  }
 0x405   : > { %7751 = vmatpush3.bf16.msra.mxu1 %v8328_v24  ;;  %v3194_v24 = vsel %vm1778_vm12, %v9678_v36, %v3193_v17  ;;  %v3206_v36 = vsel %vm1778_vm12, %v9693_v27, %v3205_v28 }
 0x406   : > { %7752 = vmatprep.subr.bf16.mxu1 %v8332_v9  ;;  %v3212_v9 = vrot.slane %v2853_v13, 1  ;;  %v8370_v13 = vld [vmem:[%s11071_s7 + $0x1c0] sm:$0xff]  }
 0x408   : > { %8100 = vmatmul.mubr.msk.bf16.gmra.mrb[76].mxu1 %vm3537_vm13, %v8330_v11  ;;  %v3215_v11 = vshll.u32 %v3122_v35, 16  ;;  %v9822_v10 = vor.u32 %v3212_v9, %v2850_v51  ;;  %v8361_v51 = vld [vmem:[%s11071_s7 + $0xf8] sm:$0xff]   ;;  %v8378_v35 = vld [vmem:[%s11071_s7 + $0x190] sm:$0xff]  }
 0x409   : > { %8078 = vmatmul.mubr.bf16.vlgmr.msra.gmra.mrb[96].mxu0 %v3146_v54  ;;  %7753 = vmatpush3.bf16.msra.mxu1 %v8334_v39  ;;  %v3965_v39 = vshrl.u32 %v3948_v50, 16 }
 0x40a   : > { %7685 = vmatpush3.bf16.msra.mxu0 %v8333_v38  ;;  %8081 = vmatprep.mubr.bf16.mxu0 %v3158_v1  ;;  %v8359_v38 = vld [vmem:[%s11071_s7 + $0xf0] sm:$0xff]  }
 0x40b   : > { %7686 = vmatprep.subr.bf16.mxu0 %v8335_v60  ;;  %7754 = vmatprep.subr.bf16.mxu1 %v8336_v31  ;;  %v3217_v60 = vrot.slane %v3215_v11, 1  ;;  %v3725_v31 = vld [vmem:[#allocation2 + $0xd8] sm:$0x80]  ;;  %v3967_v54 = vrot.slane %v3965_v39, 7  ;;  %v8360_v1 = vld [vmem:[%s11071_s7 + $0xb0] sm:$0xff]  }
 0x40c   : > { %8103 = vmatprep.mubr.msk.bf16.mxu1 %vm3537_vm13, %v8339_v4  ;;  %v3875_v4 = vld [vmem:[#allocation2 + $0xd0] sm:$0x1] }
 0x40d   : > { %7755 = vmatpush3.bf16.msra.mxu1 %v8338_v37  ;;  %v3950_v37 = vld [vmem:[#allocation2 + $0xf0] sm:$0x80] }
 0x40e   : > { %7687 = vmatpush3.bf16.msra.mxu0 %v8337_v48  ;;  %7756 = vmatprep.subr.bf16.mxu1 %v8342_v21  ;;  %v3752_v48 = vshrl.u32 %v3725_v31, 16  ;;  %v8372_v21 = vld [vmem:[%s11071_s7 + $0x180] sm:$0xff]   ;;  %v3977_v55 = vshrl.u32 %v3950_v37, 16  ;;  %v8367_v11 = vld [vmem:[%s11071_s7 + $0x150] sm:$0xff]   ;;  %v8369_v37 = vld [vmem:[%s11071_s7 + $0x158] sm:$0xff]  }
 0x40f   : > { %7688 = vmatprep.subr.bf16.mxu0 %v8341_v23  ;;  %v3218_v23 = vsel %vm1778_vm12, %v9822_v10, %v3217_v60  ;;  %v8368_v31 = vld [vmem:[%s11071_s7 + $0x110] sm:$0xff]  }
 0x410   : > { %8104 = vmatmul.mubr.msk.bf16.gmra.mrb[80].mxu1 %vm3537_vm13, %v8340_v19  ;;  %v3886_v19 = vshll.u32 %v3875_v4, 16 }
 0x411   : > { %8082 = vmatmul.mubr.bf16.gmra.mrb[100].mxu0 %v3170_v58  ;;  %7757 = vmatpush3.bf16.msra.mxu1 %v8344_v63  ;;  %v3770_v63 = vrot.slane %v3768_v33, 7  ;;  %v8374_v58 = vld [vmem:[%s11071_s7 + $0x188] sm:$0xff]  }
 0x412   : > { %7689 = vmatpush3.bf16.msra.mxu0 %v8343_v45  ;;  %8085 = vmatprep.mubr.bf16.mxu0 %v3182_v25  ;;  %v9849_v45 = vld [vmem:[#allocation2 + $0x110] sm:$0xff] }
 0x413   : > { %7690 = vmatprep.subr.bf16.mxu0 %v8345_v41  ;;  %7758 = vmatprep.subr.bf16.mxu1 %v8346_v7  ;;  %v3754_v41 = vrot.slane %v3752_v48, 7  ;;  %v8363_v7 = vld [vmem:[%s11071_s7 + $0x140] sm:$0xff]   ;;  %v8376_v25 = vld [vmem:[%s11071_s7 + $0x1d0] sm:$0xff]   ;;  %v3780_v18 = vshrl.u32 %v9849_v45, 16  ;;  %v3783_v9 = vshll.u32 %v9849_v45, 16 }
 0x414   : > { %8107 = vmatprep.mubr.msk.bf16.mxu1 %vm3537_vm13, %v8349_v15  ;;  %v3888_v15 = vrot.slane %v3886_v19, 1 }
 0x415   : > { %7759 = vmatpush3.bf16.msra.mxu1 %v8348_v34  ;;  %v9861_v34 = vor.u32 %v3771_v14, %v3770_v63  ;;  %v3762_v17 = vsel %vm1536_vm2, %v3754_v41, %v9691_v47  ;;  %v9924_v63 = vld [vmem:[#allocation2 + $0x140] sm:$0xff] }
 0x416   : > { %7691 = vmatpush3.bf16.msra.mxu0 %v8347_v32  ;;  %7760 = vmatprep.subr.bf16.mxu1 %v8352_v61  ;;  %v3979_v32 = vrot.slane %v3977_v55, 7  ;;  %v3876_v61 = vld [vmem:[#allocation2 + $0xe8] sm:$0x1]  ;;  %v8375_v41 = vld [vmem:[%s11071_s7 + $0x160] sm:$0xff]  }
 0x417   : > { %7692 = vmatprep.subr.bf16.mxu0 %v8351_v29  ;;  %v8364_v29 = vld [vmem:[%s11071_s7 + $0x100] sm:$0xff]   ;;  %v3893_v28 = vshll.u32 %v3876_v61, 16  ;;  %v3878_v61 = vld [vmem:[#allocation2 + $0x118] sm:$0x1] }
 0x418   : > { %8108 = vmatmul.mubr.msk.bf16.gmra.mrb[84].mxu1 %vm3537_vm13, %v8350_v49  ;;  %v3952_v49 = vld [vmem:[#allocation2 + $0x108] sm:$0x80]  ;;  %v3987_v50 = vsel %vm1536_vm2, %v3979_v32, %v9861_v34 }
 0x419   : > { %8086 = vmatmul.mubr.bf16.gmra.mrb[104].mxu0 %v3194_v24  ;;  %7761 = vmatpush3.bf16.msra.mxu1 %v8354_v26  ;;  %v8365_v26 = vld [vmem:[%s11071_s7 + $0x148] sm:$0xff]   ;;  %v3895_v39 = vrot.slane %v3893_v28, 1 }
 0x41a   : > { %7693 = vmatpush3.bf16.msra.mxu0 %v8353_v20  ;;  %4421 = vmatprep.mubr.bf16.mxu1 %v9654_v16  ;;  %v3742_v16 = vrot.slane %v3740_v40, 7  ;;  %v3889_v20 = vsel %vm1778_vm12, %v9693_v27, %v3888_v15  ;;  %v3989_v40 = vshrl.u32 %v3952_v49, 16  ;;  %v8366_v27 = vld [vmem:[%s11071_s7 + $0x108] sm:$0xff]   ;;  %v3731_v15 = vld [vmem:[#allocation2 + $0x120] sm:$0x80] }
 0x41b   : > { %8089 = vmatprep.mubr.bf16.mxu0 %v3206_v36  ;;  %7694 = vmatprep.subr.bf16.mxu0 %v8355_v2  ;;  %v3782_v2 = vrot.slane %v3780_v18, 7  ;;  %v9888_v24 = vld [vmem:[#allocation2 + $0x128] sm:$0xff]  ;;  %v3896_v48 = vsel %vm1778_vm12, %v9822_v10, %v3895_v39  ;;  %v8371_v10 = vld [vmem:[%s11071_s7 + $0x118] sm:$0xff]   ;;  %v8387_v39 = vld [vmem:[%s11071_s7 + $0x170] sm:$0xff]  }
 0x41c   : > { %7762 = vmatprep.subr.bf16.mxu1 %v8356_v46  ;;  %v3750_v3 = vsel %vm1536_vm2, %v3742_v16, %v9675_v44  ;;  %v3975_v44 = vsel %vm1536_vm2, %v3967_v54, %v9691_v47  ;;  %v8379_v47 = vld [vmem:[%s11071_s7 + $0x1d8] sm:$0xff]   ;;  %v3766_v46 = vrot.slane %v3764_v6, 7  ;;  %v3729_v36 = vld [vmem:[#allocation2 + $0x108] sm:$0x80]  ;;  %v3877_v16 = vld [vmem:[#allocation2 + $0x100] sm:$0x1] }
 0x41d   : > { %7763 = vmatpush3.bf16.msra.mxu1 %v8358_v42  ;;  %v8380_v42 = vld [vmem:[%s11071_s7 + $0x198] sm:$0xff]   ;;  %v3792_v60 = vshrl.u32 %v9888_v24, 16  ;;  %v3954_v54 = vld [vmem:[#allocation2 + $0x120] sm:$0x80]  ;;  %v3788_v6 = vshrl.u32 %v3731_v15, 16 }
 0x41e   : > { %7695 = vmatpush3.bf16.msra.mxu0 %v8357_v52  ;;  %7876 = vmatprep.subr.bf16.mxu1 %v8370_v13  ;;  %v8382_v52 = vld [vmem:[%s11071_s7 + $0x1e0] sm:$0xff]   ;;  %v9900_v13 = vor.u32 %v3783_v9, %v3782_v2  ;;  %v3774_v4 = vsel %vm1536_vm2, %v3766_v46, %v9861_v34  ;;  %v3956_v49 = vld [vmem:[#allocation2 + $0x138] sm:$0x80] }
 0x41f   : > { %7696 = vmatprep.subr.bf16.mxu0 %v8359_v38  ;;  %v3991_v38 = vrot.slane %v3989_v40, 7  ;;  %v9967_v46 = vld [vmem:[#allocation2 + $0x158] sm:$0xff]  ;;  %v10017_v15 = vld [vmem:[%s11072_s8] sm:$0xff]  }
 0x420   : > { %4422 = vmatmul.mubr.bf16.vlgmr.msra.gmra.mrb[88].mxu1 %v3750_v3  ;;  %v8384_v3 = vld [vmem:[%s11071_s7 + $0x1a0] sm:$0xff]  }
 0x421   : > { %8090 = vmatmul.mubr.bf16.gmra.mrb[108].mxu0 %v3218_v23  ;;  %4429 = vmatprep.mubr.bf16.mxu1 %v9668_v56  ;;  %v8385_v23 = vld [vmem:[%s11071_s7 + $0x1e8] sm:$0xff]   ;;  %v3999_v19 = vsel %vm1536_vm2, %v3991_v38, %v9900_v13 }
 0x422   : > { %7697 = vmatpush3.bf16.msra.mxu0 %v8360_v1  ;;  %4228 = vmatprep.mubr.bf16.mxu0 %v3975_v44  ;;  %v3776_v1 = vshrl.u32 %v3729_v36, 16  ;;  %v4001_v44 = vshrl.u32 %v3954_v54, 16  ;;  %v8392_v36 = vld [vmem:[%s11071_s7 + $0x1b8] sm:$0xff]  }
 0x423   : > { %7698 = vmatprep.subr.bf16.mxu0 %v8361_v51  ;;  %7877 = vmatpush3.bf16.msra.mxu1 %v8372_v21  ;;  %v3897_v51 = vrot.slane %v3771_v14, 1  ;;  %v3900_v21 = vshll.u32 %v3877_v16, 16  ;;  %v3733_v16 = vld [vmem:[#allocation2 + $0x138] sm:$0x80] }
 0x424   : > { %7878 = vmatprep.subr.bf16.mxu1 %v8373_v59  ;;  %v3794_v59 = vrot.slane %v3792_v60, 7  ;;  %v3778_v55 = vrot.slane %v3776_v1, 7  ;;  %v4003_v32 = vrot.slane %v4001_v44, 7  ;;  %v3816_v1 = vshrl.u32 %v9967_v46, 16 }
 0x425   : > { %v9938_v14 = vor.u32 %v3897_v51, %v3768_v33  ;;  %v8377_v33 = vld [vmem:[%s11071_s7 + $0x120] sm:$0xff]  }
 0x426   : > { %7699 = vmatpush3.bf16.msra.mxu0 %v8362_v30  ;;  %v3795_v30 = vshll.u32 %v9888_v24, 16 }
 0x427   : > { %7812 = vmatprep.subr.bf16.mxu0 %v8363_v7  ;;  %7879 = vmatpush3.bf16.msra.mxu1 %v8374_v58  ;;  %v8386_v7 = vld [vmem:[%s11071_s7 + $0x1a8] sm:$0xff]   ;;  %v3902_v58 = vrot.slane %v3900_v21, 1  ;;  %v9997_v21 = vld [vmem:[%s11075_s11] sm:$0x3] }
 0x428   : > { %4430 = vmatmul.mubr.bf16.gmra.mrb[92].mxu1 %v3762_v17  ;;  %7880 = vmatprep.subr.bf16.mxu1 %v8376_v25  ;;  %v9943_v25 = vor.u32 %v3795_v30, %v3794_v59  ;;  %v3786_v17 = vsel %vm1536_vm2, %v3778_v55, %v9900_v13 }
 0x429   : > { %4229 = vmatmul.mubr.bf16.vlgmr.msra.gmra.mrb[112].mxu0 %v3889_v20  ;;  %4437 = vmatprep.mubr.bf16.mxu1 %v9812_v53  ;;  %v3904_v20 = vrot.slane %v3783_v9, 1  ;;  %v3903_v28 = vsel %vm1778_vm12, %v9938_v14, %v3902_v58  ;;  %v8383_v9 = vld [vmem:[%s11071_s7 + $0x128] sm:$0xff]   ;;  %v3819_v58 = vshll.u32 %v9967_v46, 16 }
 0x42a   : > { %7813 = vmatpush3.bf16.msra.mxu0 %v8364_v29  ;;  %4236 = vmatprep.mubr.bf16.mxu0 %v3987_v50  ;;  %v3804_v29 = vshrl.u32 %v9924_v63, 16  ;;  %v8391_v50 = vld [vmem:[%s11071_s7 + $0x1f8] sm:$0xff]   ;;  %v4011_v2 = vsel %vm1536_vm2, %v4003_v32, %v9943_v25 }
 0x42b   : > { %7814 = vmatprep.subr.bf16.mxu0 %v8365_v26  ;;  %7881 = vmatpush3.bf16.msra.mxu1 %v8378_v35  ;;  %v8381_v26 = vld [vmem:[%s11071_s7 + $0x168] sm:$0xff]   ;;  %v8390_v35 = vld [vmem:[%s11071_s7 + $0x1b0] sm:$0xff]  }
 0x42c   : > { %7882 = vmatprep.subr.bf16.mxu1 %v8379_v47  ;;  %v3907_v47 = vshll.u32 %v3878_v61, 16  ;;  %v3806_v40 = vrot.slane %v3804_v29, 7  ;;  %v3735_v61 = vld [vmem:[#allocation2 + $0x150] sm:$0x80] }
 0x42e   : > { %7815 = vmatpush3.bf16.msra.mxu0 %v8366_v27  ;;  %v4013_v27 = vshrl.u32 %v3956_v49, 16  ;;  %v3909_v38 = vrot.slane %v3907_v47, 1 }
 0x42f   : > { %7816 = vmatprep.subr.bf16.mxu0 %v8367_v11  ;;  %7883 = vmatpush3.bf16.msra.mxu1 %v8380_v42  ;;  %v3790_v11 = vrot.slane %v3788_v6, 7  ;;  %v3807_v42 = vshll.u32 %v9924_v63, 16 }
 0x430   : > { %4438 = vmatmul.mubr.bf16.gmra.mrb[96].mxu1 %v3774_v4  ;;  %7884 = vmatprep.subr.bf16.mxu1 %v8382_v52  ;;  %v9981_v52 = vor.u32 %v3904_v20, %v3780_v18  ;;  %v4015_v54 = vrot.slane %v4013_v27, 7  ;;  %v3879_v4 = vld [vmem:[#allocation2 + $0x130] sm:$0x1]  ;;  %v3800_v18 = vshrl.u32 %v3733_v16, 16  ;;  %v3812_v20 = vshrl.u32 %v3735_v61, 16 }
 0x431   : > { %4237 = vmatmul.mubr.bf16.gmra.mrb[116].mxu0 %v3896_v48  ;;  %4445 = vmatprep.mubr.bf16.mxu1 %v9849_v45  ;;  %v3798_v51 = vsel %vm1536_vm2, %v3790_v11, %v9943_v25  ;;  %v8393_v48 = vld [vmem:[%s11071_s7 + $0x178] sm:$0xff]   ;;  %v3914_v59 = vshll.u32 %v3879_v4, 16  ;;  %v3881_v16 = vld [vmem:[#allocation2 + $0x160] sm:$0x1]  ;;  %v4487_v61 = vld [vmem:[#allocation2 + $0xe8] sm:$0x1] }
 0x432   : > { %4244 = vmatprep.mubr.bf16.mxu0 %v3999_v19  ;;  %7817 = vmatpush3.bf16.msra.mxu0 %v8368_v31  ;;  %v9983_v31 = vor.u32 %v3807_v42, %v3806_v40  ;;  %v3910_v19 = vsel %vm1778_vm12, %v9981_v52, %v3909_v38  ;;  %v3814_v27 = vrot.slane %v3812_v20, 7 }
 0x433   : > { %7818 = vmatprep.subr.bf16.mxu0 %v8369_v37  ;;  %7885 = vmatpush3.bf16.msra.mxu1 %v8384_v3  ;;  %v3958_v37 = vld [vmem:[#allocation2 + $0x150] sm:$0x80]  ;;  %v3916_v32 = vrot.slane %v3914_v59, 1 }
 0x434   : > { %7886 = vmatprep.subr.bf16.mxu1 %v8385_v23  ;;  %v8389_v3 = vld [vmem:[%s11071_s7 + $0x130] sm:$0xff]   ;;  %v3911_v23 = vrot.slane %v3795_v30, 1  ;;  %v4023_v44 = vsel %vm1536_vm2, %v4015_v54, %v9983_v31  ;;  %v4025_v55 = vshrl.u32 %v3958_v37, 16  ;;  %v3962_v54 = vld [vmem:[#allocation2 + $0x180] sm:$0x80] }
 0x435   : > { %v10008_v30 = vld [vmem:[#allocation2 + $0x170] sm:$0xff] }
 0x436   : > { %7819 = vmatpush3.bf16.msra.mxu0 %v8371_v10  ;;  %v3818_v10 = vrot.slane %v3816_v1, 7  ;;  %v3828_v6 = vshrl.u32 %v10008_v30, 16 }
 0x437   : > { %7820 = vmatprep.subr.bf16.mxu0 %v8375_v41  ;;  %7887 = vmatpush3.bf16.msra.mxu1 %v8386_v7  ;;  %v8394_v41 = vld [vmem:[%s11071_s7 + $0x138] sm:$0xff]   ;;  %v3802_v7 = vrot.slane %v3800_v18, 7  ;;  %v3928_v18 = vshll.u32 %v3881_v16, 16 }
 0x438   : > { %4446 = vmatmul.mubr.bf16.gmra.mrb[100].mxu1 %v3786_v17  ;;  %7888 = vmatprep.subr.bf16.mxu1 %v8388_v5  ;;  %v10021_v5 = vor.u32 %v3911_v23, %v3792_v60  ;;  %v10023_v49 = vor.u32 %v3819_v58, %v3818_v10  ;;  %v3880_v17 = vld [vmem:[#allocation2 + $0x148] sm:$0x1]  ;;  %v4055_v23 = vrot.slane %v4053_v43, 7 }
 0x439   : > { %4245 = vmatmul.mubr.bf16.gmra.mrb[120].mxu0 %v3903_v28  ;;  %4453 = vmatprep.mubr.bf16.mxu1 %v9888_v24  ;;  %v3918_v28 = vrot.slane %v3807_v42, 1  ;;  %v3921_v47 = vshll.u32 %v3880_v17, 16  ;;  %v3930_v10 = vrot.slane %v3928_v18, 1 }
 0x43a   : > { %4252 = vmatprep.mubr.bf16.mxu0 %v4011_v2  ;;  %7821 = vmatpush3.bf16.msra.mxu0 %v8377_v33  ;;  %v4027_v33 = vrot.slane %v4025_v55, 7  ;;  %v3917_v60 = vsel %vm1778_vm12, %v10021_v5, %v3916_v32  ;;  %v3830_v2 = vrot.slane %v3828_v6, 7  ;;  %v3822_v4 = vsel %vm1536_vm2, %v3814_v27, %v10023_v49  ;;  %v4848_v55 = vld [vmem:[#allocation2 + $0xf0] sm:$0x80]  ;;  %v4850_v27 = vld [vmem:[#allocation2 + $0x108] sm:$0x80] }
 0x43b   : > { %7822 = vmatprep.subr.bf16.mxu0 %v8381_v26  ;;  %7889 = vmatpush3.bf16.msra.mxu1 %v8390_v35  ;;  %v3960_v26 = vld [vmem:[#allocation2 + $0x168] sm:$0x80]  ;;  %v3810_v35 = vsel %vm1536_vm2, %v3802_v7, %v9983_v31  ;;  %v10037_v11 = vor.u32 %v3918_v28, %v3804_v29  ;;  %v3923_v42 = vrot.slane %v3921_v47, 1  ;;  %v10056_v7 = vor.u32 %v4056_v0, %v4055_v23 }
 0x43c   : > { %7890 = vmatprep.subr.bf16.mxu1 %v8391_v50  ;;  %v4035_v50 = vsel %vm1536_vm2, %v4027_v33, %v10023_v49  ;;  %v4037_v40 = vshrl.u32 %v3960_v26, 16  ;;  %v4865_v33 = vshrl.u32 %v4848_v55, 16 }
 0x43e   : > { %7823 = vmatpush3.bf16.msra.mxu0 %v8383_v9  ;;  %v3831_v9 = vshll.u32 %v10008_v30, 16  ;;  %v4039_v38 = vrot.slane %v4037_v40, 7  ;;  %v4867_v28 = vrot.slane %v4865_v33, 7 }
 0x43f   : > { %7824 = vmatprep.subr.bf16.mxu0 %v8387_v39  ;;  %7891 = vmatpush3.bf16.msra.mxu1 %v8392_v36  ;;  %v3737_v39 = vld [vmem:[#allocation2 + $0x168] sm:$0x80] }
 0x440   : > { %4454 = vmatmul.mubr.bf16.gmra.mrb[104].mxu1 %v3798_v51  ;;  %8202 = vmatprep.subr.msk.bf16.mxu1 %vm670_vm0, %v9997_v21  ;;  %v10039_v36 = vor.u32 %v3831_v9, %v3830_v2  ;;  %v3824_v37 = vshrl.u32 %v3737_v39, 16  ;;  %v3924_v51 = vsel %vm1778_vm12, %v10037_v11, %v3923_v42  ;;  %v3932_v17 = vrot.slane %v3831_v9, 1 }
 0x441   : > { %4253 = vmatmul.mubr.bf16.gmra.mrb[124].mxu0 %v3910_v19  ;;  %4461 = vmatprep.mubr.bf16.mxu1 %v9924_v63  ;;  %v4486_v19 = vld [vmem:[#allocation2 + $0xe0] sm:$0xff] }
 0x442   : > { %4260 = vmatprep.mubr.bf16.mxu0 %v4023_v44  ;;  %7825 = vmatpush3.bf16.msra.mxu0 %v8389_v3  ;;  %v3925_v3 = vrot.slane %v3819_v58, 1  ;;  %v4047_v29 = vsel %vm1536_vm2, %v4039_v38, %v10039_v36  ;;  %v3826_v59 = vrot.slane %v3824_v37, 7  ;;  %v3882_v58 = vld [vmem:[#allocation2 + $0x178] sm:$0x1]  ;;  %v4505_v32 = vshll.u32 %v4486_v19, 16 }
 0x443   : > { %7826 = vmatprep.subr.bf16.mxu0 %v8393_v48  ;;  %v4049_v48 = vshrl.u32 %v3962_v54, 16  ;;  %v3935_v26 = vshll.u32 %v3882_v58, 16  ;;  %v10065_v47 = vor.u32 %v3932_v17, %v3828_v6  ;;  %v4877_v6 = vshrl.u32 %v4850_v27, 16 }
 0x444   : > { %v10052_v44 = vor.u32 %v3925_v3, %v3816_v1  ;;  %v3834_v43 = vsel %vm1536_vm2, %v3826_v59, %v10039_v36  ;;  %v4507_v0 = vrot.slane %v4505_v32, 1  ;;  %v4489_v3 = vld [vmem:[#allocation2 + $0x100] sm:$0x1] }
 0x445   : > { %v3937_v40 = vrot.slane %v3935_v26, 1  ;;  %v10077_v59 = vld [vmem:[%s11075_s11] sm:$0x3]  ;;  %v4879_v58 = vrot.slane %v4877_v6, 7 }
 0x446   : > { %7827 = vmatpush3.bf16.msra.mxu0 %v8394_v41  ;;  %v4051_v41 = vrot.slane %v4049_v48, 7  ;;  %v3931_v1 = vsel %vm1778_vm12, %v10052_v44, %v3930_v10 }
 0x447   : > { %8111 = vmatprep.subr.bf16.mxu0 %v10017_v15 }
 0x448   : > { %4462 = vmatmul.mubr.bf16.gmra.mrb[108].mxu1 %v3810_v35  ;;  %v4059_v8 = vsel %vm1536_vm2, %v4051_v41, %v10056_v7  ;;  %v4510_v35 = vshll.u32 %v4487_v61, 16 }
 0x449   : > { %4261 = vmatmul.mubr.bf16.gmra.mrb[128].mxu0 %v3917_v60  ;;  %4469 = vmatprep.mubr.bf16.mxu1 %v9967_v46  ;;  %v4503_v60 = vshrl.u32 %v4486_v19, 16  ;;  %v3938_v19 = vsel %vm1778_vm12, %v10065_v47, %v3937_v40 }
 0x44a   : > { %4268 = vmatprep.mubr.bf16.mxu0 %v4035_v50  ;;  %v4512_v16 = vrot.slane %v4510_v35, 1 }
 0x44b   : > { %v4508_v38 = vor.u32 %v4507_v0, %v4503_v60  ;;  %v4887_v60 = vsel %vm1536_vm2, %v4879_v58, %v9900_v13 }
 0x44d   : > { %v4513_v10 = vsel %vm1778_vm12, %v4508_v38, %v4512_v16 }
 0x450   : > { %4470 = vmatmul.mubr.bf16.gmra.mrb[112].mxu1 %v3822_v4 }
 0x451   : > { %4269 = vmatmul.mubr.bf16.gmra.mrb[132].mxu0 %v3924_v51  ;;  %4477 = vmatprep.mubr.bf16.mxu1 %v10008_v30 }
 0x452   : > { %4276 = vmatprep.mubr.bf16.mxu0 %v4047_v29  ;;  %v4875_v29 = vsel %vm1536_vm2, %v4867_v28, %v9861_v34  ;;  %v4522_v34 = vshll.u32 %v4489_v3, 16 }
 0x454   : > { %v4524_v26 = vrot.slane %v4522_v34, 1 }
 0x458   : > { %4478 = vmatmul.mubr.bf16.gmra.mrb[116].mxu1 %v3834_v43  ;;  %v4852_v43 = vld [vmem:[#allocation2 + $0x120] sm:$0x80] }
 0x459   : > { %4277 = vmatmul.mubr.bf16.gmra.mrb[136].mxu0 %v3931_v1  ;;  %5128 = vmatprep.mubr.bf16.mxu1 %v9812_v53 }
 0x45a   : > { %4284 = vmatprep.mubr.bf16.mxu0 %v4059_v8 }
 0x45b   : > { %v7489_v20 = vpop.f32.mrb[12].mxu1 }
 0x45c   : > { %v7419_v50 = vpop.f32.mrb[32].mxu0  ;;  %v7490_v2 = vpop.f32.mrb[13].mxu1 }
 0x45d   : > { %v7491_v9 = vadd.f32 %v7490_v2, %v7489_v20  ;;  %v7420_v42 = vpop.f32.mrb[33].mxu0  ;;  %v7492_v39 = vpop.f32.mrb[14].mxu1  ;;  %v8396_v2 = vld [vmem:[%s11072_s8 + $0x8] sm:$0xff]  }
 0x45e   : > { %v7421_v54 = vadd.f32 %v7420_v42, %v7419_v50  ;;  %v7422_v4 = vpop.f32.mrb[34].mxu0  ;;  %v7493_v37 = vpop.f32.mrb[15].mxu1  ;;  %v4889_v50 = vshrl.u32 %v4852_v43, 16  ;;  %v4525_v42 = vsel %vm1778_vm12, %v9938_v14, %v4524_v26 }
 0x45f   : > { %v7494_v51 = vadd.f32 %v7493_v37, %v7492_v39  ;;  %v7423_v18 = vpop.f32.mrb[35].mxu0 }
 0x460   : > { %v10070_v48 = vadd.f32 %v9629_v22, %v7421_v54  ;;  %v7424_v23 = vadd.f32 %v7423_v18, %v7422_v4  ;;  %5129 = vmatmul.mubr.bf16.vlgmr.msra.gmra.mrb[120].mxu1 %v4875_v29  ;;  %v10083_v22 = vsel %vm670_vm0, %v9997_v21, 0  ;;  %v4891_v16 = vrot.slane %v4889_v50, 7  ;;  %v4854_v4 = vld [vmem:[#allocation2 + $0x138] sm:$0x80]  ;;  %v4495_v50 = vld [vmem:[#allocation2 + $0x148] sm:$0x1] }
 0x461   : > { %4285 = vmatmul.mubr.bf16.gmra.mrb[140].mxu0 %v3938_v19  ;;  %5136 = vmatprep.mubr.bf16.mxu1 %v9849_v45  ;;  %v4901_v34 = vshrl.u32 %v4854_v4, 16 }
 0x462   : > { %v10086_v55 = vadd.f32 %v9642_v57, %v7424_v23  ;;  %4766 = vmatprep.mubr.bf16.mxu0 %v4513_v10  ;;  %8198 = vmatpush3.bf16.msra.mxu1 %v10083_v22  ;;  %v4491_v57 = vld [vmem:[#allocation2 + $0x118] sm:$0x1]  ;;  %v4899_v10 = vsel %vm1536_vm2, %v4891_v16, %v9943_v25 }
 0x463   : > { %v7495_v41 = vpop.f32.mrb[16].mxu1  ;;  %8204 = vmatprep.subr.msk.bf16.mxu1 %vm670_vm0, %v10077_v59  ;;  %v4534_v39 = vshll.u32 %v4491_v57, 16 }
 0x464   : > { %v7425_v32 = vpop.f32.mrb[36].mxu0  ;;  %v7496_v61 = vpop.f32.mrb[17].mxu1 }
 0x465   : > { %v7497_v33 = vadd.f32 %v7496_v61, %v7495_v41  ;;  %v7426_v17 = vpop.f32.mrb[37].mxu0  ;;  %v7498_v1 = vpop.f32.mrb[18].mxu1  ;;  %v4536_v14 = vrot.slane %v4534_v39, 1  ;;  %v8398_v41 = vld [vmem:[%s11072_s8 + $0x18] sm:$0xff]  }
 0x466   : > { %v7427_v8 = vadd.f32 %v7426_v17, %v7425_v32  ;;  %v7428_v0 = vpop.f32.mrb[38].mxu0  ;;  %v7499_v35 = vpop.f32.mrb[19].mxu1 }
 0x467   : > { %v7500_v20 = vadd.f32 %v7499_v35, %v7498_v1  ;;  %v7429_v28 = vpop.f32.mrb[39].mxu0  ;;  %v4537_v61 = vsel %vm1778_vm12, %v9981_v52, %v4536_v14  ;;  %v4903_v1 = vrot.slane %v4901_v34, 7 }
 0x468   : > { %v10096_v40 = vadd.f32 %v7491_v9, %v7427_v8  ;;  %v7430_v27 = vadd.f32 %v7429_v28, %v7428_v0  ;;  %5137 = vmatmul.mubr.bf16.gmra.mrb[124].mxu1 %v4887_v60  ;;  %v8397_v9 = vld [vmem:[%s11072_s8 + $0x10] sm:$0xff]  }
 0x469   : > { %4767 = vmatmul.mubr.bf16.vlgmr.msra.gmra.mrb[144].mxu0 %v9668_v56  ;;  %5144 = vmatprep.mubr.bf16.mxu1 %v9888_v24 }
 0x46a   : > { %v10102_v38 = vadd.f32 %v7494_v51, %v7430_v27  ;;  %8112 = vmatpush3.bf16.msra.mxu0 %v10017_v15  ;;  %4774 = vmatprep.mubr.bf16.mxu0 %v4525_v42  ;;  %v4493_v15 = vld [vmem:[#allocation2 + $0x130] sm:$0x1]  ;;  %v4911_v42 = vsel %vm1536_vm2, %v4903_v1, %v9983_v31 }
 0x46b   : > { %v7501_v13 = vpop.f32.mrb[20].mxu1  ;;  %8113 = vmatprep.subr.bf16.mxu0 %v8396_v2  ;;  %v4546_v43 = vshll.u32 %v4493_v15, 16 }
 0x46c   : > { %v7431_v54 = vpop.f32.mrb[40].mxu0  ;;  %v7502_v56 = vpop.f32.mrb[21].mxu1 }
 0x46d   : > { %v7503_v37 = vadd.f32 %v7502_v56, %v7501_v13  ;;  %v7432_v3 = vpop.f32.mrb[41].mxu0  ;;  %v7504_v18 = vpop.f32.mrb[22].mxu1  ;;  %v4548_v28 = vrot.slane %v4546_v43, 1  ;;  %v8400_v13 = vld [vmem:[%s11072_s8 + $0x28] sm:$0xff]   ;;  %v4558_v56 = vshll.u32 %v4495_v50, 16  ;;  %v8402_v43 = vld [vmem:[%s11072_s8 + $0x38] sm:$0xff]  }
 0x46e   : > { %v7433_v29 = vadd.f32 %v7432_v3, %v7431_v54  ;;  %v7434_v51 = vpop.f32.mrb[42].mxu0  ;;  %v7505_v6 = vpop.f32.mrb[23].mxu1  ;;  %8114 = vmatpush3.bf16.msra.mxu0 %v8396_v2 }
 0x46f   : > { %v7506_v23 = vadd.f32 %v7505_v6, %v7504_v18  ;;  %v7435_v19 = vpop.f32.mrb[43].mxu0  ;;  %8115 = vmatprep.subr.bf16.mxu0 %v8397_v9  ;;  %v4549_v54 = vsel %vm1778_vm12, %v10021_v5, %v4548_v28  ;;  %v4560_v15 = vrot.slane %v4558_v56, 1 }
 0x470   : > { %v10113_v58 = vadd.f32 %v7497_v33, %v7433_v29  ;;  %v7436_v32 = vadd.f32 %v7435_v19, %v7434_v51  ;;  %5145 = vmatmul.mubr.bf16.gmra.mrb[128].mxu1 %v4899_v10  ;;  %v8399_v33 = vld [vmem:[%s11072_s8 + $0x20] sm:$0xff]  }
 0x471   : > { %4775 = vmatmul.mubr.bf16.gmra.mrb[148].mxu0 %v9812_v53  ;;  %5152 = vmatprep.mubr.bf16.mxu1 %v9924_v63  ;;  %v4856_v53 = vld [vmem:[#allocation2 + $0x150] sm:$0x80]  ;;  %v4497_v10 = vld [vmem:[#allocation2 + $0x160] sm:$0x1] }
 0x472   : > { %v10119_v17 = vadd.f32 %v7500_v20, %v7436_v32  ;;  %4782 = vmatprep.mubr.bf16.mxu0 %v4537_v61  ;;  %8116 = vmatpush3.bf16.msra.mxu0 %v8397_v9  ;;  %v4913_v39 = vshrl.u32 %v4856_v53, 16 }
 0x473   : > { %v7507_v25 = vpop.f32.mrb[24].mxu1  ;;  %8117 = vmatprep.subr.bf16.mxu0 %v8398_v41 }
 0x474   : > { %v7437_v26 = vpop.f32.mrb[44].mxu0  ;;  %v7508_v8 = vpop.f32.mrb[25].mxu1  ;;  %v4915_v3 = vrot.slane %v4913_v39, 7 }
 0x475   : > { %v7509_v0 = vadd.f32 %v7508_v8, %v7507_v25  ;;  %v7438_v35 = vpop.f32.mrb[45].mxu0  ;;  %v7510_v57 = vpop.f32.mrb[26].mxu1 }
 0x476   : > { %v7439_v52 = vadd.f32 %v7438_v35, %v7437_v26  ;;  %v7440_v60 = vpop.f32.mrb[46].mxu0  ;;  %v7511_v20 = vpop.f32.mrb[27].mxu1  ;;  %8118 = vmatpush3.bf16.msra.mxu0 %v8398_v41  ;;  %v4923_v32 = vsel %vm1536_vm2, %v4915_v3, %v10023_v49  ;;  %v4570_v26 = vshll.u32 %v4497_v10, 16 }
 0x477   : > { %v7512_v2 = vadd.f32 %v7511_v20, %v7510_v57  ;;  %v7441_v27 = vpop.f32.mrb[47].mxu0  ;;  %8119 = vmatprep.subr.bf16.mxu0 %v8399_v33  ;;  %v4860_v57 = vld [vmem:[#allocation2 + $0x180] sm:$0x80]  ;;  %v4499_v20 = vld [vmem:[#allocation2 + $0x178] sm:$0x1] }
 0x478   : > { %v10129_v16 = vadd.f32 %v7503_v37, %v7439_v52  ;;  %v7442_v9 = vadd.f32 %v7441_v27, %v7440_v60  ;;  %5153 = vmatmul.mubr.bf16.gmra.mrb[132].mxu1 %v4911_v42  ;;  %v8401_v37 = vld [vmem:[%s11072_s8 + $0x30] sm:$0xff]   ;;  %v4582_v56 = vshll.u32 %v4499_v20, 16 }
 0x479   : > { %4783 = vmatmul.mubr.bf16.gmra.mrb[152].mxu0 %v9849_v45  ;;  %5160 = vmatprep.mubr.bf16.mxu1 %v9967_v46  ;;  %v4858_v45 = vld [vmem:[#allocation2 + $0x168] sm:$0x80] }
 0x47a   : > { %v10135_v4 = vadd.f32 %v7506_v23, %v7442_v9  ;;  %4790 = vmatprep.mubr.bf16.mxu0 %v4549_v54  ;;  %8120 = vmatpush3.bf16.msra.mxu0 %v8399_v33  ;;  %v4925_v61 = vshrl.u32 %v4858_v45, 16  ;;  %v4561_v33 = vsel %vm1778_vm12, %v10037_v11, %v4560_v15  ;;  %v4501_v15 = vld [vmem:[#allocation2 + $0x190] sm:$0x1] }
 0x47b   : > { %v7513_v31 = vpop.f32.mrb[28].mxu1  ;;  %8121 = vmatprep.subr.bf16.mxu0 %v8400_v13 }
 0x47c   : > { %v7443_v18 = vpop.f32.mrb[48].mxu0  ;;  %v7514_v14 = vpop.f32.mrb[29].mxu1  ;;  %v4927_v53 = vrot.slane %v4925_v61, 7 }
 0x47d   : > { %v7515_v29 = vadd.f32 %v7514_v14, %v7513_v31  ;;  %v7444_v51 = vpop.f32.mrb[49].mxu0  ;;  %v7516_v6 = vpop.f32.mrb[30].mxu1  ;;  %v10160_v31 = vld [vmem:[#allocation2 + $0x188] sm:$0xff]  ;;  %v4862_v14 = vld [vmem:[#allocation2 + $0x198] sm:$0x80] }
 0x47e   : > { %v7445_v5 = vadd.f32 %v7444_v51, %v7443_v18  ;;  %v7446_v19 = vpop.f32.mrb[50].mxu0  ;;  %v7517_v23 = vpop.f32.mrb[31].mxu1  ;;  %8122 = vmatpush3.bf16.msra.mxu0 %v8400_v13  ;;  %v4935_v39 = vsel %vm1536_vm2, %v4927_v53, %v10039_v36  ;;  %v4937_v13 = vshrl.u32 %v4860_v57, 16  ;;  %v4594_v53 = vshll.u32 %v4501_v15, 16 }
 0x47f   : > { %v7518_v34 = vadd.f32 %v7517_v23, %v7516_v6  ;;  %v7447_v41 = vpop.f32.mrb[51].mxu0  ;;  %8123 = vmatprep.subr.bf16.mxu0 %v8401_v37 }
 0x480   : > { %v10145_v25 = vadd.f32 %v7509_v0, %v7445_v5  ;;  %v7448_v1 = vadd.f32 %v7447_v41, %v7446_v19  ;;  %5161 = vmatmul.mubr.bf16.gmra.mrb[136].mxu1 %v4923_v32  ;;  %v4949_v41 = vshrl.u32 %v4862_v14, 16  ;;  %v4596_v20 = vrot.slane %v4594_v53, 1 }
 0x481   : > { %4791 = vmatmul.mubr.bf16.gmra.mrb[156].mxu0 %v9888_v24  ;;  %5168 = vmatprep.mubr.bf16.mxu1 %v10008_v30  ;;  %v4572_v24 = vrot.slane %v4570_v26, 1 }
 0x482   : > { %v10151_v8 = vadd.f32 %v7512_v2, %v7448_v1  ;;  %4798 = vmatprep.mubr.bf16.mxu0 %v4561_v33  ;;  %8124 = vmatpush3.bf16.msra.mxu0 %v8401_v37  ;;  %v10165_v37 = vld [vmem:[#allocation2 + $0x8] sm:$0xff]  ;;  %v4951_v57 = vrot.slane %v4949_v41, 7 }
 0x483   : > { %v7519_v49 = vpop.f32.mrb[32].mxu1  ;;  %8125 = vmatprep.subr.bf16.mxu0 %v8402_v43  ;;  %v4573_v3 = vsel %vm1778_vm12, %v10052_v44, %v4572_v24  ;;  %v4953_v36 = vshrl.u32 %v10165_v37, 16  ;;  %v4956_v10 = vshll.u32 %v10165_v37, 16 }
 0x484   : > { %v7449_v35 = vpop.f32.mrb[52].mxu0  ;;  %v7520_v0 = vpop.f32.mrb[33].mxu1 }
 0x485   : > { %v7521_v28 = vadd.f32 %v7520_v0, %v7519_v49  ;;  %v7450_v52 = vpop.f32.mrb[53].mxu0  ;;  %v7522_v60 = vpop.f32.mrb[34].mxu1  ;;  %v4955_v44 = vrot.slane %v4953_v36, 7 }
 0x486   : > { %v7451_v50 = vadd.f32 %v7450_v52, %v7449_v35  ;;  %v7452_v27 = vpop.f32.mrb[54].mxu0  ;;  %v7523_v42 = vpop.f32.mrb[35].mxu1  ;;  %8126 = vmatpush3.bf16.msra.mxu0 %v8402_v43 }
 0x487   : > { %v7524_v11 = vadd.f32 %v7523_v42, %v7522_v60  ;;  %v7453_v2 = vpop.f32.mrb[55].mxu0  ;;  %8201 = vmatprep.subr.msk.bf16.mxu0 %vm670_vm0, %v9997_v21  ;;  %v4958_v0 = vor.u32 %v4956_v10, %v4955_v44 }
 0x488   : > { %v10157_v9 = vadd.f32 %v7515_v29, %v7451_v50  ;;  %v7454_v54 = vadd.f32 %v7453_v2, %v7452_v27  ;;  %5169 = vmatmul.mubr.bf16.gmra.mrb[140].mxu1 %v4935_v39  ;;  %v4939_v29 = vrot.slane %v4937_v13, 7  ;;  %v8405_v2 = vld [vmem:[%s8588_s27 + $0x50] sm:$0xff]  }
 0x489   : > { %4799 = vmatmul.mubr.bf16.gmra.mrb[160].mxu0 %v9924_v63  ;;  %5176 = vmatprep.mubr.bf16.mxu1 %v10160_v31  ;;  %v4584_v63 = vrot.slane %v4582_v56, 1  ;;  %v5210_v56 = vld [vmem:[#allocation2 + $0x100] sm:$0x1] }
 0x48a   : > { %v10168_v18 = vadd.f32 %v7518_v34, %v7454_v54  ;;  %4806 = vmatprep.mubr.bf16.mxu0 %v4573_v3  ;;  %v4947_v33 = vsel %vm1536_vm2, %v4939_v29, %v10056_v7  ;;  %v5209_v7 = vld [vmem:[#allocation2 + $0xf8] sm:$0xff]  ;;  %v4597_v29 = vsel %vm1778_vm12, %v9594_v62, %v4596_v20  ;;  %v6348_v20 = vsel %vm670_vm0, %v10077_v59, 0 }
 0x48b   : > { %v7525_v45 = vpop.f32.mrb[36].mxu1  ;;  %v4585_v35 = vsel %vm1778_vm12, %v10065_v47, %v4584_v63  ;;  %v5228_v42 = vshll.u32 %v5209_v7, 16  ;;  %v4959_v47 = vsel %vm1536_vm2, %v4951_v57, %v4958_v0  ;;  %v5211_v63 = vld [vmem:[#allocation2 + $0x110] sm:$0xff]  ;;  %v8407_v0 = vld [vmem:[%s8588_s27 + $0x60] sm:$0xff]  }
 0x48c   : > { %v7455_v51 = vpop.f32.mrb[56].mxu0  ;;  %v7526_v6 = vpop.f32.mrb[37].mxu1  ;;  %v5238_v59 = vshrl.u32 %v5211_v63, 16 }
 0x48d   : > { %v7527_v5 = vadd.f32 %v7526_v6, %v7525_v45  ;;  %v7456_v19 = vpop.f32.mrb[57].mxu0  ;;  %v7528_v23 = vpop.f32.mrb[38].mxu1  ;;  %v5233_v6 = vshll.u32 %v5210_v56, 16 }
 0x48e   : > { %v7457_v32 = vadd.f32 %v7456_v19, %v7455_v51  ;;  %v7458_v34 = vpop.f32.mrb[58].mxu0  ;;  %v7529_v61 = vpop.f32.mrb[39].mxu1  ;;  %v5230_v51 = vrot.slane %v5228_v42, 1  ;;  %v5213_v19 = vld [vmem:[#allocation2 + $0x128] sm:$0xff] }
 0x48f   : > { %v7530_v43 = vadd.f32 %v7529_v61, %v7528_v23  ;;  %v7459_v1 = vpop.f32.mrb[59].mxu0  ;;  %v5226_v23 = vshrl.u32 %v5209_v7, 16  ;;  %v5235_v53 = vrot.slane %v5233_v6, 1 }
 0x490   : > { %v10175_v26 = vadd.f32 %v7521_v28, %v7457_v32  ;;  %v7460_v49 = vadd.f32 %v7459_v1, %v7458_v34  ;;  %5177 = vmatmul.mubr.bf16.gmra.mrb[144].mxu1 %v4947_v33  ;;  %v5212_v32 = vld [vmem:[#allocation2 + $0x118] sm:$0x1]  ;;  %v5240_v34 = vshll.u32 %v5211_v63, 16 }
 0x491   : > { %4807 = vmatmul.mubr.bf16.gmra.mrb[164].mxu0 %v9967_v46  ;;  %5184 = vmatprep.mubr.bf16.mxu1 %v10165_v37 }
 0x492   : > { %v10183_v52 = vadd.f32 %v7524_v11, %v7460_v49  ;;  %4814 = vmatprep.mubr.bf16.mxu0 %v4585_v35  ;;  %v5231_v49 = vor.u32 %v5230_v51, %v5226_v23  ;;  %v5252_v35 = vshll.u32 %v5213_v19, 16  ;;  %v5242_v42 = vrot.slane %v5240_v34, 1 }
 0x493   : > { %v7611_v28 = vpop.f32.mrb[40].mxu1 }
 0x494   : > { %v7461_v60 = vpop.f32.mrb[60].mxu0  ;;  %v7612_v24 = vpop.f32.mrb[41].mxu1 }
 0x495   : > { %v7613_v50 = vadd.f32 %v7612_v24, %v7611_v28  ;;  %v7462_v46 = vpop.f32.mrb[61].mxu0  ;;  %v7614_v27 = vpop.f32.mrb[42].mxu1 }
 0x496   : > { %v7463_v39 = vadd.f32 %v7462_v46, %v7461_v60  ;;  %v7464_v13 = vpop.f32.mrb[62].mxu0  ;;  %v7615_v54 = vpop.f32.mrb[43].mxu1  ;;  %v5214_v60 = vld [vmem:[#allocation2 + $0x130] sm:$0x1] }
 0x497   : > { %v7616_v3 = vadd.f32 %v7615_v54, %v7614_v27  ;;  %v7465_v11 = vpop.f32.mrb[63].mxu0  ;;  %v5215_v54 = vld [vmem:[#allocation2 + $0x140] sm:$0xff] }
 0x498   : > { %v10187_v14 = vadd.f32 %v7527_v5, %v7463_v39  ;;  %v7466_v45 = vadd.f32 %v7465_v11, %v7464_v13  ;;  %5185 = vmatmul.mubr.bf16.gmra.mrb[148].mxu1 %v4959_v47  ;;  %v5245_v47 = vshll.u32 %v5212_v32, 16  ;;  %v5254_v39 = vrot.slane %v5252_v35, 1  ;;  %v5218_v35 = vld [vmem:[#allocation2 + $0x160] sm:$0x1] }
 0x499   : > { %4815 = vmatmul.mubr.bf16.gmra.mrb[168].mxu0 %v10008_v30  ;;  %8149 = vmatprep.mubr.msk.bf16.mxu1 %vm3537_vm13, %v8405_v2  ;;  %v8406_v30 = vld [vmem:[%s8588_s27 + $0x58] sm:$0xff]   ;;  %v5236_v2 = vsel %vm1778_vm12, %v5231_v49, %v5235_v53  ;;  %v5257_v13 = vshll.u32 %v5214_v60, 16 }
 0x49a   : > { %v10193_v15 = vadd.f32 %v7530_v43, %v7466_v45  ;;  %4822 = vmatprep.mubr.bf16.mxu0 %v4597_v29  ;;  %v5250_v29 = vshrl.u32 %v5213_v19, 16  ;;  %v5247_v23 = vrot.slane %v5245_v47, 1 }
 0x49b   : > { %v7617_v5 = vpop.f32.mrb[44].mxu1 }
 0x49c   : > { %v7547_v44 = vpop.f32.mrb[64].mxu0  ;;  %v7618_v41 = vpop.f32.mrb[45].mxu1 }
 0x49d   : > { %v10196_v61 = vadd.f32 %v7618_v41, %v7617_v5  ;;  %v7548_v1 = vpop.f32.mrb[65].mxu0  ;;  %v7620_v33 = vpop.f32.mrb[46].mxu1  ;;  %v5243_v5 = vor.u32 %v5242_v42, %v5238_v59  ;;  %v8408_v41 = vld [vmem:[%s8588_s27 + $0x68] sm:$0xff]   ;;  %v5219_v42 = vld [vmem:[#allocation2 + $0x170] sm:$0xff] }
 0x49e   : > { %v7549_v43 = vadd.f32 %v7548_v1, %v7547_v44  ;;  %v7550_v57 = vpop.f32.mrb[66].mxu0  ;;  %v7621_v28 = vpop.f32.mrb[47].mxu1  ;;  %v5264_v44 = vshll.u32 %v5215_v54, 16  ;;  %v5259_v1 = vrot.slane %v5257_v13, 1 }
 0x49f   : > { %v10199_v24 = vadd.f32 %v7621_v28, %v7620_v33  ;;  %v7551_v7 = vpop.f32.mrb[67].mxu0  ;;  %v8409_v33 = vld [vmem:[%s8588_s27 + $0x70] sm:$0xff]  }
 0x4a0   : > { %v2728_v46 = vadd.f32 %v7549_v43, %v10070_v48  ;;  %v7552_v27 = vadd.f32 %v7551_v7, %v7550_v57  ;;  %8150 = vmatmul.mubr.msk.bf16.vlgmr.msra.gmra.mrb[152].mxu1 %vm3537_vm13, %v8406_v30  ;;  %v5217_v48 = vld [vmem:[#allocation2 + $0x158] sm:$0xff]  ;;  %v5255_v30 = vor.u32 %v5254_v39, %v5250_v29  ;;  %v5266_v7 = vrot.slane %v5264_v44, 1 }
 0x4a1   : > { %4823 = vmatmul.mubr.bf16.gmra.mrb[172].mxu0 %v10160_v31  ;;  %8153 = vmatprep.mubr.msk.bf16.mxu1 %vm3537_vm13, %v8407_v0  ;;  %v5216_v31 = vld [vmem:[#allocation2 + $0x148] sm:$0x1]  ;;  %v5274_v13 = vshrl.u32 %v5217_v48, 16 }
 0x4a2   : > { %v2729_v56 = vadd.f32 %v7552_v27, %v10086_v55  ;;  %8127 = vmatprep.mubr.bf16.mxu0 %v5236_v2  ;;  %8180 = vmatpush3.bf16.msra.mxu1 %v6348_v20  ;;  %v10209_v11 = vadd.f32 %v7613_v50, %v2728_v46  ;;  %v5276_v50 = vshll.u32 %v5217_v48, 16  ;;  %v5269_v57 = vshll.u32 %v5216_v31, 16 }
 0x4a3   : > { %v7623_v45 = vpop.f32.mrb[48].mxu1  ;;  %v5260_v20 = vsel %vm1778_vm12, %v5255_v30, %v5259_v1  ;;  %v5281_v27 = vshll.u32 %v5218_v35, 16  ;;  %v5222_v30 = vld [vmem:[#allocation2 + $0x190] sm:$0x1] }
 0x4a4   : > { %v7553_v51 = vpop.f32.mrb[68].mxu0  ;;  %v7624_v6 = vpop.f32.mrb[49].mxu1  ;;  %v10212_v32 = vadd.f32 %v7616_v3, %v2729_v56  ;;  %v5248_v3 = vsel %vm1778_vm12, %v5243_v5, %v5247_v23  ;;  %v5278_v46 = vrot.slane %v5276_v50, 1  ;;  %v5220_v56 = vld [vmem:[#allocation2 + $0x178] sm:$0x1]  ;;  %v5271_v31 = vrot.slane %v5269_v57, 1 }
 0x4a5   : > { %v10214_v34 = vadd.f32 %v7624_v6, %v7623_v45  ;;  %v7554_v55 = vpop.f32.mrb[69].mxu0  ;;  %v7626_v63 = vpop.f32.mrb[50].mxu1  ;;  %v8410_v6 = vld [vmem:[%s8588_s27 + $0x78] sm:$0xff]   ;;  %v5283_v44 = vrot.slane %v5281_v27, 1  ;;  %v5293_v50 = vshll.u32 %v5220_v56, 16  ;;  %v5305_v35 = vshll.u32 %v5222_v30, 16 }
 0x4a6   : > { %v7555_v49 = vadd.f32 %v7554_v55, %v7553_v51  ;;  %v7556_v53 = vpop.f32.mrb[70].mxu0  ;;  %v7627_v19 = vpop.f32.mrb[51].mxu1  ;;  %v5288_v51 = vshll.u32 %v5219_v42, 16  ;;  %v5279_v23 = vor.u32 %v5278_v46, %v5274_v13  ;;  %v5286_v57 = vshrl.u32 %v5219_v42, 16  ;;  %v8418_v30 = vld [vmem:[%s8588_s27 + $0x58] sm:$0xff]  }
 0x4a7   : > { %v7628_v0 = vadd.f32 %v7627_v19, %v7626_v63  ;;  %v7557_v43 = vpop.f32.mrb[71].mxu0  ;;  %v5295_v46 = vrot.slane %v5293_v50, 1  ;;  %v5307_v56 = vrot.slane %v5305_v35, 1 }
 0x4a8   : > { %v2730_v28 = vadd.f32 %v7555_v49, %v10096_v40  ;;  %v7558_v60 = vadd.f32 %v7557_v43, %v7556_v53  ;;  %8154 = vmatmul.mubr.msk.bf16.gmra.mrb[156].mxu1 %vm3537_vm13, %v8408_v41  ;;  %v5262_v40 = vshrl.u32 %v5215_v54, 16  ;;  %v8412_v41 = vld [vmem:[%s8588_s27 + $0x40] sm:$0xff]   ;;  %v5290_v53 = vrot.slane %v5288_v51, 1 }
 0x4a9   : > { %8128 = vmatmul.mubr.bf16.vlgmr.msra.gmra.mrb[176].mxu0 %v5248_v3  ;;  %8157 = vmatprep.mubr.msk.bf16.mxu1 %vm3537_vm13, %v8409_v33  ;;  %v5284_v19 = vsel %vm1778_vm12, %v5279_v23, %v5283_v44 }
 0x4aa   : > { %v2731_v47 = vadd.f32 %v7558_v60, %v10102_v38  ;;  %8144 = vmatpush3.bf16.msra.mxu0 %v10083_v22  ;;  %8131 = vmatprep.mubr.bf16.mxu0 %v5260_v20  ;;  %v10225_v2 = vadd.f32 %v10196_v61, %v2730_v28  ;;  %v5267_v29 = vor.u32 %v5266_v7, %v5262_v40  ;;  %v5224_v60 = vld [vmem:[#allocation2 + $0x1a8] sm:$0x1] }
 0x4ab   : > { %v7629_v39 = vpop.f32.mrb[52].mxu1  ;;  %8203 = vmatprep.subr.msk.bf16.mxu0 %vm670_vm0, %v9997_v21  ;;  %v5291_v20 = vor.u32 %v5290_v53, %v5286_v57 }
 0x4ac   : > { %v7559_v59 = vpop.f32.mrb[72].mxu0  ;;  %v7630_v45 = vpop.f32.mrb[53].mxu1  ;;  %v10230_v38 = vadd.f32 %v10199_v24, %v2731_v47  ;;  %v5272_v24 = vsel %vm1778_vm12, %v5267_v29, %v5271_v31  ;;  %v8414_v47 = vld [vmem:[%s8588_s27 + $0x48] sm:$0xff]   ;;  %v5317_v29 = vshll.u32 %v5224_v60, 16 }
 0x4ad   : > { %v7631_v54 = vadd.f32 %v7630_v45, %v7629_v39  ;;  %v7560_v5 = vpop.f32.mrb[73].mxu0  ;;  %v7632_v61 = vpop.f32.mrb[54].mxu1 }
 0x4ae   : > { %v7561_v48 = vadd.f32 %v7560_v5, %v7559_v59  ;;  %v7562_v55 = vpop.f32.mrb[74].mxu0  ;;  %v7633_v63 = vpop.f32.mrb[55].mxu1  ;;  %v5296_v5 = vsel %vm1778_vm12, %v5291_v20, %v5295_v46 }
 0x4af   : > { %v7634_v21 = vadd.f32 %v7633_v63, %v7632_v61  ;;  %v7563_v1 = vpop.f32.mrb[75].mxu0  ;;  %v5308_v61 = vsel %vm1778_vm12, %v9594_v62, %v5307_v56 }
 0x4b0   : > { %v2732_v33 = vadd.f32 %v7561_v48, %v10113_v58  ;;  %v7564_v49 = vadd.f32 %v7563_v1, %v7562_v55  ;;  %8158 = vmatmul.mubr.msk.bf16.gmra.mrb[160].mxu1 %vm3537_vm13, %v8410_v6 }
 0x4b1   : > { %8132 = vmatmul.mubr.bf16.gmra.mrb[180].mxu0 %v5272_v24  ;;  %8181 = vmatprep.mubr.msk.bf16.mxu1 %vm3537_vm13, %v8412_v41 }
 0x4b2   : > { %v2733_v43 = vadd.f32 %v7564_v49, %v10119_v17  ;;  %8135 = vmatprep.mubr.bf16.mxu0 %v5284_v19  ;;  %v10241_v58 = vadd.f32 %v10214_v34, %v2732_v33  ;;  %v8416_v17 = vld [vmem:[%s8588_s27 + $0x50] sm:$0xff]   ;;  %v5314_v34 = vrot.slane %v4956_v10, 1  ;;  %v8420_v33 = vld [vmem:[%s8588_s27 + $0x60] sm:$0xff]  }
 0x4b3   : > { %v7635_v28 = vpop.f32.mrb[56].mxu1 }
 0x4b4   : > { %v7565_v3 = vpop.f32.mrb[76].mxu0  ;;  %v7636_v7 = vpop.f32.mrb[57].mxu1  ;;  %v10243_v27 = vadd.f32 %v7628_v0, %v2733_v43  ;;  %v5315_v23 = vor.u32 %v5314_v34, %v4953_v36  ;;  %v8403_v36 = vld [vmem:[%s8588_s27 + $0x40] sm:$0xff]  }
 0x4b5   : > { %v7637_v40 = vadd.f32 %v7636_v7, %v7635_v28  ;;  %v7566_v39 = vpop.f32.mrb[77].mxu0  ;;  %v7638_v13 = vpop.f32.mrb[58].mxu1 }
 0x4b6   : > { %v7567_v59 = vadd.f32 %v7566_v39, %v7565_v3  ;;  %v7568_v45 = vpop.f32.mrb[78].mxu0  ;;  %v7639_v42 = vpop.f32.mrb[59].mxu1  ;;  %v8424_v39 = vld [vmem:[%s8588_s27 + $0x70] sm:$0xff]  }
 0x4b7   : > { %v7640_v31 = vadd.f32 %v7639_v42, %v7638_v13  ;;  %v7569_v51 = vpop.f32.mrb[79].mxu0 }
 0x4b8   : > { %v2734_v6 = vadd.f32 %v7567_v59, %v10129_v16  ;;  %v7570_v0 = vadd.f32 %v7569_v51, %v7568_v45  ;;  %8182 = vmatmul.mubr.msk.bf16.vlgmr.msra.gmra.mrb[164].mxu1 %vm3537_vm13, %v8414_v47  ;;  %v5319_v16 = vrot.slane %v5317_v29, 1  ;;  %v8404_v47 = vld [vmem:[%s8588_s27 + $0x48] sm:$0xff]  }
 0x4b9   : > { %8136 = vmatmul.mubr.bf16.gmra.mrb[184].mxu0 %v5296_v5  ;;  %8185 = vmatprep.mubr.msk.bf16.mxu1 %vm3537_vm13, %v8416_v17 }
 0x4ba   : > { %v2735_v10 = vadd.f32 %v7570_v0, %v10135_v4  ;;  %8139 = vmatprep.mubr.bf16.mxu0 %v5308_v61  ;;  %v10258_v44 = vadd.f32 %v7631_v54, %v2734_v6  ;;  %v5320_v37 = vsel %vm1778_vm12, %v5315_v23, %v5319_v16  ;;  %v8426_v0 = vld [vmem:[%s8588_s27 + $0x78] sm:$0xff]   ;;  %v8413_v23 = vld [vmem:[%s8588_s27 + $0x8] sm:$0xff]  }
 0x4bb   : > { %v7641_v41 = vpop.f32.mrb[60].mxu1 }
 0x4bc   : > { %v7571_v48 = vpop.f32.mrb[80].mxu0  ;;  %v7642_v55 = vpop.f32.mrb[61].mxu1  ;;  %v10260_v63 = vadd.f32 %v7634_v21, %v2735_v10 }
 0x4bd   : > { %v7643_v1 = vadd.f32 %v7642_v55, %v7641_v41  ;;  %v7572_v62 = vpop.f32.mrb[81].mxu0  ;;  %v7644_v50 = vpop.f32.mrb[62].mxu1 }
 0x4be   : > { %v7573_v49 = vadd.f32 %v7572_v62, %v7571_v48  ;;  %v7574_v4 = vpop.f32.mrb[82].mxu0  ;;  %v7645_v24 = vpop.f32.mrb[63].mxu1  ;;  %v8415_v48 = vld [vmem:[%s8588_s27 + $0x10] sm:$0xff]  }
 0x4bf   : > { %v7646_v53 = vadd.f32 %v7645_v24, %v7644_v50  ;;  %v7575_v54 = vpop.f32.mrb[83].mxu0 }
 0x4c0   : > { %v2736_v19 = vadd.f32 %v7573_v49, %v10145_v25  ;;  %v7576_v35 = vadd.f32 %v7575_v54, %v7574_v4  ;;  %8186 = vmatmul.mubr.msk.bf16.gmra.mrb[168].mxu1 %vm3537_vm13, %v8418_v30  ;;  %v8422_v25 = vld [vmem:[%s8588_s27 + $0x68] sm:$0xff]  }
 0x4c1   : > { %8140 = vmatmul.mubr.bf16.gmra.mrb[188].mxu0 %v5320_v37  ;;  %8189 = vmatprep.mubr.msk.bf16.mxu1 %vm3537_vm13, %v8420_v33 }
 0x4c2   : > { %v2737_v21 = vadd.f32 %v7576_v35, %v10151_v8  ;;  %8145 = vmatprep.mubr.msk.bf16.mxu0 %vm3537_vm13, %v8403_v36  ;;  %v10271_v43 = vadd.f32 %v7637_v40, %v2736_v19  ;;  %v8411_v8 = vld [vmem:[%s8588_s27] sm:$0xff]  }
 0x4c3   : > { %v7647_v57 = vpop.f32.mrb[64].mxu1 }
 0x4c4   : > { %v7577_v28 = vpop.f32.mrb[84].mxu0  ;;  %v7648_v60 = vpop.f32.mrb[65].mxu1  ;;  %v10273_v3 = vadd.f32 %v7640_v31, %v2737_v21  ;;  %v8419_v21 = vld [vmem:[%s8588_s27 + $0x20] sm:$0xff]  }
 0x4c5   : > { %v7649_v7 = vadd.f32 %v7648_v60, %v7647_v57  ;;  %v7578_v20 = vpop.f32.mrb[85].mxu0  ;;  %v7650_v46 = vpop.f32.mrb[66].mxu1 }
 0x4c6   : > { %v7579_v13 = vadd.f32 %v7578_v20, %v7577_v28  ;;  %v7580_v56 = vpop.f32.mrb[86].mxu0  ;;  %v7651_v17 = vpop.f32.mrb[67].mxu1 }
 0x4c7   : > { %v7652_v59 = vadd.f32 %v7651_v17, %v7650_v46  ;;  %v7581_v45 = vpop.f32.mrb[87].mxu0 }
 0x4c8   : > { %v2738_v40 = vadd.f32 %v7579_v13, %v10157_v9  ;;  %v7582_v42 = vadd.f32 %v7581_v45, %v7580_v56  ;;  %8190 = vmatmul.mubr.msk.bf16.gmra.mrb[172].mxu1 %vm3537_vm13, %v8422_v25 }
 0x4c9   : > { %8146 = vmatmul.mubr.msk.bf16.vlgmr.msra.gmra.mrb[192].mxu0 %vm3537_vm13, %v8404_v47  ;;  %8193 = vmatprep.mubr.msk.bf16.mxu1 %vm3537_vm13, %v8424_v39 }
 0x4ca   : > { %v2739_v34 = vadd.f32 %v7582_v42, %v10168_v18  ;;  %v10284_v29 = vadd.f32 %v7643_v1, %v2738_v40  ;;  %8162 = vmatpush3.bf16.msra.mxu0 %v10083_v22  ;;  %8163 = vmatprep.mubr.msk.bf16.mxu0 %vm3537_vm13, %v8411_v8 }
 0x4cb   : > { %v7653_v31 = vpop.f32.mrb[68].mxu1 }
 0x4cc   : > { %v7583_v51 = vpop.f32.mrb[88].mxu0  ;;  %v7654_v9 = vpop.f32.mrb[69].mxu1  ;;  %v10288_v6 = vadd.f32 %v7646_v53, %v2739_v34  ;;  %v8417_v53 = vld [vmem:[%s8588_s27 + $0x18] sm:$0xff]  }
 0x4cd   : > { %v7655_v5 = vadd.f32 %v7654_v9, %v7653_v31  ;;  %v7584_v61 = vpop.f32.mrb[89].mxu0  ;;  %v7656_v10 = vpop.f32.mrb[70].mxu1  ;;  %v8421_v9 = vld [vmem:[%s8588_s27 + $0x28] sm:$0xff]  }
 0x4ce   : > { %v7585_v16 = vadd.f32 %v7584_v61, %v7583_v51  ;;  %v7586_v41 = vpop.f32.mrb[90].mxu0  ;;  %v7657_v18 = vpop.f32.mrb[71].mxu1 }
 0x4cf   : > { %v7658_v55 = vadd.f32 %v7657_v18, %v7656_v10  ;;  %v7587_v30 = vpop.f32.mrb[91].mxu0  ;;  %v8423_v10 = vld [vmem:[%s8588_s27 + $0x30] sm:$0xff]  }
 0x4d0   : > { %v2740_v22 = vadd.f32 %v7585_v16, %v10175_v26  ;;  %v7588_v1 = vadd.f32 %v7587_v30, %v7586_v41  ;;  %8194 = vmatmul.mubr.msk.bf16.gmra.mrb[176].mxu1 %vm3537_vm13, %v8426_v0 }
 0x4d1   : > { %8164 = vmatmul.mubr.msk.bf16.vlgmr.msra.gmra.mrb[196].mxu0 %vm3537_vm13, %v8413_v23 }
 0x4d2   : > { %v2741_v62 = vadd.f32 %v7588_v1, %v10183_v52  ;;  %v10297_v50 = vadd.f32 %v7649_v7, %v2740_v22  ;;  %8167 = vmatprep.mubr.msk.bf16.mxu0 %vm3537_vm13, %v8415_v48 }
 0x4d3   : > { %v8097_v33 = vpop.f32.mrb[72].mxu1 }
 0x4d4   : > { %v7589_v49 = vpop.f32.mrb[92].mxu0  ;;  %v3599_v4 = vpop.f32.mrb[73].mxu1  ;;  %v10300_v24 = vadd.f32 %v7652_v59, %v2741_v62  ;;  %v3686_v28 = vmul.f32 %v8097_v33, %v8097_v33 }
 0x4d5   : > { %v7590_v37 = vpop.f32.mrb[93].mxu0  ;;  %v3684_v36 = vmul.f32 %v3599_v4, %v3599_v4  ;;  %v8098_v26 = vpop.f32.mrb[74].mxu1 }
 0x4d6   : > { %v7591_v54 = vadd.f32 %v7590_v37, %v7589_v49  ;;  %v7592_v19 = vpop.f32.mrb[94].mxu0  ;;  %v3602_v35 = vpop.f32.mrb[75].mxu1  ;;  %v3687_v20 = vmul.f32 %v8098_v26, %v8098_v26 }
 0x4d7   : > { %v7593_v57 = vpop.f32.mrb[95].mxu0  ;;  %v3662_v52 = vadd.f32 %v3602_v35, %v3599_v4  ;;  %v3685_v60 = vmul.f32 %v3602_v35, %v3602_v35 }
 0x4d8   : > { %v2742_v25 = vadd.f32 %v7591_v54, %v10187_v14  ;;  %v7594_v7 = vadd.f32 %v7593_v57, %v7592_v19 }
 0x4d9   : > { %v3663_v46 = vadd.f32 %v8097_v33, %v3662_v52  ;;  %v3700_v47 = vadd.f32 %v3685_v60, %v3684_v36  ;;  %8168 = vmatmul.mubr.msk.bf16.gmra.mrb[200].mxu0 %vm3537_vm13, %v8417_v53  ;;  %v8425_v53 = vld [vmem:[%s8588_s27 + $0x38] sm:$0xff]  }
 0x4da   : > { %v2743_v39 = vadd.f32 %v7594_v7, %v10193_v15  ;;  %v10307_v13 = vadd.f32 %v7655_v5, %v2742_v25  ;;  %8171 = vmatprep.mubr.msk.bf16.mxu0 %vm3537_vm13, %v8419_v21 }
 0x4db   : > { %v3701_v56 = vadd.f32 %v3700_v47, %v3686_v28  ;;  %v8101_v17 = vpop.f32.mrb[76].mxu1  ;;  %v3664_v8 = vadd.f32 %v8098_v26, %v3663_v46 }
 0x4dc   : > { %v8079_v59 = vpop.f32.mrb[96].mxu0  ;;  %v3615_v45 = vpop.f32.mrb[77].mxu1  ;;  %v10310_v14 = vadd.f32 %v7658_v55, %v2743_v39  ;;  %v3690_v48 = vmul.f32 %v8101_v17, %v8101_v17 }
 0x4dd   : > { %v10313_v40 = vadd.f32 %v8079_v59, %v10225_v2  ;;  %v3325_v42 = vpop.f32.mrb[97].mxu0  ;;  %v3665_v34 = vadd.f32 %v3664_v8, %v3615_v45  ;;  %v3688_v31 = vmul.f32 %v3615_v45, %v3615_v45  ;;  %v3702_v51 = vadd.f32 %v3701_v56, %v3687_v20  ;;  %v8102_v15 = vpop.f32.mrb[78].mxu1 }
 0x4de   : > { %v10317_v0 = vadd.f32 %v3325_v42, %v10209_v11  ;;  %v8080_v5 = vpop.f32.mrb[98].mxu0  ;;  %v3618_v61 = vpop.f32.mrb[79].mxu1  ;;  %v3691_v11 = vmul.f32 %v8102_v15, %v8102_v15 }
 0x4df   : > { %v10321_v23 = vadd.f32 %v8080_v5, %v10230_v38  ;;  %v3328_v16 = vpop.f32.mrb[99].mxu0  ;;  %v3703_v41 = vadd.f32 %v3702_v51, %v3688_v31  ;;  %v3666_v18 = vadd.f32 %v3665_v34, %v3618_v61  ;;  %v3689_v55 = vmul.f32 %v3618_v61, %v3618_v61 }
 0x4e0   : > { %v10324_v2 = vadd.f32 %v3328_v16, %v10212_v32 }
 0x4e1   : > { %v3667_v30 = vadd.f32 %v8101_v17, %v3666_v18  ;;  %8172 = vmatmul.mubr.msk.bf16.gmra.mrb[204].mxu0 %vm3537_vm13, %v8421_v9  ;;  %v3704_v22 = vadd.f32 %v3703_v41, %v3689_v55 }
 0x4e2   : > { %8175 = vmatprep.mubr.msk.bf16.mxu0 %vm3537_vm13, %v8423_v10 }
 0x4e3   : > { %v8105_v1 = vpop.f32.mrb[80].mxu1  ;;  %v3668_v62 = vadd.f32 %v8102_v15, %v3667_v30  ;;  %v3705_v33 = vadd.f32 %v3704_v22, %v3690_v48 }
 0x4e4   : > { %v8083_v38 = vpop.f32.mrb[100].mxu0  ;;  %v3631_v49 = vpop.f32.mrb[81].mxu1 }
 0x4e5   : > { %v10329_v4 = vadd.f32 %v8083_v38, %v10258_v44  ;;  %v3341_v32 = vpop.f32.mrb[101].mxu0  ;;  %v3669_v37 = vadd.f32 %v3668_v62, %v3631_v49  ;;  %v3692_v36 = vmul.f32 %v3631_v49, %v3631_v49  ;;  %v8106_v26 = vpop.f32.mrb[82].mxu1  ;;  %v3706_v35 = vadd.f32 %v3705_v33, %v3691_v11 }
 0x4e6   : > { %v10333_v54 = vadd.f32 %v3341_v32, %v10241_v58  ;;  %v8084_v19 = vpop.f32.mrb[102].mxu0  ;;  %v3634_v21 = vpop.f32.mrb[83].mxu1  ;;  %v3694_v44 = vmul.f32 %v8105_v1, %v8105_v1  ;;  %v3695_v46 = vmul.f32 %v8106_v26, %v8106_v26 }
 0x4e7   : > { %v10336_v57 = vadd.f32 %v8084_v19, %v10260_v63  ;;  %v3344_v28 = vpop.f32.mrb[103].mxu0  ;;  %v3670_v52 = vadd.f32 %v3669_v37, %v3634_v21  ;;  %v3707_v25 = vadd.f32 %v3706_v35, %v3692_v36  ;;  %v3693_v20 = vmul.f32 %v3634_v21, %v3634_v21 }
 0x4e8   : > { %v10339_v60 = vadd.f32 %v3344_v28, %v10243_v27 }
 0x4e9   : > { %v3671_v7 = vadd.f32 %v8105_v1, %v3670_v52  ;;  %8176 = vmatmul.mubr.msk.bf16.gmra.mrb[208].mxu0 %vm3537_vm13, %v8425_v53  ;;  %v3708_v58 = vadd.f32 %v3707_v25, %v3693_v20 }
 0x4eb   : > { %v8109_v47 = vpop.f32.mrb[84].mxu1  ;;  %v3672_v39 = vadd.f32 %v8106_v26, %v3671_v7  ;;  %v3709_v59 = vadd.f32 %v3708_v58, %v3694_v44 }
 0x4ec   : > { %v8087_v56 = vpop.f32.mrb[104].mxu0  ;;  %v3647_v17 = vpop.f32.mrb[85].mxu1 }
 0x4ed   : > { %v10343_v63 = vadd.f32 %v8087_v56, %v10284_v29  ;;  %v3357_v8 = vpop.f32.mrb[105].mxu0  ;;  %v3673_v45 = vadd.f32 %v3672_v39, %v3647_v17  ;;  %v3696_v27 = vmul.f32 %v3647_v17, %v3647_v17  ;;  %v8110_v42 = vpop.f32.mrb[86].mxu1  ;;  %v3710_v5 = vadd.f32 %v3709_v59, %v3695_v46 }
 0x4ee   : > { %v10346_v34 = vadd.f32 %v3357_v8, %v10271_v43  ;;  %v8088_v31 = vpop.f32.mrb[106].mxu0  ;;  %v3650_v51 = vpop.f32.mrb[87].mxu1  ;;  %v3698_v29 = vmul.f32 %v8109_v47, %v8109_v47  ;;  %v3699_v48 = vmul.f32 %v8110_v42, %v8110_v42 }
 0x4ef   : > { %v10349_v15 = vadd.f32 %v8088_v31, %v10288_v6  ;;  %v3360_v9 = vpop.f32.mrb[107].mxu0  ;;  %v3674_v61 = vadd.f32 %v3673_v45, %v3650_v51  ;;  %v3711_v16 = vadd.f32 %v3710_v5, %v3696_v27  ;;  %v3697_v18 = vmul.f32 %v3650_v51, %v3650_v51 }
 0x4f0   : > { %11096 = vst [vmem:[#allocation4_spill] sm:$0xff] %v10346_v34  ;;  %v10352_v10 = vadd.f32 %v3360_v9, %v10273_v3 }
 0x4f1   : > { %11097 = vst [vmem:[#allocation5_spill] sm:$0xff] %v10349_v15  ;;  %v3675_v41 = vadd.f32 %v8109_v47, %v3674_v61  ;;  %v3712_v43 = vadd.f32 %v3711_v16, %v3697_v18 }
 0x4f2   : > { %11098 = vst [vmem:[#allocation6_spill] sm:$0xff] %v10352_v10 }
 0x4f3   : > { %v10354_v55 = vadd.f32 %v8110_v42, %v3675_v41  ;;  %v7764_v30 = vpop.f32.mrb[88].mxu1  ;;  %v3713_v1 = vadd.f32 %v3712_v43, %v3698_v29 }
 0x4f4   : > { %v8091_v11 = vpop.f32.mrb[108].mxu0  ;;  %v7765_v22 = vpop.f32.mrb[89].mxu1 }
 0x4f5   : > { %v10357_v6 = vadd.f32 %v8091_v11, %v10307_v13  ;;  %v7766_v62 = vadd.f32 %v7765_v22, %v7764_v30  ;;  %v3373_v38 = vpop.f32.mrb[109].mxu0  ;;  %v7767_v33 = vpop.f32.mrb[90].mxu1  ;;  %v10362_v37 = vadd.f32 %v3713_v1, %v3699_v48 }
 0x4f6   : > { %v10360_v3 = vadd.f32 %v3373_v38, %v10297_v50  ;;  %v8092_v49 = vpop.f32.mrb[110].mxu0  ;;  %v7768_v32 = vpop.f32.mrb[91].mxu1 }
 0x4f7   : > { %11099 = vst [vmem:[#allocation7_spill] sm:$0xff] %v10357_v6  ;;  %v10365_v36 = vadd.f32 %v8092_v49, %v10310_v14  ;;  %v3376_v26 = vpop.f32.mrb[111].mxu0  ;;  %v7769_v53 = vadd.f32 %v7768_v32, %v7767_v33 }
 0x4f8   : > { %11100 = vst [vmem:[#allocation8_spill] sm:$0xff] %v10360_v3  ;;  %v10368_v19 = vadd.f32 %v3376_v26, %v10300_v24 }
 0x4f9   : > { %11101 = vst [vmem:[#allocation9_spill] sm:$0xff] %v10365_v36 }
 0x4fa   : > { %11102 = vst [vmem:[#allocation10_spill] sm:$0xff] %v10368_v19 }
 0x4fb   : > { %v7770_v13 = vpop.f32.mrb[92].mxu1 }
 0x4fc   : > { %v7700_v35 = vpop.f32.mrb[112].mxu0  ;;  %v7771_v21 = vpop.f32.mrb[93].mxu1 }
 0x4fd   : > { %v7701_v28 = vpop.f32.mrb[113].mxu0  ;;  %v7773_v52 = vpop.f32.mrb[94].mxu1  ;;  %v7772_v44 = vadd.f32 %v7771_v21, %v7770_v13 }
 0x4fe   : > { %v7702_v50 = vadd.f32 %v7701_v28, %v7700_v35  ;;  %v7703_v25 = vpop.f32.mrb[114].mxu0  ;;  %v7774_v7 = vpop.f32.mrb[95].mxu1 }
 0x4ff   : > { %v7704_v20 = vpop.f32.mrb[115].mxu0  ;;  %v7775_v58 = vadd.f32 %v7774_v7, %v7773_v52 }
 0x500   : > { %v10370_v46 = vadd.f32 %v7766_v62, %v7702_v50  ;;  %v7705_v14 = vadd.f32 %v7704_v20, %v7703_v25 }
 0x502   : > { %v10372_v47 = vadd.f32 %v7769_v53, %v7705_v14 }
 0x503   : > { %v7776_v39 = vpop.f32.mrb[96].mxu1 }
 0x504   : > { %v7706_v56 = vpop.f32.mrb[116].mxu0  ;;  %v7777_v24 = vpop.f32.mrb[97].mxu1 }
 0x505   : > { %v7778_v17 = vadd.f32 %v7777_v24, %v7776_v39  ;;  %v7707_v8 = vpop.f32.mrb[117].mxu0  ;;  %v7779_v59 = vpop.f32.mrb[98].mxu1 }
 0x506   : > { %v7708_v45 = vadd.f32 %v7707_v8, %v7706_v56  ;;  %v7709_v27 = vpop.f32.mrb[118].mxu0  ;;  %v7780_v42 = vpop.f32.mrb[99].mxu1 }
 0x507   : > { %v7781_v31 = vadd.f32 %v7780_v42, %v7779_v59  ;;  %v7710_v51 = vpop.f32.mrb[119].mxu0 }
 0x508   : > { %v10374_v9 = vadd.f32 %v7772_v44, %v7708_v45  ;;  %v7711_v5 = vadd.f32 %v7710_v51, %v7709_v27 }
 0x50a   : > { %v10376_v61 = vadd.f32 %v7775_v58, %v7711_v5 }
 0x50b   : > { %v7782_v29 = vpop.f32.mrb[100].mxu1 }
 0x50c   : > { %v7712_v16 = vpop.f32.mrb[120].mxu0  ;;  %v7783_v41 = vpop.f32.mrb[101].mxu1 }
 0x50d   : > { %v7784_v18 = vadd.f32 %v7783_v41, %v7782_v29  ;;  %v7713_v48 = vpop.f32.mrb[121].mxu0  ;;  %v7785_v43 = vpop.f32.mrb[102].mxu1 }
 0x50e   : > { %v7714_v30 = vadd.f32 %v7713_v48, %v7712_v16  ;;  %v7715_v11 = vpop.f32.mrb[122].mxu0  ;;  %v7786_v22 = vpop.f32.mrb[103].mxu1 }
 0x50f   : > { %v7787_v1 = vadd.f32 %v7786_v22, %v7785_v43  ;;  %v7716_v62 = vpop.f32.mrb[123].mxu0 }
 0x510   : > { %v10378_v38 = vadd.f32 %v7778_v17, %v7714_v30  ;;  %v7717_v33 = vadd.f32 %v7716_v62, %v7715_v11 }
 0x512   : > { %v10380_v49 = vadd.f32 %v7781_v31, %v7717_v33 }
 0x513   : > { %v7788_v32 = vpop.f32.mrb[104].mxu1 }
 0x514   : > { %v7718_v26 = vpop.f32.mrb[124].mxu0  ;;  %v7789_v53 = vpop.f32.mrb[105].mxu1 }
 0x515   : > { %v7790_v13 = vadd.f32 %v7789_v53, %v7788_v32  ;;  %v7719_v35 = vpop.f32.mrb[125].mxu0  ;;  %v7791_v21 = vpop.f32.mrb[106].mxu1 }
 0x516   : > { %v7720_v28 = vadd.f32 %v7719_v35, %v7718_v26  ;;  %v7721_v52 = vpop.f32.mrb[126].mxu0  ;;  %v7792_v44 = vpop.f32.mrb[107].mxu1 }
 0x517   : > { %v7793_v50 = vadd.f32 %v7792_v44, %v7791_v21  ;;  %v7722_v25 = vpop.f32.mrb[127].mxu0 }
 0x518   : > { %v10382_v7 = vadd.f32 %v7784_v18, %v7720_v28  ;;  %v7723_v20 = vadd.f32 %v7722_v25, %v7721_v52 }
 0x51a   : > { %v10384_v58 = vadd.f32 %v7787_v1, %v7723_v20 }
 0x51b   : > { %v7794_v14 = vpop.f32.mrb[108].mxu1 }
 0x51c   : > { %v7724_v39 = vpop.f32.mrb[128].mxu0  ;;  %v7795_v56 = vpop.f32.mrb[109].mxu1 }
 0x51d   : > { %v7796_v24 = vadd.f32 %v7795_v56, %v7794_v14  ;;  %v7725_v17 = vpop.f32.mrb[129].mxu0  ;;  %v7797_v8 = vpop.f32.mrb[110].mxu1 }
 0x51e   : > { %v7726_v59 = vadd.f32 %v7725_v17, %v7724_v39  ;;  %v7727_v45 = vpop.f32.mrb[130].mxu0  ;;  %v7798_v27 = vpop.f32.mrb[111].mxu1 }
 0x51f   : > { %v7799_v42 = vadd.f32 %v7798_v27, %v7797_v8  ;;  %v7728_v31 = vpop.f32.mrb[131].mxu0 }
 0x520   : > { %v10386_v51 = vadd.f32 %v7790_v13, %v7726_v59  ;;  %v7729_v5 = vadd.f32 %v7728_v31, %v7727_v45 }
 0x522   : > { %v10388_v29 = vadd.f32 %v7793_v50, %v7729_v5 }
 0x523   : > { %v7800_v16 = vpop.f32.mrb[112].mxu1 }
 0x524   : > { %v7730_v41 = vpop.f32.mrb[132].mxu0  ;;  %v7801_v18 = vpop.f32.mrb[113].mxu1 }
 0x525   : > { %v7802_v48 = vadd.f32 %v7801_v18, %v7800_v16  ;;  %v7731_v43 = vpop.f32.mrb[133].mxu0  ;;  %v7803_v30 = vpop.f32.mrb[114].mxu1 }
 0x526   : > { %v7732_v11 = vadd.f32 %v7731_v43, %v7730_v41  ;;  %v7733_v22 = vpop.f32.mrb[134].mxu0  ;;  %v7804_v1 = vpop.f32.mrb[115].mxu1 }
 0x527   : > { %v7805_v62 = vadd.f32 %v7804_v1, %v7803_v30  ;;  %v7734_v33 = vpop.f32.mrb[135].mxu0 }
 0x528   : > { %v10390_v32 = vadd.f32 %v7796_v24, %v7732_v11  ;;  %v7735_v26 = vadd.f32 %v7734_v33, %v7733_v22 }
 0x52a   : > { %v10392_v53 = vadd.f32 %v7799_v42, %v7735_v26 }
 0x52b   : > { %v7806_v13 = vpop.f32.mrb[116].mxu1 }
 0x52c   : > { %v7736_v35 = vpop.f32.mrb[136].mxu0  ;;  %v7807_v21 = vpop.f32.mrb[117].mxu1 }
 0x52d   : > { %v7808_v28 = vadd.f32 %v7807_v21, %v7806_v13  ;;  %v7737_v52 = vpop.f32.mrb[137].mxu0  ;;  %v7809_v44 = vpop.f32.mrb[118].mxu1 }
 0x52e   : > { %v7738_v50 = vadd.f32 %v7737_v52, %v7736_v35  ;;  %v7739_v25 = vpop.f32.mrb[138].mxu0  ;;  %v7810_v20 = vpop.f32.mrb[119].mxu1 }
 0x52f   : > { %v7811_v14 = vadd.f32 %v7810_v20, %v7809_v44  ;;  %v7740_v39 = vpop.f32.mrb[139].mxu0 }
 0x530   : > { %v10394_v56 = vadd.f32 %v7802_v48, %v7738_v50  ;;  %v7741_v17 = vadd.f32 %v7740_v39, %v7739_v25 }
 0x532   : > { %v10396_v8 = vadd.f32 %v7805_v62, %v7741_v17 }
 0x533   : > { %v7892_v24 = vpop.f32.mrb[120].mxu1 }
 0x534   : > { %v7742_v59 = vpop.f32.mrb[140].mxu0  ;;  %v7893_v45 = vpop.f32.mrb[121].mxu1 }
 0x535   : > { %v7894_v27 = vadd.f32 %v7893_v45, %v7892_v24  ;;  %v7743_v42 = vpop.f32.mrb[141].mxu0  ;;  %v7895_v31 = vpop.f32.mrb[122].mxu1 }
 0x536   : > { %v7744_v5 = vadd.f32 %v7743_v42, %v7742_v59  ;;  %v7745_v16 = vpop.f32.mrb[142].mxu0  ;;  %v7896_v41 = vpop.f32.mrb[123].mxu1 }
 0x537   : > { %v7897_v18 = vadd.f32 %v7896_v41, %v7895_v31  ;;  %v7746_v43 = vpop.f32.mrb[143].mxu0 }
 0x538   : > { %v10398_v30 = vadd.f32 %v7808_v28, %v7744_v5  ;;  %v7747_v11 = vadd.f32 %v7746_v43, %v7745_v16 }
 0x53a   : > { %v10400_v22 = vadd.f32 %v7811_v14, %v7747_v11 }
 0x53b   : > { %v7898_v48 = vpop.f32.mrb[124].mxu1 }
 0x53c   : > { %v7828_v1 = vpop.f32.mrb[144].mxu0  ;;  %v7899_v62 = vpop.f32.mrb[125].mxu1 }
 0x53d   : > { %v7900_v33 = vadd.f32 %v7899_v62, %v7898_v48  ;;  %v7829_v26 = vpop.f32.mrb[145].mxu0  ;;  %v7901_v13 = vpop.f32.mrb[126].mxu1 }
 0x53e   : > { %v7830_v35 = vadd.f32 %v7829_v26, %v7828_v1  ;;  %v7831_v21 = vpop.f32.mrb[146].mxu0  ;;  %v7902_v52 = vpop.f32.mrb[127].mxu1 }
 0x53f   : > { %v7903_v44 = vadd.f32 %v7902_v52, %v7901_v13  ;;  %v7832_v50 = vpop.f32.mrb[147].mxu0 }
 0x540   : > { %v4831_v25 = vadd.f32 %v7830_v35, %v10370_v46  ;;  %v7833_v20 = vadd.f32 %v7832_v50, %v7831_v21 }
 0x542   : > { %v4832_v28 = vadd.f32 %v7833_v20, %v10372_v47  ;;  %v10404_v39 = vadd.f32 %v7894_v27, %v4831_v25 }
 0x543   : > { %v7904_v14 = vpop.f32.mrb[128].mxu1 }
 0x544   : > { %v7834_v17 = vpop.f32.mrb[148].mxu0  ;;  %v7905_v24 = vpop.f32.mrb[129].mxu1  ;;  %v10406_v59 = vadd.f32 %v7897_v18, %v4832_v28 }
 0x545   : > { %v7906_v45 = vadd.f32 %v7905_v24, %v7904_v14  ;;  %v7835_v42 = vpop.f32.mrb[149].mxu0  ;;  %v7907_v31 = vpop.f32.mrb[130].mxu1 }
 0x546   : > { %v7836_v5 = vadd.f32 %v7835_v42, %v7834_v17  ;;  %v7837_v16 = vpop.f32.mrb[150].mxu0  ;;  %v7908_v41 = vpop.f32.mrb[131].mxu1 }
 0x547   : > { %v7909_v43 = vadd.f32 %v7908_v41, %v7907_v31  ;;  %v7838_v11 = vpop.f32.mrb[151].mxu0 }
 0x548   : > { %v4833_v46 = vadd.f32 %v7836_v5, %v10374_v9  ;;  %v7839_v48 = vadd.f32 %v7838_v11, %v7837_v16 }
 0x54a   : > { %v4834_v47 = vadd.f32 %v7839_v48, %v10376_v61  ;;  %v10410_v27 = vadd.f32 %v7900_v33, %v4833_v46  ;;  %v3443_v48 = vmul.f32 %v10324_v2, %v10324_v2 }
 0x54b   : > { %v7910_v1 = vpop.f32.mrb[132].mxu1 }
 0x54c   : > { %v7840_v62 = vpop.f32.mrb[152].mxu0  ;;  %v7911_v26 = vpop.f32.mrb[133].mxu1  ;;  %v10412_v18 = vadd.f32 %v7903_v44, %v4834_v47 }
 0x54d   : > { %v7912_v13 = vadd.f32 %v7911_v26, %v7910_v1  ;;  %v7841_v35 = vpop.f32.mrb[153].mxu0  ;;  %v7913_v21 = vpop.f32.mrb[134].mxu1  ;;  %v3442_v1 = vmul.f32 %v10317_v0, %v10317_v0 }
 0x54e   : > { %v7842_v52 = vadd.f32 %v7841_v35, %v7840_v62  ;;  %v7843_v50 = vpop.f32.mrb[154].mxu0  ;;  %v7914_v25 = vpop.f32.mrb[135].mxu1 }
 0x54f   : > { %v7915_v20 = vadd.f32 %v7914_v25, %v7913_v21  ;;  %v7844_v28 = vpop.f32.mrb[155].mxu0  ;;  %v3458_v35 = vadd.f32 %v3443_v48, %v3442_v1 }
 0x550   : > { %v4835_v9 = vadd.f32 %v7842_v52, %v10378_v38  ;;  %v7845_v14 = vadd.f32 %v7844_v28, %v7843_v50 }
 0x552   : > { %v4836_v61 = vadd.f32 %v7845_v14, %v10380_v49  ;;  %v10416_v33 = vadd.f32 %v7906_v45, %v4835_v9 }
 0x553   : > { %v7916_v17 = vpop.f32.mrb[136].mxu1 }
 0x554   : > { %v7846_v24 = vpop.f32.mrb[156].mxu0  ;;  %v7917_v42 = vpop.f32.mrb[137].mxu1  ;;  %v10418_v44 = vadd.f32 %v7909_v43, %v4836_v61  ;;  %v3420_v43 = vadd.f32 %v10324_v2, %v10317_v0 }
 0x555   : > { %v7918_v31 = vadd.f32 %v7917_v42, %v7916_v17  ;;  %v7847_v5 = vpop.f32.mrb[157].mxu0  ;;  %v7919_v16 = vpop.f32.mrb[138].mxu1 }
 0x556   : > { %v7848_v41 = vadd.f32 %v7847_v5, %v7846_v24  ;;  %v7849_v11 = vpop.f32.mrb[158].mxu0  ;;  %v7920_v46 = vpop.f32.mrb[139].mxu1  ;;  %v3421_v28 = vadd.f32 %v3420_v43, %v10313_v40 }
 0x557   : > { %v7921_v38 = vadd.f32 %v7920_v46, %v7919_v16  ;;  %v7850_v47 = vpop.f32.mrb[159].mxu0 }
 0x558   : > { %v4837_v49 = vadd.f32 %v7848_v41, %v10382_v7  ;;  %v7851_v45 = vadd.f32 %v7850_v47, %v7849_v11  ;;  %v3444_v7 = vmul.f32 %v10313_v40, %v10313_v40  ;;  %v3422_v11 = vadd.f32 %v3421_v28, %v10321_v23 }
 0x559   : > { %v3446_v47 = vmul.f32 %v10333_v54, %v10333_v54 }
 0x55a   : > { %v4838_v62 = vadd.f32 %v7851_v45, %v10384_v58  ;;  %v10428_v26 = vadd.f32 %v7912_v13, %v4837_v49  ;;  %v3459_v58 = vadd.f32 %v3458_v35, %v3444_v7 }
 0x55b   : > { %v7922_v21 = vpop.f32.mrb[140].mxu1 }
 0x55c   : > { %v7852_v52 = vpop.f32.mrb[160].mxu0  ;;  %v7923_v50 = vpop.f32.mrb[141].mxu1  ;;  %v10430_v25 = vadd.f32 %v7915_v20, %v4838_v62  ;;  %v3445_v20 = vmul.f32 %v10321_v23, %v10321_v23 }
 0x55d   : > { %v7924_v9 = vadd.f32 %v7923_v50, %v7922_v21  ;;  %v7853_v14 = vpop.f32.mrb[161].mxu0  ;;  %v7925_v61 = vpop.f32.mrb[142].mxu1 }
 0x55e   : > { %v7854_v17 = vadd.f32 %v7853_v14, %v7852_v52  ;;  %v7855_v24 = vpop.f32.mrb[162].mxu0  ;;  %v7926_v42 = vpop.f32.mrb[143].mxu1  ;;  %v3460_v49 = vadd.f32 %v3459_v58, %v3445_v20 }
 0x55f   : > { %v7927_v13 = vadd.f32 %v7926_v42, %v7925_v61  ;;  %v7856_v5 = vpop.f32.mrb[163].mxu0 }
 0x560   : > { %v4839_v16 = vadd.f32 %v7854_v17, %v10386_v51  ;;  %v7857_v41 = vadd.f32 %v7856_v5, %v7855_v24  ;;  %v3423_v51 = vadd.f32 %v3422_v11, %v10333_v54 }
 0x562   : > { %v4840_v46 = vadd.f32 %v7857_v41, %v10388_v29  ;;  %v10440_v48 = vadd.f32 %v7918_v31, %v4839_v16  ;;  %v3461_v29 = vadd.f32 %v3460_v49, %v3446_v47  ;;  %v3447_v31 = vmul.f32 %v10339_v60, %v10339_v60 }
 0x563   : > { %v7928_v45 = vpop.f32.mrb[144].mxu1 }
 0x564   : > { %v7858_v1 = vpop.f32.mrb[164].mxu0  ;;  %v7929_v43 = vpop.f32.mrb[145].mxu1  ;;  %v10444_v62 = vadd.f32 %v7921_v38, %v4840_v46  ;;  %v3424_v38 = vadd.f32 %v3423_v51, %v10339_v60  ;;  %v3462_v5 = vadd.f32 %v3461_v29, %v3447_v31  ;;  %v3448_v46 = vmul.f32 %v10329_v4, %v10329_v4 }
 0x565   : > { %v7930_v35 = vadd.f32 %v7929_v43, %v7928_v45  ;;  %v7859_v21 = vpop.f32.mrb[165].mxu0  ;;  %v7931_v52 = vpop.f32.mrb[146].mxu1  ;;  %v3450_v31 = vmul.f32 %v10346_v34, %v10346_v34 }
 0x566   : > { %v7860_v50 = vadd.f32 %v7859_v21, %v7858_v1  ;;  %v7861_v7 = vpop.f32.mrb[166].mxu0  ;;  %v7932_v28 = vpop.f32.mrb[147].mxu1  ;;  %v3425_v47 = vadd.f32 %v3424_v38, %v10329_v4 }
 0x567   : > { %v7933_v14 = vadd.f32 %v7932_v28, %v7931_v52  ;;  %v7862_v61 = vpop.f32.mrb[167].mxu0 }
 0x568   : > { %v4841_v17 = vadd.f32 %v7860_v50, %v10390_v32  ;;  %v7863_v24 = vadd.f32 %v7862_v61, %v7861_v7  ;;  %v3426_v7 = vadd.f32 %v3425_v47, %v10336_v57 }
 0x56a   : > { %v4842_v42 = vadd.f32 %v7863_v24, %v10392_v53  ;;  %v10452_v58 = vadd.f32 %v7924_v9, %v4841_v17  ;;  %v3463_v53 = vadd.f32 %v3462_v5, %v3448_v46  ;;  %v3451_v46 = vmul.f32 %v10352_v10, %v10352_v10 }
 0x56b   : > { %v7934_v16 = vpop.f32.mrb[148].mxu1 }
 0x56c   : > { %v7864_v41 = vpop.f32.mrb[168].mxu0  ;;  %v7935_v20 = vpop.f32.mrb[149].mxu1  ;;  %v10454_v11 = vadd.f32 %v7927_v13, %v4842_v42  ;;  %v3449_v13 = vmul.f32 %v10336_v57, %v10336_v57  ;;  %v3427_v42 = vadd.f32 %v3426_v7, %v10346_v34 }
 0x56d   : > { %v7865_v49 = vpop.f32.mrb[169].mxu0  ;;  %v7936_v32 = vadd.f32 %v7935_v20, %v7934_v16  ;;  %v7937_v45 = vpop.f32.mrb[150].mxu1 }
 0x56e   : > { %v7866_v1 = vadd.f32 %v7865_v49, %v7864_v41  ;;  %v7867_v43 = vpop.f32.mrb[170].mxu0  ;;  %v7938_v51 = vpop.f32.mrb[151].mxu1  ;;  %v3464_v61 = vadd.f32 %v3463_v53, %v3449_v13  ;;  %v3452_v13 = vmul.f32 %v10343_v63, %v10343_v63 }
 0x56f   : > { %v7868_v9 = vpop.f32.mrb[171].mxu0  ;;  %v7939_v21 = vadd.f32 %v7938_v51, %v7937_v45  ;;  %v3428_v45 = vadd.f32 %v3427_v42, %v10352_v10 }
 0x570   : > { %v4843_v52 = vadd.f32 %v7866_v1, %v10394_v56  ;;  %v7869_v50 = vadd.f32 %v7868_v9, %v7867_v43  ;;  %v3465_v20 = vadd.f32 %v3464_v61, %v3450_v31 }
 0x572   : > { %v4844_v28 = vadd.f32 %v7869_v50, %v10396_v8  ;;  %v10464_v29 = vadd.f32 %v7930_v35, %v4843_v52  ;;  %v3466_v51 = vadd.f32 %v3465_v20, %v3451_v46 }
 0x573   : > { %v10468_v17 = vpop.f32.mrb[152].mxu1 }
 0x574   : > { %v7870_v24 = vpop.f32.mrb[172].mxu0  ;;  %v10470_v38 = vadd.f32 %v7933_v14, %v4844_v28  ;;  %v10472_v56 = vpop.f32.mrb[153].mxu1 }
 0x575   : > { %v7871_v5 = vpop.f32.mrb[173].mxu0  ;;  %v10475_v16 = vpop.f32.mrb[154].mxu1 }
 0x576   : > { %v7872_v41 = vadd.f32 %v7871_v5, %v7870_v24  ;;  %v7873_v8 = vpop.f32.mrb[174].mxu0  ;;  %v10477_v35 = vpop.f32.mrb[155].mxu1 }
 0x577   : > { %v7874_v47 = vpop.f32.mrb[175].mxu0 }
 0x578   : > { %v4845_v49 = vadd.f32 %v7872_v41, %v10398_v30  ;;  %v7875_v14 = vadd.f32 %v7874_v47, %v7873_v8  ;;  %v3429_v30 = vadd.f32 %v3428_v45, %v10343_v63 }
 0x57a   : > { %v4846_v1 = vadd.f32 %v7875_v14, %v10400_v22  ;;  %v10484_v43 = vadd.f32 %v7936_v32, %v4845_v49  ;;  %v3430_v41 = vadd.f32 %v3429_v30, %v10349_v15 }
 0x57b   : > { %v10486_v53 = vpop.f32.mrb[156].mxu1 }
 0x57c   : > { %v8129_v9 = vpop.f32.mrb[176].mxu0  ;;  %v10488_v52 = vadd.f32 %v7939_v21, %v4846_v1  ;;  %v10490_v50 = vpop.f32.mrb[157].mxu1  ;;  %v3467_v21 = vadd.f32 %v3466_v51, %v3452_v13  ;;  %v3431_v51 = vadd.f32 %v3430_v41, %v10360_v3 }
 0x57d   : > { %v10496_v7 = vadd.f32 %v8129_v9, %v10410_v27  ;;  %v5427_v28 = vpop.f32.mrb[177].mxu0  ;;  %v10498_v22 = vpop.f32.mrb[158].mxu1  ;;  %v3453_v27 = vmul.f32 %v10349_v15, %v10349_v15 }
 0x57e   : > { %v10501_v32 = vadd.f32 %v5427_v28, %v10404_v39  ;;  %v8130_v31 = vpop.f32.mrb[178].mxu0  ;;  %v10503_v61 = vpop.f32.mrb[159].mxu1 }
 0x57f   : > { %v10506_v24 = vadd.f32 %v8130_v31, %v10412_v18  ;;  %v5430_v42 = vpop.f32.mrb[179].mxu0  ;;  %v3454_v18 = vmul.f32 %v10360_v3, %v10360_v3  ;;  %v3468_v46 = vadd.f32 %v3467_v21, %v3453_v27  ;;  %v5546_v47 = vmul.f32 %v10496_v7, %v10496_v7 }
 0x580   : > { %v10509_v5 = vadd.f32 %v5430_v42, %v10406_v59  ;;  %v5544_v39 = vmul.f32 %v10501_v32, %v10501_v32 }
 0x581   : > { %v5547_v28 = vmul.f32 %v10506_v24, %v10506_v24 }
 0x582   : > { %v5522_v8 = vadd.f32 %v10509_v5, %v10501_v32  ;;  %v5545_v20 = vmul.f32 %v10509_v5, %v10509_v5 }
 0x583   : > { %v10522_v59 = vpop.f32.mrb[160].mxu1 }
 0x584   : > { %v5523_v49 = vadd.f32 %v5522_v8, %v10496_v7  ;;  %v5560_v14 = vadd.f32 %v5545_v20, %v5544_v39  ;;  %v8133_v45 = vpop.f32.mrb[180].mxu0  ;;  %v10527_v1 = vpop.f32.mrb[161].mxu1  ;;  %v3469_v8 = vadd.f32 %v3468_v46, %v3454_v18 }
 0x585   : > { %v10531_v9 = vadd.f32 %v8133_v45, %v10428_v26  ;;  %v5443_v13 = vpop.f32.mrb[181].mxu0  ;;  %v10533_v30 = vpop.f32.mrb[162].mxu1  ;;  %v3455_v26 = vmul.f32 %v10368_v19, %v10368_v19 }
 0x586   : > { %v5561_v31 = vadd.f32 %v5560_v14, %v5546_v47  ;;  %v10538_v21 = vadd.f32 %v5443_v13, %v10416_v33  ;;  %v5524_v42 = vadd.f32 %v5523_v49, %v10506_v24  ;;  %v8134_v27 = vpop.f32.mrb[182].mxu0  ;;  %v10541_v39 = vpop.f32.mrb[163].mxu1  ;;  %v3432_v49 = vadd.f32 %v3431_v51, %v10368_v19 }
 0x587   : > { %v10546_v41 = vadd.f32 %v8134_v27, %v10430_v25  ;;  %v5446_v20 = vpop.f32.mrb[183].mxu0  ;;  %v3470_v25 = vadd.f32 %v3469_v8, %v3455_v26  ;;  %v3456_v51 = vmul.f32 %v10357_v6, %v10357_v6 }
 0x588   : > { %v5525_v45 = vadd.f32 %v5524_v42, %v10538_v21  ;;  %v5548_v47 = vmul.f32 %v10538_v21, %v10538_v21  ;;  %v5562_v33 = vadd.f32 %v5561_v31, %v5547_v28  ;;  %v10552_v14 = vadd.f32 %v5446_v20, %v10418_v44 }
 0x589   : > { %v5550_v42 = vmul.f32 %v10531_v9, %v10531_v9  ;;  %v3433_v20 = vadd.f32 %v3432_v49, %v10357_v6 }
 0x58a   : > { %v5563_v13 = vadd.f32 %v5562_v33, %v5548_v47  ;;  %v5526_v18 = vadd.f32 %v5525_v45, %v10552_v14  ;;  %v5549_v46 = vmul.f32 %v10552_v14, %v10552_v14  ;;  %v5551_v47 = vmul.f32 %v10546_v41, %v10546_v41 }
 0x58b   : > { %v10558_v27 = vpop.f32.mrb[164].mxu1 }
 0x58c   : > { %11103 = vst [vmem:[#allocation11_spill] sm:$0xff] %v10558_v27  ;;  %v5527_v3 = vadd.f32 %v5526_v18, %v10531_v9  ;;  %v5564_v28 = vadd.f32 %v5563_v13, %v5549_v46  ;;  %v8137_v31 = vpop.f32.mrb[184].mxu0  ;;  %v10563_v44 = vpop.f32.mrb[165].mxu1  ;;  %v3471_v27 = vadd.f32 %v3470_v25, %v3456_v51 }
 0x58d   : > { %11104 = vst [vmem:[#allocation12_spill] sm:$0xff] %v10563_v44  ;;  %v10569_v45 = vadd.f32 %v8137_v31, %v10452_v58  ;;  %v5459_v8 = vpop.f32.mrb[185].mxu0  ;;  %v10571_v26 = vpop.f32.mrb[166].mxu1 }
 0x58e   : > { %11105 = vst [vmem:[#allocation13_spill] sm:$0xff] %v10571_v26  ;;  %v5565_v33 = vadd.f32 %v5564_v28, %v5550_v42  ;;  %v10576_v13 = vadd.f32 %v5459_v8, %v10440_v48  ;;  %v5528_v18 = vadd.f32 %v5527_v3, %v10546_v41  ;;  %v8138_v46 = vpop.f32.mrb[186].mxu0  ;;  %v10579_v44 = vpop.f32.mrb[167].mxu1  ;;  %v3457_v3 = vmul.f32 %v10365_v36, %v10365_v36 }
 0x58f   : > { %11107 = vst [vmem:[#allocation15_spill] sm:$0xff] %v10579_v44  ;;  %v10582_v49 = vadd.f32 %v8138_v46, %v10454_v11  ;;  %v5462_v58 = vpop.f32.mrb[187].mxu0  ;;  %v3434_v48 = vadd.f32 %v3433_v20, %v10365_v36 }
 0x590   : > { %11106 = vst [vmem:[#allocation14_spill] sm:$0xff] %v10576_v13  ;;  %v5529_v31 = vadd.f32 %v5528_v18, %v10576_v13  ;;  %v5552_v26 = vmul.f32 %v10576_v13, %v10576_v13  ;;  %v5566_v19 = vadd.f32 %v5565_v33, %v5551_v47  ;;  %v10588_v42 = vadd.f32 %v5462_v58, %v10444_v62 }
 0x591   : > { %11108 = vst [vmem:[#allocation16_spill] sm:$0xff] %v10582_v49  ;;  %v3472_v51 = vadd.f32 %v3471_v27, %v3457_v3  ;;  %v5554_v47 = vmul.f32 %v10569_v45, %v10569_v45  ;;  %v3435_v58 = vrot.slane %v3434_v48, 4  ;;  %v5555_v27 = vmul.f32 %v10582_v49, %v10582_v49 }
 0x592   : > { %11109 = vst [vmem:[#allocation17_spill] sm:$0xff] %v10588_v42  ;;  %v5567_v28 = vadd.f32 %v5566_v19, %v5552_v26  ;;  %v5530_v25 = vadd.f32 %v5529_v31, %v10588_v42  ;;  %v5553_v11 = vmul.f32 %v10588_v42, %v10588_v42 }
 0x593   : > { %v10596_v8 = vpop.f32.mrb[168].mxu1 }
 0x594   : > { %11110 = vst [vmem:[#allocation18_spill] sm:$0xff] %v10596_v8  ;;  %v5531_v62 = vadd.f32 %v5530_v25, %v10569_v45  ;;  %v5568_v33 = vadd.f32 %v5567_v28, %v5553_v11  ;;  %v8141_v18 = vpop.f32.mrb[188].mxu0  ;;  %v10601_v46 = vpop.f32.mrb[169].mxu1 }
 0x595   : > { %11111 = vst [vmem:[#allocation19_spill] sm:$0xff] %v10601_v46  ;;  %v10604_v19 = vadd.f32 %v8141_v18, %v10484_v43  ;;  %v5475_v20 = vpop.f32.mrb[189].mxu0  ;;  %v10606_v26 = vpop.f32.mrb[170].mxu1  ;;  %v3473_v46 = vrot.slane %v3472_v51, 4 }
 0x596   : > { %11113 = vst [vmem:[#allocation21_spill] sm:$0xff] %v10606_v26  ;;  %v5569_v31 = vadd.f32 %v5568_v33, %v5554_v47  ;;  %v10611_v3 = vadd.f32 %v5475_v20, %v10464_v29  ;;  %v5532_v25 = vadd.f32 %v5531_v62, %v10582_v49  ;;  %v8142_v28 = vpop.f32.mrb[190].mxu0  ;;  %v10614_v11 = vpop.f32.mrb[171].mxu1  ;;  %v3436_v29 = vadd.f32 %v3435_v58, %v3434_v48 }
 0x597   : > { %11112 = vst [vmem:[#allocation20_spill] sm:$0xff] %v10604_v19  ;;  %11115 = vst [vmem:[#allocation23_spill] sm:$0xff] %v10614_v11  ;;  %v10617_v8 = vadd.f32 %v8142_v28, %v10488_v52  ;;  %v5478_v43 = vpop.f32.mrb[191].mxu0  ;;  %v3474_v11 = vadd.f32 %v3473_v46, %v3472_v51 }
 0x598   : > { %11114 = vst [vmem:[#allocation22_spill] sm:$0xff] %v10611_v3  ;;  %v5533_v18 = vadd.f32 %v5532_v25, %v10611_v3  ;;  %v5556_v26 = vmul.f32 %v10611_v3, %v10611_v3  ;;  %v5570_v44 = vadd.f32 %v5569_v31, %v5555_v27  ;;  %v10623_v47 = vadd.f32 %v5478_v43, %v10470_v38 }
 0x599   : > { %11116 = vst [vmem:[#allocation24_spill] sm:$0xff] %v10617_v8  ;;  %v5558_v25 = vmul.f32 %v10604_v19, %v10604_v19  ;;  %v3437_v38 = vrot.slane %v3436_v29, 2  ;;  %v5559_v58 = vmul.f32 %v10617_v8, %v10617_v8 }
 0x59a   : > { %v5571_v33 = vadd.f32 %v5570_v44, %v5556_v26  ;;  %v5534_v62 = vadd.f32 %v5533_v18, %v10623_v47  ;;  %v5557_v20 = vmul.f32 %v10623_v47, %v10623_v47  ;;  %v3475_v18 = vrot.slane %v3474_v11, 2 }
 0x59b   : > { %v10628_v52 = vpop.f32.mrb[172].mxu1 }
 0x59c   : > { %11117 = vst [vmem:[#allocation25_spill] sm:$0xff] %v10628_v52  ;;  %v5535_v28 = vadd.f32 %v5534_v62, %v10604_v19  ;;  %v5572_v36 = vadd.f32 %v5571_v33, %v5557_v20  ;;  %v8147_v27 = vpop.f32.mrb[192].mxu0  ;;  %v10633_v31 = vpop.f32.mrb[173].mxu1  ;;  %v3438_v19 = vadd.f32 %v3437_v38, %v3436_v29  ;;  %v3476_v15 = vadd.f32 %v3475_v18, %v3474_v11 }
 0x59d   : > { %11118 = vst [vmem:[#allocation26_spill] sm:$0xff] %v10633_v31  ;;  %v5700_v48 = vpop.f32.mrb[193].mxu0  ;;  %v10635_v44 = vpop.f32.mrb[174].mxu1  ;;  %v5787_v6 = vmul.f32 %v8147_v27, %v8147_v27 }
 0x59e   : > { %11119 = vst [vmem:[#allocation27_spill] sm:$0xff] %v10635_v44  ;;  %v5536_v51 = vadd.f32 %v5535_v28, %v10617_v8  ;;  %v5573_v46 = vadd.f32 %v5572_v36, %v5558_v25  ;;  %v8148_v26 = vpop.f32.mrb[194].mxu0  ;;  %v10640_v43 = vpop.f32.mrb[175].mxu1  ;;  %v5785_v52 = vmul.f32 %v5700_v48, %v5700_v48  ;;  %v5789_v36 = vmul.f32 %v10472_v56, %v10472_v56 }
 0x59f   : > { %11120 = vst [vmem:[#allocation28_spill] sm:$0xff] %v10640_v43  ;;  %v5703_v62 = vpop.f32.mrb[195].mxu0  ;;  %v5788_v13 = vmul.f32 %v8148_v26, %v8148_v26  ;;  %v3439_v29 = vrot.slane %v3438_v19, 1 }
 0x5a0   : > { %v5537_v33 = vrot.slane %v5536_v51, 4  ;;  %v5574_v20 = vadd.f32 %v5573_v46, %v5559_v58  ;;  %v5763_v3 = vadd.f32 %v5703_v62, %v5700_v48  ;;  %v5786_v31 = vmul.f32 %v5703_v62, %v5703_v62 }
 0x5a2   : > { %v5538_v42 = vadd.f32 %v5537_v33, %v5536_v51  ;;  %v5575_v44 = vrot.slane %v5574_v20, 4  ;;  %v5764_v10 = vadd.f32 %v8147_v27, %v5763_v3  ;;  %v5801_v49 = vadd.f32 %v5786_v31, %v5785_v52 }
 0x5a3   : > { %v10644_v25 = vpop.f32.mrb[176].mxu1 }
 0x5a4   : > { %v5539_v28 = vrot.slane %v5538_v42, 2  ;;  %v5576_v43 = vadd.f32 %v5575_v44, %v5574_v20  ;;  %v5802_v8 = vadd.f32 %v5801_v49, %v5787_v6  ;;  %v5765_v34 = vadd.f32 %v8148_v26, %v5764_v10  ;;  %v10646_v58 = vpop.f32.mrb[196].mxu0  ;;  %v10648_v48 = vpop.f32.mrb[177].mxu1 }
 0x5a5   : > { %v10650_v38 = vpop.f32.mrb[197].mxu0  ;;  %v10652_v3 = vpop.f32.mrb[178].mxu1  ;;  %v3477_v6 = vrot.slane %v3476_v15, 1  ;;  %v5790_v10 = vmul.f32 %v10477_v35, %v10477_v35 }
 0x5a6   : > { %v5540_v11 = vadd.f32 %v5539_v28, %v5538_v42  ;;  %v5577_v52 = vrot.slane %v5576_v43, 2  ;;  %v5766_v27 = vadd.f32 %v5765_v34, %v10472_v56  ;;  %v5803_v31 = vadd.f32 %v5802_v8, %v5788_v13  ;;  %v10655_v51 = vpop.f32.mrb[198].mxu0  ;;  %v10657_v46 = vpop.f32.mrb[179].mxu1 }
 0x5a7   : > { %11121 = vst [vmem:[#allocation29_spill] sm:$0xff] %v10657_v46  ;;  %v10661_v49 = vpop.f32.mrb[199].mxu0  ;;  %v3440_v42 = vadd.f32 %v3439_v29, %v3438_v19  ;;  %v5791_v34 = vmul.f32 %v10468_v17, %v10468_v17  ;;  %v3478_v20 = vadd.f32 %v3477_v6, %v3476_v15  ;;  %v5792_v28 = vmul.f32 %v10475_v16, %v10475_v16 }
 0x5a8   : > { %v5541_v44 = vrot.slane %v5540_v11, 1  ;;  %v5578_v26 = vadd.f32 %v5577_v52, %v5576_v43  ;;  %v5804_v18 = vadd.f32 %v5803_v31, %v5789_v36  ;;  %v5767_v62 = vadd.f32 %v5766_v27, %v10477_v35 }
 0x5a9   : > { %v5793_v46 = vmul.f32 %v10490_v50, %v10490_v50  ;;  %v3677_v6 = vrot.slane %v10354_v55, 4 }
 0x5aa   : > { %v5542_v56 = vadd.f32 %v5541_v44, %v5540_v11  ;;  %v5579_v13 = vrot.slane %v5578_v26, 1  ;;  %v5768_v8 = vadd.f32 %v10468_v17, %v5767_v62  ;;  %v5805_v33 = vadd.f32 %v5804_v18, %v5790_v10 }
 0x5ab   : > { %v3715_v10 = vrot.slane %v10362_v37, 4  ;;  %v5794_v44 = vmul.f32 %v10503_v61, %v10503_v61 }
 0x5ac   : > { %v5543_v43 = vadd.f32 %v5542_v56, %v3440_v42  ;;  %v5580_v36 = vadd.f32 %v5579_v13, %v5578_v26  ;;  %v5806_v52 = vadd.f32 %v5805_v33, %v5791_v34  ;;  %v5769_v35 = vadd.f32 %v10475_v16, %v5768_v8  ;;  %v10672_v19 = vpop.f32.mrb[200].mxu0 }
 0x5ad   : > { %v10674_v29 = vpop.f32.mrb[201].mxu0  ;;  %v3678_v8 = vadd.f32 %v3677_v6, %v10354_v55  ;;  %v3716_v33 = vadd.f32 %v3715_v10, %v10362_v37  ;;  %v5798_v6 = vmul.f32 %v10541_v39, %v10541_v39  ;;  %v5799_v10 = vmul.f32 %v10522_v59, %v10522_v59 }
 0x5ae   : > { %v5581_v11 = vadd.f32 %v5580_v36, %v3478_v20  ;;  %v5823_v27 = vmul.f32 0.00390625, %v5543_v43  ;;  %v5770_v17 = vadd.f32 %v5769_v35, %v10490_v50  ;;  %v5807_v15 = vadd.f32 %v5806_v52, %v5792_v28  ;;  %v10677_v31 = vpop.f32.mrb[202].mxu0 }
 0x5af   : > { %v10683_v26 = vpop.f32.mrb[203].mxu0  ;;  %v5795_v50 = vmul.f32 %v10486_v53, %v10486_v53  ;;  %v5796_v20 = vmul.f32 %v10498_v22, %v10498_v22  ;;  %v3679_v37 = vrot.slane %v3678_v8, 2 }
 0x5b0   : > { %v5824_v16 = vmul.f32 0.00390625, %v5581_v11  ;;  %v5825_v18 = vmul.f32 %v5823_v27, %v5823_v27  ;;  %v5808_v62 = vadd.f32 %v5807_v15, %v5793_v46  ;;  %v5771_v42 = vadd.f32 %v5770_v17, %v10503_v61 }
 0x5b1   : > { %v5797_v61 = vmul.f32 %v10527_v1, %v10527_v1  ;;  %v3717_v17 = vrot.slane %v3716_v33, 2 }
 0x5b2   : > { %v5826_v34 = vsub.f32 %v5824_v16, %v5825_v18  ;;  %v5772_v56 = vadd.f32 %v10486_v53, %v5771_v42  ;;  %v5809_v13 = vadd.f32 %v5808_v62, %v5794_v44  ;;  %v5800_v62 = vmul.f32 %v10533_v30, %v10533_v30 }
 0x5b3   : > { %v3718_v18 = vadd.f32 %v3717_v17, %v3716_v33 }
 0x5b4   : > { %v5827_v28 = vadd.f32 1e-05, %v5826_v34  ;;  %v5810_v43 = vadd.f32 %v5809_v13, %v5795_v50  ;;  %v5773_v46 = vadd.f32 %v10498_v22, %v5772_v56  ;;  %v10696_v36 = vpop.f32.mrb[204].mxu0 }
 0x5b5   : > { %v10698_v52 = vpop.f32.mrb[205].mxu0 }
 0x5b6   : > { %8433 = vrsqrt.f32 %v5827_v28  ;;  %v5774_v53 = vadd.f32 %v5773_v46, %v10527_v1  ;;  %v5811_v55 = vadd.f32 %v5810_v43, %v5796_v20  ;;  %v10701_v35 = vpop.f32.mrb[206].mxu0  ;;  %v3680_v1 = vadd.f32 %v3679_v37, %v3678_v8 }
 0x5b7   : > { %v10703_v11 = vpop.f32.mrb[207].mxu0  ;;  %v3719_v43 = vrot.slane %v3718_v18, 1 }
 0x5b8   : > { %v5812_v15 = vadd.f32 %v5811_v55, %v5797_v61  ;;  %v5775_v22 = vadd.f32 %v5774_v53, %v10541_v39  ;;  %v5829_v39 = vld [vmem:[%s11073_s9] sm:$0x1]  ;;  %v3681_v28 = vrot.slane %v3680_v1, 1 }
 0x5b9   : > { %v5831_v53 = vld [vmem:[%s11074_s10] sm:$0x1] }
 0x5ba   : > { %v5776_v44 = vadd.f32 %v10522_v59, %v5775_v22  ;;  %v5813_v16 = vadd.f32 %v5812_v15, %v5798_v6  ;;  %v3682_v22 = vadd.f32 %v3681_v28, %v3680_v1  ;;  %v3720_v6 = vadd.f32 %v3719_v43, %v3718_v18 }
 0x5bc   : > { %v5777_v42 = vadd.f32 %v10533_v30, %v5776_v44  ;;  %v5814_v34 = vadd.f32 %v5813_v16, %v5799_v10  ;;  %v10714_v50 = vpop.f32.mrb[208].mxu0 }
 0x5bd   : > { %v10716_v56 = vpop.f32.mrb[209].mxu0 }
 0x5be   : > { %v5778_v13 = vrot.slane %v5777_v42, 4  ;;  %v5815_v20 = vadd.f32 %v5814_v34, %v5800_v62  ;;  %v10721_v59 = vpop.f32.mrb[210].mxu0 }
 0x5bf   : > { %v10723_v8 = vpop.f32.mrb[211].mxu0 }
 0x5c0   : > { %v8434_v33 = vpop.eup %8433  ;;  %v5779_v46 = vadd.f32 %v5778_v13, %v5777_v42  ;;  %v5816_v30 = vrot.slane %v5815_v20, 4 }
 0x5c1   : > { %v5830_v61 = vmul.f32 %v8434_v33, %v5829_v39 }
 0x5c2   : > { %v5780_v55 = vrot.slane %v5779_v46, 2  ;;  %v5817_v37 = vadd.f32 %v5816_v30, %v5815_v20 }
 0x5c3   : > { %v5832_v17 = vmul.f32 %v5830_v61, %v5823_v27  ;;  %v10729_v15 = vrot.slane %v5830_v61, %v9350_v12 }
 0x5c4   : > { %v5781_v10 = vadd.f32 %v5780_v55, %v5779_v46  ;;  %v5818_v44 = vrot.slane %v5817_v37, 2 }
 0x5c5   : > { %v5833_v16 = vsub.f32 %v5831_v53, %v5832_v17  ;;  %v10733_v62 = vmul.f32 %v10729_v15, %v10623_v47  ;;  %v6044_v42 = vmul.f32 %v10729_v15, %v10313_v40  ;;  %v6465_v34 = vmul.f32 %v10729_v15, %v10496_v7 }
 0x5c6   : > { %v5782_v39 = vrot.slane %v5781_v10, 1  ;;  %v5819_v27 = vadd.f32 %v5818_v44, %v5817_v37  ;;  %v6042_v13 = vmul.f32 %v10729_v15, %v10317_v0  ;;  %v6463_v1 = vmul.f32 %v10729_v15, %v10501_v32 }
 0x5c7   : > { %v10744_v18 = vrot.slane %v5833_v16, %v9350_v12  ;;  %v6045_v47 = vmul.f32 %v10729_v15, %v10321_v23  ;;  %v6466_v40 = vmul.f32 %v10729_v15, %v10506_v24  ;;  %v6043_v7 = vmul.f32 %v10729_v15, %v10324_v2 }
 0x5c8   : > { %v5783_v20 = vadd.f32 %v5782_v39, %v5781_v10  ;;  %v5820_v33 = vrot.slane %v5819_v27, 1  ;;  %v6464_v0 = vmul.f32 %v10729_v15, %v10509_v5  ;;  %v6048_v32 = vmul.f32 %v10729_v15, %v10329_v4 }
 0x5c9   : > { %v10757_v28 = vadd.f32 %v10744_v18, %v6044_v42  ;;  %v10760_v43 = vadd.f32 %v6465_v34, %v10744_v18  ;;  %v10763_v23 = vadd.f32 %v10744_v18, %v6042_v13  ;;  %v10766_v24 = vadd.f32 %v6463_v1, %v10744_v18 }
 0x5ca   : > { %v5784_v2 = vadd.f32 %v5783_v20, %v3682_v22  ;;  %v5821_v46 = vadd.f32 %v5820_v33, %v5819_v27  ;;  %v10769_v30 = vadd.f32 %v10744_v18, %v6045_v47  ;;  %v10772_v5 = vadd.f32 %v6466_v40, %v10744_v18  ;;  %v11122_v47 = vld [vmem:[#allocation4_spill] sm:$0xff]  ;;  %v11123_v20 = vld [vmem:[#allocation14_spill] sm:$0xff] }
 0x5cb   : > { %v10775_v4 = vadd.f32 %v10744_v18, %v6043_v7  ;;  %v10778_v61 = vadd.f32 %v6464_v0, %v10744_v18  ;;  %v10781_v53 = vadd.f32 %v10744_v18, %v6048_v32  ;;  %v6469_v55 = vmul.f32 %v10729_v15, %v10531_v9  ;;  %v11124_v0 = vld [vmem:[#allocation5_spill] sm:$0xff] }
 0x5cc   : > { %v5822_v37 = vadd.f32 %v5821_v46, %v3720_v6  ;;  %v5834_v17 = vmul.f32 0.00390625, %v5784_v2  ;;  %v6046_v22 = vmul.f32 %v10729_v15, %v10333_v54  ;;  %v6467_v10 = vmul.f32 %v10729_v15, %v10538_v21 }
 0x5cd   : > { %v10790_v44 = vadd.f32 %v6469_v55, %v10744_v18  ;;  %v6049_v16 = vmul.f32 %v10729_v15, %v10336_v57  ;;  %v6470_v42 = vmul.f32 %v10729_v15, %v10546_v41  ;;  %v6047_v9 = vmul.f32 %v10729_v15, %v10339_v60 }
 0x5ce   : > { %v5835_v6 = vmul.f32 0.00390625, %v5822_v37  ;;  %v5836_v34 = vmul.f32 %v5834_v17, %v5834_v17  ;;  %v10799_v39 = vadd.f32 %v10744_v18, %v6046_v22  ;;  %v10802_v54 = vadd.f32 %v6467_v10, %v10744_v18 }
 0x5cf   : > { %v10805_v21 = vadd.f32 %v10744_v18, %v6049_v16  ;;  %v10808_v27 = vadd.f32 %v6470_v42, %v10744_v18  ;;  %v10811_v57 = vadd.f32 %v10744_v18, %v6047_v9  ;;  %v6468_v60 = vmul.f32 %v10729_v15, %v10552_v14  ;;  %v11125_v14 = vld [vmem:[#allocation16_spill] sm:$0xff]  ;;  %v11126_v16 = vld [vmem:[#allocation6_spill] sm:$0xff]  ;;  %v11127_v9 = vld [vmem:[#allocation17_spill] sm:$0xff] }
 0x5d0   : > { %v5837_v41 = vsub.f32 %v5835_v6, %v5836_v34  ;;  %v6052_v13 = vmul.f32 %v10729_v15, %v10343_v63  ;;  %v6473_v1 = vmul.f32 %v10729_v15, %v10569_v45  ;;  %v6050_v40 = vmul.f32 %v10729_v15, %v11122_v47  ;;  %v11128_v34 = vld [vmem:[#allocation7_spill] sm:$0xff]  ;;  %v11130_v47 = vld [vmem:[#allocation8_spill] sm:$0xff] }
 0x5d1   : > { %v10822_v7 = vadd.f32 %v6468_v60, %v10744_v18  ;;  %v6471_v33 = vmul.f32 %v10729_v15, %v11123_v20  ;;  %v6053_v32 = vmul.f32 %v10729_v15, %v11124_v0  ;;  %v6474_v2 = vmul.f32 %v10729_v15, %v11125_v14  ;;  %v11131_v20 = vld [vmem:[#allocation22_spill] sm:$0xff]  ;;  %v11132_v0 = vld [vmem:[#allocation9_spill] sm:$0xff] }
 0x5d2   : > { %v5838_v46 = vadd.f32 1e-05, %v5837_v41  ;;  %v10831_v63 = vadd.f32 %v10744_v18, %v6052_v13  ;;  %v10834_v45 = vadd.f32 %v6473_v1, %v10744_v18  ;;  %v10837_v55 = vadd.f32 %v10744_v18, %v6050_v40  ;;  %v11129_v41 = vld [vmem:[#allocation20_spill] sm:$0xff] }
 0x5d3   : > { %v10840_v37 = vadd.f32 %v6471_v33, %v10744_v18  ;;  %v10843_v22 = vadd.f32 %v10744_v18, %v6053_v32  ;;  %v10846_v10 = vadd.f32 %v6474_v2, %v10744_v18  ;;  %v6051_v42 = vmul.f32 %v10729_v15, %v11126_v16  ;;  %v11133_v16 = vld [vmem:[#allocation24_spill] sm:$0xff] }
 0x5d4   : > { %8435 = vrsqrt.f32 %v5838_v46  ;;  %v6472_v6 = vmul.f32 %v10729_v15, %v11127_v9  ;;  %v6056_v60 = vmul.f32 %v10729_v15, %v11128_v34  ;;  %v6477_v13 = vmul.f32 %v10729_v15, %v11129_v41 }
 0x5d5   : > { %v10857_v1 = vadd.f32 %v10744_v18, %v6051_v42  ;;  %v6054_v40 = vmul.f32 %v10729_v15, %v11130_v47  ;;  %v6475_v33 = vmul.f32 %v10729_v15, %v11131_v20  ;;  %v6057_v32 = vmul.f32 %v10729_v15, %v11132_v0 }
 0x5d6   : > { %v10866_v14 = vadd.f32 %v6472_v6, %v10744_v18  ;;  %v10869_v2 = vadd.f32 %v10744_v18, %v6056_v60  ;;  %v10872_v46 = vadd.f32 %v6477_v13, %v10744_v18  ;;  %v6478_v42 = vmul.f32 %v10729_v15, %v11133_v16  ;;  %v11134_v6 = vld [vmem:[#allocation10_spill] sm:$0xff] }
 0x5d7   : > { %v10877_v9 = vadd.f32 %v10744_v18, %v6054_v40  ;;  %v10880_v34 = vadd.f32 %v6475_v33, %v10744_v18  ;;  %v10883_v41 = vadd.f32 %v10744_v18, %v6057_v32  ;;  %v6055_v47 = vmul.f32 %v10729_v15, %v11134_v6  ;;  %v5840_v40 = vld [vmem:[%s11076_s12] sm:$0x1] }
 0x5d8   : > { %v10888_v60 = vadd.f32 %v6478_v42, %v10744_v18  ;;  %v10892_v13 = vadd.f32 %v10733_v62, %v10744_v18  ;;  %v5842_v15 = vld [vmem:[%s11077_s13] sm:$0x1] }
 0x5d9   : > { %v10895_v20 = vadd.f32 %v10744_v18, %v6055_v47  ;;  %v11138_v18 = vld [vmem:[#allocation11_spill] sm:$0xff] }
 0x5da   : > { %11135 = vst [vmem:[#allocation4_spill] sm:$0xff] %v10888_v60  ;;  %11136 = vst [vmem:[#allocation14_spill] sm:$0xff] %v10892_v13 }
 0x5db   : > { %11137 = vst [vmem:[#allocation5_spill] sm:$0xff] %v10895_v20 }
 0x5de   : > { %v8436_v33 = vpop.eup %8435 }
 0x5df   : > { %v5841_v0 = vmul.f32 %v8436_v33, %v5840_v40  ;;  %v11139_v40 = vld [vmem:[#allocation12_spill] sm:$0xff] }
 0x5e1   : > { %v5843_v32 = vmul.f32 %v5841_v0, %v5834_v17  ;;  %v10904_v16 = vrot.slane %v5841_v0, %v9350_v12  ;;  %v11140_v17 = vld [vmem:[#allocation13_spill] sm:$0xff] }
 0x5e3   : > { %v5844_v42 = vsub.f32 %v5842_v15, %v5843_v32  ;;  %v6086_v62 = vmul.f32 %v10646_v58, %v10904_v16  ;;  %v6497_v6 = vmul.f32 %v11138_v18, %v10904_v16  ;;  %v6084_v47 = vmul.f32 %v10904_v16, %v10650_v38 }
 0x5e4   : > { %v6495_v33 = vmul.f32 %v11139_v40, %v10904_v16  ;;  %v6087_v13 = vmul.f32 %v10655_v51, %v10904_v16  ;;  %v6498_v0 = vmul.f32 %v11140_v17, %v10904_v16  ;;  %v6085_v15 = vmul.f32 %v10904_v16, %v10661_v49 }
 0x5e5   : > { %v10921_v58 = vrot.slane %v5844_v42, %v9350_v12  ;;  %v6102_v32 = vadd.f32 %v6086_v62, %v10757_v28  ;;  %v6513_v18 = vadd.f32 %v6497_v6, %v10760_v43  ;;  %v6100_v38 = vadd.f32 %v6084_v47, %v10763_v23  ;;  %v11141_v28 = vld [vmem:[#allocation15_spill] sm:$0xff] }
 0x5e6   : > { %v6511_v40 = vadd.f32 %v6495_v33, %v10766_v24  ;;  %v6103_v20 = vadd.f32 %v6087_v13, %v10769_v30  ;;  %v6514_v51 = vadd.f32 %v6498_v0, %v10772_v5  ;;  %v6101_v17 = vadd.f32 %v6085_v15, %v10775_v4 }
 0x5e7   : > { %v6124_v60 = vadd.f32 %v10921_v58, %v6102_v32  ;;  %v6529_v49 = vadd.f32 %v6513_v18, %v10921_v58  ;;  %v6122_v12 = vadd.f32 %v10921_v58, %v6100_v38  ;;  %v6496_v42 = vmul.f32 %v11141_v28, %v10904_v16 }
 0x5e8   : > { %v6527_v43 = vadd.f32 %v6511_v40, %v10921_v58  ;;  %v6125_v23 = vadd.f32 %v10921_v58, %v6103_v20  ;;  %v6530_v24 = vadd.f32 %v6514_v51, %v10921_v58  ;;  %v6123_v30 = vadd.f32 %v10921_v58, %v6101_v17  ;;  %v11142_v17 = vld [vmem:[#allocation18_spill] sm:$0xff] }
 0x5e9   : > { %vm6140_vm0 = vcmp.ge.f32.partialorder %v6124_v60, 0.0  ;;  %v6156_v5 = vmul.f32 0.01, %v6124_v60  ;;  %vm6545_vm14 = vcmp.ge.f32.partialorder %v6529_v49, 0.0  ;;  %v6561_v4 = vmul.f32 0.01, %v6529_v49 }
 0x5ea   : > { %vm6138_vm15 = vcmp.ge.f32.partialorder %v6122_v12, 0.0  ;;  %v6154_v13 = vmul.f32 0.01, %v6122_v12  ;;  %vm6543_vm1 = vcmp.ge.f32.partialorder %v6527_v43, 0.0  ;;  %v6559_v62 = vmul.f32 0.01, %v6527_v43 }
 0x5eb   : > { %v6172_v6 = vsel %vm6140_vm0, %v6124_v60, %v6156_v5  ;;  %v6577_v47 = vsel %vm6545_vm14, %v6529_v49, %v6561_v4  ;;  %vm6141_vm3 = vcmp.ge.f32.partialorder %v6125_v23, 0.0  ;;  %v6157_v33 = vmul.f32 0.01, %v6125_v23 }
 0x5ec   : > { %v6170_v0 = vsel %vm6138_vm15, %v6122_v12, %v6154_v13  ;;  %v6575_v15 = vsel %vm6543_vm1, %v6527_v43, %v6559_v62  ;;  %vm6546_vm4 = vcmp.ge.f32.partialorder %v6530_v24, 0.0  ;;  %v6562_v20 = vmul.f32 0.01, %v6530_v24 }
 0x5ed   : > { %v6173_v32 = vsel %vm6141_vm3, %v6125_v23, %v6157_v33  ;;  %vm6139_vm5 = vcmp.ge.f32.partialorder %v6123_v30, 0.0  ;;  %v6155_v18 = vmul.f32 0.01, %v6123_v30  ;;  %v6512_v38 = vadd.f32 %v6496_v42, %v10778_v61 }
 0x5ee   : > { %v7279_v60 = vpack.c.bf16 %v6173_v32, %v6172_v6  ;;  %v6578_v40 = vsel %vm6546_vm4, %v6530_v24, %v6562_v20  ;;  %v6090_v51 = vmul.f32 %v10672_v19, %v10904_v16  ;;  %v6501_v49 = vmul.f32 %v11142_v17, %v10904_v16  ;;  %v11143_v24 = vld [vmem:[#allocation19_spill] sm:$0xff] }
 0x5ef   : > { %v7319_v12 = vpack.c.bf16 %v6578_v40, %v6577_v47  ;;  %v6171_v28 = vsel %vm6139_vm5, %v6123_v30, %v6155_v18  ;;  %v6528_v43 = vadd.f32 %v6512_v38, %v10921_v58  ;;  %v6088_v23 = vmul.f32 %v10904_v16, %v10674_v29 }
 0x5f0   : > { %7351 = vst [vmem:[%s10943_s30 + $0x8] sm:$0xff] %v7279_v60   ;;  %v7274_v5 = vpack.c.bf16 %v6171_v28, %v6170_v0  ;;  %v6106_v61 = vadd.f32 %v6090_v51, %v10781_v53  ;;  %v6517_v42 = vadd.f32 %v6501_v49, %v10790_v44  ;;  %v6499_v19 = vmul.f32 %v11143_v24, %v10904_v16  ;;  %v11144_v44 = vld [vmem:[#allocation21_spill] sm:$0xff] }
 0x5f1   : > { %7359 = vst [vmem:[%s10943_s30 + $0x48] sm:$0xff] %v7319_v12   ;;  %vm6544_vm6 = vcmp.ge.f32.partialorder %v6528_v43, 0.0  ;;  %v6560_v4 = vmul.f32 0.01, %v6528_v43  ;;  %v6104_v13 = vadd.f32 %v6088_v23, %v10799_v39  ;;  %v6091_v30 = vmul.f32 %v10677_v31, %v10904_v16 }
 0x5f2   : > { %7275 = vst [vmem:[%s10943_s30] sm:$0xff] %v7274_v5   ;;  %v6128_v29 = vadd.f32 %v10921_v58, %v6106_v61  ;;  %v6533_v62 = vadd.f32 %v6517_v42, %v10921_v58  ;;  %v6515_v53 = vadd.f32 %v6499_v19, %v10802_v54  ;;  %v6502_v6 = vmul.f32 %v11144_v44, %v10904_v16 }
 0x5f3   : > { %v6576_v47 = vsel %vm6544_vm6, %v6528_v43, %v6560_v4  ;;  %v6126_v33 = vadd.f32 %v10921_v58, %v6104_v13  ;;  %v6107_v0 = vadd.f32 %v6091_v30, %v10805_v21  ;;  %v6089_v39 = vmul.f32 %v10904_v16, %v10683_v26  ;;  %v11145_v43 = vld [vmem:[#allocation23_spill] sm:$0xff] }
 0x5f4   : > { %v7314_v31 = vpack.c.bf16 %v6576_v47, %v6575_v15  ;;  %vm6144_vm2 = vcmp.ge.f32.partialorder %v6128_v29, 0.0  ;;  %v6160_v20 = vmul.f32 0.01, %v6128_v29  ;;  %vm6549_vm7 = vcmp.ge.f32.partialorder %v6533_v62, 0.0 }
 0x5f5   : > { %v6565_v32 = vmul.f32 0.01, %v6533_v62  ;;  %vm6142_vm8 = vcmp.ge.f32.partialorder %v6126_v33, 0.0  ;;  %v6158_v18 = vmul.f32 0.01, %v6126_v33  ;;  %v6531_v54 = vadd.f32 %v6515_v53, %v10921_v58 }
 0x5f6   : > { %7358 = vst [vmem:[%s10943_s30 + $0x40] sm:$0xff] %v7314_v31   ;;  %v6176_v38 = vsel %vm6144_vm2, %v6128_v29, %v6160_v20  ;;  %v6129_v60 = vadd.f32 %v10921_v58, %v6107_v0  ;;  %v6518_v40 = vadd.f32 %v6502_v6, %v10808_v27  ;;  %v6105_v21 = vadd.f32 %v6089_v39, %v10811_v57  ;;  %v11146_v57 = vld [vmem:[#allocation25_spill] sm:$0xff] }
 0x5f7   : > { %v6581_v51 = vsel %vm6549_vm7, %v6533_v62, %v6565_v32  ;;  %v6174_v17 = vsel %vm6142_vm8, %v6126_v33, %v6158_v18  ;;  %vm6547_vm9 = vcmp.ge.f32.partialorder %v6531_v54, 0.0  ;;  %v6563_v26 = vmul.f32 0.01, %v6531_v54  ;;  %v11147_v62 = vld [vmem:[#allocation26_spill] sm:$0xff] }
 0x5f8   : > { %vm6145_vm10 = vcmp.ge.f32.partialorder %v6129_v60, 0.0  ;;  %v6161_v15 = vmul.f32 0.01, %v6129_v60  ;;  %v6534_v49 = vadd.f32 %v6518_v40, %v10921_v58  ;;  %v6127_v12 = vadd.f32 %v10921_v58, %v6105_v21 }
 0x5f9   : > { %v6579_v28 = vsel %vm6547_vm9, %v6531_v54, %v6563_v26  ;;  %v6500_v23 = vmul.f32 %v11145_v43, %v10904_v16  ;;  %v6094_v27 = vmul.f32 %v10696_v36, %v10904_v16  ;;  %v6505_v5 = vmul.f32 %v11146_v57, %v10904_v16 }
 0x5fa   : > { %v6177_v61 = vsel %vm6145_vm10, %v6129_v60, %v6161_v15  ;;  %vm6550_vm11 = vcmp.ge.f32.partialorder %v6534_v49, 0.0  ;;  %v6566_v42 = vmul.f32 0.01, %v6534_v49  ;;  %vm6143_vm12 = vcmp.ge.f32.partialorder %v6127_v12, 0.0 }
 0x5fb   : > { %v7289_v24 = vpack.c.bf16 %v6177_v61, %v6176_v38  ;;  %v6159_v19 = vmul.f32 0.01, %v6127_v12  ;;  %v6516_v4 = vadd.f32 %v6500_v23, %v10822_v7  ;;  %v6110_v13 = vadd.f32 %v6094_v27, %v10831_v63 }
 0x5fc   : > { %v6582_v30 = vsel %vm6550_vm11, %v6534_v49, %v6566_v42  ;;  %v6521_v29 = vadd.f32 %v6505_v5, %v10834_v45  ;;  %v6092_v36 = vmul.f32 %v10904_v16, %v10698_v52  ;;  %v6503_v53 = vmul.f32 %v11147_v62, %v10904_v16 }
 0x5fd   : > { %7353 = vst [vmem:[%s10943_s30 + $0x18] sm:$0xff] %v7289_v24   ;;  %v7329_v44 = vpack.c.bf16 %v6582_v30, %v6581_v51  ;;  %v6175_v6 = vsel %vm6143_vm12, %v6127_v12, %v6159_v19  ;;  %v6532_v47 = vadd.f32 %v6516_v4, %v10921_v58  ;;  %v6132_v33 = vadd.f32 %v10921_v58, %v6110_v13 }
 0x5fe   : > { %v7284_v7 = vpack.c.bf16 %v6175_v6, %v6174_v17  ;;  %v6537_v63 = vadd.f32 %v6521_v29, %v10921_v58  ;;  %v6108_v0 = vadd.f32 %v6092_v36, %v10837_v55  ;;  %v6519_v45 = vadd.f32 %v6503_v53, %v10840_v37  ;;  %v11148_v55 = vld [vmem:[#allocation27_spill] sm:$0xff] }
 0x5ff   : > { %7361 = vst [vmem:[%s10943_s30 + $0x58] sm:$0xff] %v7329_v44   ;;  %vm6548_vm13 = vcmp.ge.f32.partialorder %v6532_v47, 0.0  ;;  %v6564_v52 = vmul.f32 0.01, %v6532_v47  ;;  %vm6148_vm0 = vcmp.ge.f32.partialorder %v6132_v33, 0.0  ;;  %v6095_v54 = vmul.f32 %v10701_v35, %v10904_v16  ;;  %v11149_v35 = vld [vmem:[#allocation28_spill] sm:$0xff] }
 0x600   : > { %v6164_v39 = vmul.f32 0.01, %v6132_v33  ;;  %7352 = vst [vmem:[%s10943_s30 + $0x10] sm:$0xff] %v7284_v7   ;;  %vm6553_vm14 = vcmp.ge.f32.partialorder %v6537_v63, 0.0  ;;  %v6569_v31 = vmul.f32 0.01, %v6537_v63  ;;  %v6130_v20 = vadd.f32 %v10921_v58, %v6108_v0 }
 0x601   : > { %v6535_v32 = vadd.f32 %v6519_v45, %v10921_v58  ;;  %v6580_v18 = vsel %vm6548_vm13, %v6532_v47, %v6564_v52  ;;  %v6506_v37 = vmul.f32 %v11148_v55, %v10904_v16  ;;  %v6111_v51 = vadd.f32 %v6095_v54, %v10843_v22  ;;  %v11150_v0 = vld [vmem:[#allocation29_spill] sm:$0xff] }
 0x602   : > { %v7324_v38 = vpack.c.bf16 %v6580_v18, %v6579_v28  ;;  %v6180_v60 = vsel %vm6148_vm0, %v6132_v33, %v6164_v39  ;;  %vm6146_vm15 = vcmp.ge.f32.partialorder %v6130_v20, 0.0  ;;  %v6162_v40 = vmul.f32 0.01, %v6130_v20  ;;  %v11153_v18 = vld [vmem:[#allocation14_spill] sm:$0xff] }
 0x603   : > { %v6585_v21 = vsel %vm6553_vm14, %v6537_v63, %v6569_v31  ;;  %vm6551_vm1 = vcmp.ge.f32.partialorder %v6535_v32, 0.0  ;;  %v6522_v17 = vadd.f32 %v6506_v37, %v10846_v10  ;;  %v6567_v26 = vmul.f32 0.01, %v6535_v32  ;;  %v11151_v31 = vld [vmem:[#allocation4_spill] sm:$0xff] }
 0x604   : > { %7360 = vst [vmem:[%s10943_s30 + $0x50] sm:$0xff] %v7324_v38   ;;  %v6093_v15 = vmul.f32 %v10904_v16, %v10703_v11  ;;  %v6504_v49 = vmul.f32 %v11149_v35, %v10904_v16  ;;  %v6098_v12 = vmul.f32 %v10714_v50, %v10904_v16  ;;  %v6178_v28 = vsel %vm6146_vm15, %v6130_v20, %v6162_v40 }
 0x605   : > { %v6133_v43 = vadd.f32 %v10921_v58, %v6111_v51  ;;  %v6538_v23 = vadd.f32 %v6522_v17, %v10921_v58  ;;  %v6509_v22 = vmul.f32 %v10644_v25, %v10904_v16  ;;  %v6096_v57 = vmul.f32 %v10904_v16, %v10716_v56 }
 0x606   : > { %v6109_v10 = vadd.f32 %v6093_v15, %v10857_v1  ;;  %v6520_v27 = vadd.f32 %v6504_v49, %v10866_v14  ;;  %v6114_v11 = vadd.f32 %v6098_v12, %v10869_v2  ;;  %v6507_v56 = vmul.f32 %v10648_v48, %v10904_v16 }
 0x607   : > { %vm6149_vm3 = vcmp.ge.f32.partialorder %v6133_v43, 0.0  ;;  %v6165_v5 = vmul.f32 0.01, %v6133_v43  ;;  %vm6554_vm4 = vcmp.ge.f32.partialorder %v6538_v23, 0.0  ;;  %v6570_v50 = vmul.f32 0.01, %v6538_v23 }
 0x608   : > { %v6131_v61 = vadd.f32 %v10921_v58, %v6109_v10  ;;  %v6536_v42 = vadd.f32 %v6520_v27, %v10921_v58  ;;  %v6136_v25 = vadd.f32 %v10921_v58, %v6114_v11  ;;  %v6525_v1 = vadd.f32 %v6509_v22, %v10872_v46 }
 0x609   : > { %v6181_v14 = vsel %vm6149_vm3, %v6133_v43, %v6165_v5  ;;  %v6586_v24 = vsel %vm6554_vm4, %v6538_v23, %v6570_v50  ;;  %v6112_v2 = vadd.f32 %v6096_v57, %v10877_v9  ;;  %v6583_v30 = vsel %vm6551_vm1, %v6535_v32, %v6567_v26 }
 0x60a   : > { %v7299_v19 = vpack.c.bf16 %v6181_v14, %v6180_v60  ;;  %v7339_v4 = vpack.c.bf16 %v6586_v24, %v6585_v21  ;;  %vm6147_vm5 = vcmp.ge.f32.partialorder %v6131_v61, 0.0  ;;  %v6163_v13 = vmul.f32 0.01, %v6131_v61 }
 0x60b   : > { %vm6552_vm6 = vcmp.ge.f32.partialorder %v6536_v42, 0.0  ;;  %v6568_v29 = vmul.f32 0.01, %v6536_v42  ;;  %v6541_v36 = vadd.f32 %v6525_v1, %v10921_v58  ;;  %v6134_v9 = vadd.f32 %v10921_v58, %v6112_v2 }
 0x60c   : > { %7355 = vst [vmem:[%s10943_s30 + $0x28] sm:$0xff] %v7299_v19   ;;  %7363 = vst [vmem:[%s10943_s30 + $0x68] sm:$0xff] %v7339_v4   ;;  %v6179_v46 = vsel %vm6147_vm5, %v6131_v61, %v6163_v13  ;;  %v6523_v62 = vadd.f32 %v6507_v56, %v10880_v34  ;;  %v6099_v44 = vmul.f32 %v10721_v59, %v10904_v16  ;;  %v6168_v47 = vmul.f32 0.01, %v6136_v25 }
 0x60d   : > { %v7294_v48 = vpack.c.bf16 %v6179_v46, %v6178_v28  ;;  %v6584_v53 = vsel %vm6552_vm6, %v6536_v42, %v6568_v29  ;;  %v6510_v63 = vmul.f32 %v10652_v3, %v10904_v16  ;;  %vm6152_vm2 = vcmp.ge.f32.partialorder %v6136_v25, 0.0 }
 0x60e   : > { %v7334_v6 = vpack.c.bf16 %v6584_v53, %v6583_v30  ;;  %v6539_v33 = vadd.f32 %v6523_v62, %v10921_v58  ;;  %v6115_v7 = vadd.f32 %v6099_v44, %v10883_v41  ;;  %v6097_v34 = vmul.f32 %v10904_v16, %v10723_v8  ;;  %v11152_v41 = vld [vmem:[#allocation5_spill] sm:$0xff] }
 0x60f   : > { %7354 = vst [vmem:[%s10943_s30 + $0x20] sm:$0xff] %v7294_v48   ;;  %v6508_v45 = vmul.f32 %v11150_v0, %v10904_v16  ;;  %vm6557_vm7 = vcmp.ge.f32.partialorder %v6541_v36, 0.0  ;;  %v6573_v59 = vmul.f32 0.01, %v6541_v36  ;;  %v6166_v52 = vmul.f32 0.01, %v6134_v9 }
 0x610   : > { %7362 = vst [vmem:[%s10943_s30 + $0x60] sm:$0xff] %v7334_v6   ;;  %v6137_v39 = vadd.f32 %v10921_v58, %v6115_v7  ;;  %vm6150_vm8 = vcmp.ge.f32.partialorder %v6134_v9, 0.0  ;;  %v6526_v20 = vadd.f32 %v6510_v63, %v11151_v31  ;;  %v6113_v32 = vadd.f32 %v6097_v34, %v11152_v41 }
 0x611   : > { %v6524_v3 = vadd.f32 %v6508_v45, %v11153_v18  ;;  %v6184_v54 = vsel %vm6152_vm2, %v6136_v25, %v6168_v47  ;;  %v6571_v55 = vmul.f32 0.01, %v6539_v33  ;;  %vm6555_vm10 = vcmp.ge.f32.partialorder %v6539_v33, 0.0 }
 0x612   : > { %vm6153_vm9 = vcmp.ge.f32.partialorder %v6137_v39, 0.0  ;;  %v6169_v37 = vmul.f32 0.01, %v6137_v39  ;;  %v6542_v8 = vadd.f32 %v6526_v20, %v10921_v58  ;;  %v6135_v16 = vadd.f32 %v10921_v58, %v6113_v32 }
 0x613   : > { %v6540_v38 = vadd.f32 %v6524_v3, %v10921_v58  ;;  %v6589_v60 = vsel %vm6557_vm7, %v6541_v36, %v6573_v59  ;;  %v6182_v40 = vsel %vm6150_vm8, %v6134_v9, %v6166_v52  ;;  %v6587_v26 = vsel %vm6555_vm10, %v6539_v33, %v6571_v55 }
 0x614   : > { %v6185_v21 = vsel %vm6153_vm9, %v6137_v39, %v6169_v37  ;;  %vm6558_vm11 = vcmp.ge.f32.partialorder %v6542_v8, 0.0  ;;  %v6574_v17 = vmul.f32 0.01, %v6542_v8  ;;  %vm6151_vm12 = vcmp.ge.f32.partialorder %v6135_v16, 0.0 }
 0x615   : > { %v7309_v51 = vpack.c.bf16 %v6185_v21, %v6184_v54  ;;  %v6167_v15 = vmul.f32 0.01, %v6135_v16  ;;  %vm6556_vm13 = vcmp.ge.f32.partialorder %v6540_v38, 0.0  ;;  %v6572_v35 = vmul.f32 0.01, %v6540_v38 }
 0x616   : > { %v6590_v49 = vsel %vm6558_vm11, %v6542_v8, %v6574_v17 }
 0x617   : > { %7357 = vst [vmem:[%s10943_s30 + $0x38] sm:$0xff] %v7309_v51   ;;  %v7349_v12 = vpack.c.bf16 %v6590_v49, %v6589_v60  ;;  %v6183_v28 = vsel %vm6151_vm12, %v6135_v16, %v6167_v15  ;;  %v6588_v58 = vsel %vm6556_vm13, %v6540_v38, %v6572_v35 }
 0x618   : > { %v7304_v43 = vpack.c.bf16 %v6183_v28, %v6182_v40  ;;  %v7344_v23 = vpack.c.bf16 %v6588_v58, %v6587_v26 }
 0x619   : > { %7365 = vst [vmem:[%s10943_s30 + $0x78] sm:$0xff] %v7349_v12  }
 0x61a   : > { %7356 = vst [vmem:[%s10943_s30 + $0x30] sm:$0xff] %v7304_v43   ;;  %7364 = vst [vmem:[%s10943_s30 + $0x70] sm:$0xff] %v7344_v23  }
 0x61b PF: > { %s24_s29 = sadd.s32 1, %s8445_s29  }
 0x61c   : > { %p21_p4 = scmp.ge.s32.totalorder %s24_s29, 4  }
 0x61e   :  { %23 = sbr.rel (!%p21_p4) target bundleno = 1 (0x1), region = 118 }

</bundles_post_ra>
